<compile_context>
chip_gen: v6e
topology: v6e:2x2x1
jax: 0.10.0
libtpu: 0.0.40
codegen_flags: <defaults>
</compile_context>

<pallas_src>
import math

import jax
import jax.numpy as jnp
from jax.experimental import pallas as pl
from jax.experimental.pallas import tpu as pltpu

D_MODEL = 128
N_HEAD = 8
HEAD_DIM = D_MODEL // N_HEAD
D_FF = 2048            # PyTorch TransformerEncoderLayer default dim_feedforward (d_hid arg unused)
N_LAYERS = 6
LN_EPS = 1e-5
PE_LEN = 25
LOGITS = 2
LOGITS_PAD = 128       # lane-dense logits block; wrapper slices [:, :2]


# ----------------------------------------------------------------------------- kernel
def _layer_norm(x, gamma, beta):
    mu = jnp.mean(x, axis=-1, keepdims=True)
    var = jnp.mean((x - mu) ** 2, axis=-1, keepdims=True)
    return (x - mu) * jax.lax.rsqrt(var + LN_EPS) * gamma + beta


def encoder_stack_kernel(
    x_ref,                                        # (B_TILE, S, D) f32  embedded input tile
    wqkv_ref, bqkv_ref,                           # (L, D, 3D) bf16 / (L, 1, 3D) f32
    wo_ref, bo_ref,                               # (L, D, D) bf16 / (L, 1, D) f32
    g1_ref, be1_ref,                              # LayerNorm1 (L, 1, D)
    w1_ref, b1_ref, w2_ref, b2_ref,               # FFN (bf16 weights, f32 biases)
    g2_ref, be2_ref,                              # LayerNorm2 (L, 1, D)
    wout_ref, bout_ref,                           # logits head (D, 128) / (1, 128) f32 (padded)
    out_ref,                                      # out: (B_TILE, 1, 128) f32
):
    b_tile, S, _ = x_ref.shape
    M = b_tile * S

    def layer_body(l, x):                         # x: (M, D) f32, resident across layers
        xb = x.astype(jnp.bfloat16)

        # fused QKV projection (1/sqrt(head_dim) folded into Q weight columns at init)
        qkv = jnp.dot(xb, wqkv_ref[l], preferred_element_type=jnp.float32) + bqkv_ref[l]
        qkv3 = qkv.reshape(b_tile, S, 3 * D_MODEL)        # leading split only (cheap)

        # attention, batched over the batch-tile axis; static unroll over heads
        ctx_heads = []
        for h in range(N_HEAD):
            q = qkv3[..., h * HEAD_DIM:(h + 1) * HEAD_DIM]
            k = qkv3[..., D_MODEL + h * HEAD_DIM:D_MODEL + (h + 1) * HEAD_DIM]
            v = qkv3[..., 2 * D_MODEL + h * HEAD_DIM:2 * D_MODEL + (h + 1) * HEAD_DIM]
            s = jnp.einsum('bqd,bkd->bqk', q, k,
                           preferred_element_type=jnp.float32)       # (B_TILE, S, S)
            s = s - jnp.max(s, axis=-1, keepdims=True)
            p = jnp.exp(s)
            p = p / jnp.sum(p, axis=-1, keepdims=True)                # exact softmax denom
            ctx_heads.append(jnp.einsum('bqk,bkd->bqd', p, v,
                                        preferred_element_type=jnp.float32))
        ctx = jnp.concatenate(ctx_heads, axis=-1).reshape(M, D_MODEL)  # (M, D)

        # out-projection over all heads
        attn = jnp.dot(ctx.astype(jnp.bfloat16), wo_ref[l],
                       preferred_element_type=jnp.float32) + bo_ref[l]
        x1 = _layer_norm(x + attn, g1_ref[l], be1_ref[l])              # post-norm

        # feed-forward (relu)
        h1 = jnp.dot(x1.astype(jnp.bfloat16), w1_ref[l],
                     preferred_element_type=jnp.float32) + b1_ref[l]
        h1 = jnp.maximum(h1, 0.0)
        ff = jnp.dot(h1.astype(jnp.bfloat16), w2_ref[l],
                     preferred_element_type=jnp.float32) + b2_ref[l]
        return _layer_norm(x1 + ff, g2_ref[l], be2_ref[l])

    x0 = x_ref[...].reshape(M, D_MODEL)
    xf = jax.lax.fori_loop(0, N_LAYERS, layer_body, x0)                # 6 resident layers

    # logits head for the CLS rows only (row 0 of each sequence), 128-lane padded output
    cls = xf.reshape(b_tile, S, D_MODEL)[:, 0, :]                      # (B_TILE, D)
    logits = jnp.dot(cls, wout_ref[...],
                     preferred_element_type=jnp.float32) + bout_ref[...]
    out_ref[...] = logits[:, None, :]                                  # (B_TILE, 1, 128)


# ----------------------------------------------------------------------------- wrapper
def _pick_b_tile(B, S):
    """Largest useful batch tile: prefer >=128 rows per tile, and >=2 tiles (megacore)
    when that still leaves >=128 rows per tile.  Always a divisor of B."""
    divs = [d for d in range(1, B + 1) if B % d == 0]
    ok = [d for d in divs if d * S >= 128]
    if not ok:
        return B
    two_plus = [d for d in ok if B // d >= 2]
    return min(two_plus) if two_plus else min(ok)


def encoder_forward_pallas(x, p):
    B, S, _ = x.shape
    b_tile = _pick_b_tile(B, S)
    grid = (B // b_tile,)

    xmap = lambda b: (b, 0, 0)        # per-batch-tile block
    wmap3 = lambda b: (0, 0, 0)       # constant: full weight stack resident in VMEM
    wmap2 = lambda b: (0, 0)

    out = pl.pallas_call(
        encoder_stack_kernel,
        out_shape=jax.ShapeDtypeStruct((B, 1, LOGITS_PAD), jnp.float32),
        grid=grid,
        in_specs=[
            pl.BlockSpec((b_tile, S, D_MODEL), xmap),                    # x
            pl.BlockSpec((N_LAYERS, D_MODEL, 3 * D_MODEL), wmap3),       # wqkv (bf16)
            pl.BlockSpec((N_LAYERS, 1, 3 * D_MODEL), wmap3),             # bqkv
            pl.BlockSpec((N_LAYERS, D_MODEL, D_MODEL), wmap3),           # wo (bf16)
            pl.BlockSpec((N_LAYERS, 1, D_MODEL), wmap3),                 # bo
            pl.BlockSpec((N_LAYERS, 1, D_MODEL), wmap3),                 # ln1 gamma
            pl.BlockSpec((N_LAYERS, 1, D_MODEL), wmap3),                 # ln1 beta
            pl.BlockSpec((N_LAYERS, D_MODEL, D_FF), wmap3),              # w1 (bf16)
            pl.BlockSpec((N_LAYERS, 1, D_FF), wmap3),                    # b1
            pl.BlockSpec((N_LAYERS, D_FF, D_MODEL), wmap3),              # w2 (bf16)
            pl.BlockSpec((N_LAYERS, 1, D_MODEL), wmap3),                 # b2
            pl.BlockSpec((N_LAYERS, 1, D_MODEL), wmap3),                 # ln2 gamma
            pl.BlockSpec((N_LAYERS, 1, D_MODEL), wmap3),                 # ln2 beta
            pl.BlockSpec((D_MODEL, LOGITS_PAD), wmap2),                  # w_logits (padded)
            pl.BlockSpec((1, LOGITS_PAD), wmap2),                        # b_logits (padded)
        ],
        out_specs=pl.BlockSpec((b_tile, 1, LOGITS_PAD), xmap),
        compiler_params=pltpu.CompilerParams(
            dimension_semantics=("parallel",),
            vmem_limit_bytes=32 * 1024 * 1024),
    )(x, p["wqkv"], p["bqkv"], p["wo"], p["bo"], p["g1"], p["be1"],
      p["w1"], p["b1"], p["w2"], p["b2"], p["g2"], p["be2"],
      p["w_logits_pad"], p["b_logits_pad"])
    return out[:, 0, :LOGITS]                                            # (B, 2)


# ----------------------------------------------------------------------------- params / glue
def positional_encoding_1d(d_model, length):
    position = jnp.arange(length, dtype=jnp.float32)[:, None]
    div_term = jnp.exp(jnp.arange(0, d_model, 2, dtype=jnp.float32)
                       * -(math.log(10000.0) / d_model))
    pe = jnp.zeros((length, d_model), jnp.float32)
    pe = pe.at[:, 0::2].set(jnp.sin(position * div_term))
    pe = pe.at[:, 1::2].set(jnp.cos(position * div_term))
    return pe


def xavier_uniform(key, shape):
    fan_out, fan_in = shape
    bound = math.sqrt(6.0 / (fan_in + fan_out))
    return jax.random.uniform(key, shape, jnp.float32, -bound, bound)


def init_params(key, n_tokens):
    vocab = n_tokens + 2
    keys = jax.random.split(key, 3 + N_LAYERS)
    embed = jax.random.normal(keys[0], (vocab, D_MODEL), jnp.float32)   # nn.Embedding ~ N(0,1)
    lim = 1.0 / math.sqrt(D_MODEL)
    w_logits = jax.random.uniform(keys[1], (D_MODEL, LOGITS), jnp.float32, -lim, lim)
    b_logits = jax.random.uniform(keys[2], (LOGITS,), jnp.float32, -lim, lim)
    w_logits_pad = jnp.zeros((D_MODEL, LOGITS_PAD), jnp.float32).at[:, :LOGITS].set(w_logits)
    b_logits_pad = jnp.zeros((1, LOGITS_PAD), jnp.float32).at[0, :LOGITS].set(b_logits)

    scale = 1.0 / math.sqrt(HEAD_DIM)
    cols = {k: [] for k in
            ("wqkv", "bqkv", "wo", "bo", "g1", "be1", "w1", "b1", "w2", "b2", "g2", "be2")}
    for li in range(N_LAYERS):
        ks = jax.random.split(keys[3 + li], 6)
        # PyTorch-shaped weights, xavier-uniform (use_xavier=True); MHA biases zero,
        # FFN biases keep the nn.Linear default uniform init (dim==1 -> not xavier'd).
        in_proj = xavier_uniform(ks[0], (3 * D_MODEL, D_MODEL))          # (3D, D)
        out_proj = xavier_uniform(ks[1], (D_MODEL, D_MODEL))             # (D, D)
        lin1 = xavier_uniform(ks[2], (D_FF, D_MODEL))                    # (DFF, D)
        lin2 = xavier_uniform(ks[3], (D_MODEL, D_FF))                    # (D, DFF)

        wqkv = in_proj.T                                                 # (D, 3D): [q | k | v]
        wqkv = wqkv.at[:, :D_MODEL].multiply(scale)                      # fold 1/sqrt(head_dim) into Q
        bqkv = jnp.zeros((1, 3 * D_MODEL), jnp.float32)                  # Q bias zero -> folding valid

        cols["wqkv"].append(wqkv)
        cols["bqkv"].append(bqkv)
        cols["wo"].append(out_proj.T)
        cols["bo"].append(jnp.zeros((1, D_MODEL), jnp.float32))
        cols["g1"].append(jnp.ones((1, D_MODEL), jnp.float32))
        cols["be1"].append(jnp.zeros((1, D_MODEL), jnp.float32))
        cols["w1"].append(lin1.T)
        cols["b1"].append(jax.random.uniform(ks[4], (1, D_FF), jnp.float32,
                                             -1.0 / math.sqrt(D_MODEL), 1.0 / math.sqrt(D_MODEL)))
        cols["w2"].append(lin2.T)
        cols["b2"].append(jax.random.uniform(ks[5], (1, D_MODEL), jnp.float32,
                                             -1.0 / math.sqrt(D_FF), 1.0 / math.sqrt(D_FF)))
        cols["g2"].append(jnp.ones((1, D_MODEL), jnp.float32))
        cols["be2"].append(jnp.zeros((1, D_MODEL), jnp.float32))

    bf16_keys = ("wqkv", "wo", "w1", "w2")        # large matrices kept resident as bf16
    params = {"embed": embed, "pe": positional_encoding_1d(D_MODEL, PE_LEN),
              "w_logits_pad": w_logits_pad, "b_logits_pad": b_logits_pad}
    for k, v in cols.items():
        params[k] = jnp.stack(v).astype(jnp.bfloat16 if k in bf16_keys else jnp.float32)
    return params


@jax.jit
def simple_encoder_forward(params, input_ids, attention_mask):
    # attention_mask mirrors the PyTorch signature but, exactly like the reference forward,
    # is never passed to the encoder (unused).
    del attention_mask
    S = input_ids.shape[1]
    # TODO(synk): embedding gather + PE add stay in plain JAX (tiny gather, not worth a kernel).
    # Note: the reference forward does NOT scale the embedding by sqrt(d_model), so neither do we.
    x = jnp.take(params["embed"], input_ids, axis=0) + params["pe"][:S]
    return encoder_forward_pallas(x, params)


if __name__ == "__main__":
    key = jax.random.PRNGKey(0)
    kp, kd = jax.random.split(key)
    n_tokens = 30
    B, S = 2, 8                        # S <= 25 (positional-encoding table length)
    params = init_params(kp, n_tokens)
    input_ids = jax.random.randint(kd, (B, S), 0, n_tokens + 2, dtype=jnp.int32)
    attention_mask = jnp.ones((B, S), jnp.int32)
    logits = simple_encoder_forward(params, input_ids, attention_mask)
    jax.block_until_ready(logits)
    assert logits.shape == (B, LOGITS) and logits.dtype == jnp.float32
    print("KERNEL_OK")
</pallas_src>

<mosaic_0001>
module attributes {stable_mosaic.version = 11 : i64} {
  func.func @encoder_stack_kernel(%arg0: i32, %arg1: memref<2x8x128xf32, #tpu.memory_space<vmem>>, %arg2: memref<6x128x384xbf16, #tpu.memory_space<vmem>>, %arg3: memref<6x1x384xf32, #tpu.memory_space<vmem>>, %arg4: memref<6x128x128xbf16, #tpu.memory_space<vmem>>, %arg5: memref<6x1x128xf32, #tpu.memory_space<vmem>>, %arg6: memref<6x1x128xf32, #tpu.memory_space<vmem>>, %arg7: memref<6x1x128xf32, #tpu.memory_space<vmem>>, %arg8: memref<6x128x2048xbf16, #tpu.memory_space<vmem>>, %arg9: memref<6x1x2048xf32, #tpu.memory_space<vmem>>, %arg10: memref<6x2048x128xbf16, #tpu.memory_space<vmem>>, %arg11: memref<6x1x128xf32, #tpu.memory_space<vmem>>, %arg12: memref<6x1x128xf32, #tpu.memory_space<vmem>>, %arg13: memref<6x1x128xf32, #tpu.memory_space<vmem>>, %arg14: memref<128x128xf32, #tpu.memory_space<vmem>>, %arg15: memref<1x128xf32, #tpu.memory_space<vmem>>, %arg16: memref<2x1x128xf32, #tpu.memory_space<vmem>>) attributes {dimension_semantics = [#tpu.dimension_semantics<parallel>], iteration_bounds = array<i64: 1>, scalar_prefetch = 0 : i64, scratch_operands = 0 : i64, tpu.core_type = #tpu.core_type<tc>, window_params = [{transform_indices = @transform_0, window_bounds = array<i64: 2, 8, 128>}, {pipeline_mode = #tpu.pipeline_mode<synchronous>, transform_indices = @transform_1, window_bounds = array<i64: 6, 128, 384>}, {pipeline_mode = #tpu.pipeline_mode<synchronous>, transform_indices = @transform_2, window_bounds = array<i64: 6, 1, 384>}, {pipeline_mode = #tpu.pipeline_mode<synchronous>, transform_indices = @transform_3, window_bounds = array<i64: 6, 128, 128>}, {pipeline_mode = #tpu.pipeline_mode<synchronous>, transform_indices = @transform_4, window_bounds = array<i64: 6, 1, 128>}, {pipeline_mode = #tpu.pipeline_mode<synchronous>, transform_indices = @transform_5, window_bounds = array<i64: 6, 1, 128>}, {pipeline_mode = #tpu.pipeline_mode<synchronous>, transform_indices = @transform_6, window_bounds = array<i64: 6, 1, 128>}, {pipeline_mode = #tpu.pipeline_mode<synchronous>, transform_indices = @transform_7, window_bounds = array<i64: 6, 128, 2048>}, {pipeline_mode = #tpu.pipeline_mode<synchronous>, transform_indices = @transform_8, window_bounds = array<i64: 6, 1, 2048>}, {pipeline_mode = #tpu.pipeline_mode<synchronous>, transform_indices = @transform_9, window_bounds = array<i64: 6, 2048, 128>}, {pipeline_mode = #tpu.pipeline_mode<synchronous>, transform_indices = @transform_10, window_bounds = array<i64: 6, 1, 128>}, {pipeline_mode = #tpu.pipeline_mode<synchronous>, transform_indices = @transform_11, window_bounds = array<i64: 6, 1, 128>}, {pipeline_mode = #tpu.pipeline_mode<synchronous>, transform_indices = @transform_12, window_bounds = array<i64: 6, 1, 128>}, {pipeline_mode = #tpu.pipeline_mode<synchronous>, transform_indices = @transform_13, window_bounds = array<i64: 128, 128>}, {pipeline_mode = #tpu.pipeline_mode<synchronous>, transform_indices = @transform_14, window_bounds = array<i64: 1, 128>}, {transform_indices = @transform_15, window_bounds = array<i64: 2, 1, 128>}]} {
    %c0 = arith.constant 0 : index
    %c0_0 = arith.constant 0 : index
    %c0_1 = arith.constant 0 : index
    %0 = vector.load %arg1[%c0, %c0_0, %c0_1] : memref<2x8x128xf32, #tpu.memory_space<vmem>>, vector<2x8x128xf32>
    %1 = vector.shape_cast %0 : vector<2x8x128xf32> to vector<16x128xf32>
    %c0_i32 = arith.constant 0 : i32
    %c6_i32 = arith.constant 6 : i32
    %2 = arith.addi %c0_i32, %c6_i32 : i32
    %c1_i32 = arith.constant 1 : i32
    %3 = scf.for %arg17 = %c0_i32 to %2 step %c1_i32 iter_args(%arg18 = %1) -> (vector<16x128xf32>)  : i32 {
      %14 = arith.truncf %arg18 : vector<16x128xf32> to vector<16x128xbf16>
      %15 = arith.index_cast %arg17 : i32 to index
      %c0_10 = arith.constant 0 : index
      %c0_11 = arith.constant 0 : index
      %16 = vector.load %arg2[%15, %c0_10, %c0_11] : memref<6x128x384xbf16, #tpu.memory_space<vmem>>, vector<1x128x384xbf16>
      %17 = vector.shape_cast %16 : vector<1x128x384xbf16> to vector<128x384xbf16>
      %cst_12 = arith.constant dense<0.000000e+00> : vector<16x384xf32>
      %18 = tpu.matmul %14, %17, %cst_12 {dimension_numbers = #tpu.dot_dimension_numbers<[1], [0], [0], [1], [0, 0, 1, 1], [], []>} : vector<16x128xbf16>, vector<128x384xbf16>, vector<16x384xf32> -> vector<16x384xf32>
      %19 = arith.index_cast %arg17 : i32 to index
      %c0_13 = arith.constant 0 : index
      %c0_14 = arith.constant 0 : index
      %20 = vector.load %arg3[%19, %c0_13, %c0_14] : memref<6x1x384xf32, #tpu.memory_space<vmem>>, vector<1x1x384xf32>
      %21 = vector.shape_cast %20 : vector<1x1x384xf32> to vector<1x384xf32>
      %22 = vector.broadcast %21 : vector<1x384xf32> to vector<16x384xf32>
      %23 = arith.addf %18, %22 : vector<16x384xf32>
      %24 = vector.shape_cast %23 : vector<16x384xf32> to vector<2x8x384xf32>
      %25 = vector.extract_strided_slice %24 {offsets = [0, 0, 0], sizes = [2, 8, 16], strides = [1, 1, 1]} : vector<2x8x384xf32> to vector<2x8x16xf32>
      %26 = vector.extract_strided_slice %24 {offsets = [0, 0, 128], sizes = [2, 8, 16], strides = [1, 1, 1]} : vector<2x8x384xf32> to vector<2x8x16xf32>
      %27 = vector.extract_strided_slice %24 {offsets = [0, 0, 256], sizes = [2, 8, 16], strides = [1, 1, 1]} : vector<2x8x384xf32> to vector<2x8x16xf32>
      "tpu.trace_start"() <{level = 10 : i32, message = "bqd,bkd->bqk"}> : () -> ()
      %cst_15 = arith.constant dense<0.000000e+00> : vector<2x8x8xf32>
      %28 = tpu.matmul %25, %26, %cst_15 {dimension_numbers = #tpu.dot_dimension_numbers<[2], [2], [1], [1], [0, 0, 0, 1, 1, 1], [0], [0]>} : vector<2x8x16xf32>, vector<2x8x16xf32>, vector<2x8x8xf32> -> vector<2x8x8xf32>
      "tpu.trace_stop"() : () -> ()
      %cst_16 = arith.constant dense<0xFF800000> : vector<2x8xf32>
      %29 = vector.multi_reduction <maximumf>, %28, %cst_16 [2] : vector<2x8x8xf32> to vector<2x8xf32>
      %30 = vector.shape_cast %29 : vector<2x8xf32> to vector<2x8x1xf32>
      %31 = vector.broadcast %30 : vector<2x8x1xf32> to vector<2x8x8xf32>
      %32 = arith.subf %28, %31 : vector<2x8x8xf32>
      %33 = math.exp %32 : vector<2x8x8xf32>
      %cst_17 = arith.constant dense<0.000000e+00> : vector<2x8xf32>
      %34 = vector.multi_reduction <add>, %33, %cst_17 [2] : vector<2x8x8xf32> to vector<2x8xf32>
      %35 = vector.shape_cast %34 : vector<2x8xf32> to vector<2x8x1xf32>
      %36 = vector.broadcast %35 : vector<2x8x1xf32> to vector<2x8x8xf32>
      %37 = arith.divf %33, %36 : vector<2x8x8xf32>
      "tpu.trace_start"() <{level = 10 : i32, message = "bqk,bkd->bqd"}> : () -> ()
      %cst_18 = arith.constant dense<0.000000e+00> : vector<2x8x16xf32>
      %38 = tpu.matmul %37, %27, %cst_18 {dimension_numbers = #tpu.dot_dimension_numbers<[2], [1], [1], [2], [0, 0, 0, 1, 1, 2], [0], [0]>} : vector<2x8x8xf32>, vector<2x8x16xf32>, vector<2x8x16xf32> -> vector<2x8x16xf32>
      "tpu.trace_stop"() : () -> ()
      %39 = vector.extract_strided_slice %24 {offsets = [0, 0, 16], sizes = [2, 8, 16], strides = [1, 1, 1]} : vector<2x8x384xf32> to vector<2x8x16xf32>
      %40 = vector.extract_strided_slice %24 {offsets = [0, 0, 144], sizes = [2, 8, 16], strides = [1, 1, 1]} : vector<2x8x384xf32> to vector<2x8x16xf32>
      %41 = vector.extract_strided_slice %24 {offsets = [0, 0, 272], sizes = [2, 8, 16], strides = [1, 1, 1]} : vector<2x8x384xf32> to vector<2x8x16xf32>
      "tpu.trace_start"() <{level = 10 : i32, message = "bqd,bkd->bqk"}> : () -> ()
      %cst_19 = arith.constant dense<0.000000e+00> : vector<2x8x8xf32>
      %42 = tpu.matmul %39, %40, %cst_19 {dimension_numbers = #tpu.dot_dimension_numbers<[2], [2], [1], [1], [0, 0, 0, 1, 1, 1], [0], [0]>} : vector<2x8x16xf32>, vector<2x8x16xf32>, vector<2x8x8xf32> -> vector<2x8x8xf32>
      "tpu.trace_stop"() : () -> ()
      %cst_20 = arith.constant dense<0xFF800000> : vector<2x8xf32>
      %43 = vector.multi_reduction <maximumf>, %42, %cst_20 [2] : vector<2x8x8xf32> to vector<2x8xf32>
      %44 = vector.shape_cast %43 : vector<2x8xf32> to vector<2x8x1xf32>
      %45 = vector.broadcast %44 : vector<2x8x1xf32> to vector<2x8x8xf32>
      %46 = arith.subf %42, %45 : vector<2x8x8xf32>
      %47 = math.exp %46 : vector<2x8x8xf32>
      %cst_21 = arith.constant dense<0.000000e+00> : vector<2x8xf32>
      %48 = vector.multi_reduction <add>, %47, %cst_21 [2] : vector<2x8x8xf32> to vector<2x8xf32>
      %49 = vector.shape_cast %48 : vector<2x8xf32> to vector<2x8x1xf32>
      %50 = vector.broadcast %49 : vector<2x8x1xf32> to vector<2x8x8xf32>
      %51 = arith.divf %47, %50 : vector<2x8x8xf32>
      "tpu.trace_start"() <{level = 10 : i32, message = "bqk,bkd->bqd"}> : () -> ()
      %cst_22 = arith.constant dense<0.000000e+00> : vector<2x8x16xf32>
      %52 = tpu.matmul %51, %41, %cst_22 {dimension_numbers = #tpu.dot_dimension_numbers<[2], [1], [1], [2], [0, 0, 0, 1, 1, 2], [0], [0]>} : vector<2x8x8xf32>, vector<2x8x16xf32>, vector<2x8x16xf32> -> vector<2x8x16xf32>
      "tpu.trace_stop"() : () -> ()
      %53 = vector.extract_strided_slice %24 {offsets = [0, 0, 32], sizes = [2, 8, 16], strides = [1, 1, 1]} : vector<2x8x384xf32> to vector<2x8x16xf32>
      %54 = vector.extract_strided_slice %24 {offsets = [0, 0, 160], sizes = [2, 8, 16], strides = [1, 1, 1]} : vector<2x8x384xf32> to vector<2x8x16xf32>
      %55 = vector.extract_strided_slice %24 {offsets = [0, 0, 288], sizes = [2, 8, 16], strides = [1, 1, 1]} : vector<2x8x384xf32> to vector<2x8x16xf32>
      "tpu.trace_start"() <{level = 10 : i32, message = "bqd,bkd->bqk"}> : () -> ()
      %cst_23 = arith.constant dense<0.000000e+00> : vector<2x8x8xf32>
      %56 = tpu.matmul %53, %54, %cst_23 {dimension_numbers = #tpu.dot_dimension_numbers<[2], [2], [1], [1], [0, 0, 0, 1, 1, 1], [0], [0]>} : vector<2x8x16xf32>, vector<2x8x16xf32>, vector<2x8x8xf32> -> vector<2x8x8xf32>
      "tpu.trace_stop"() : () -> ()
      %cst_24 = arith.constant dense<0xFF800000> : vector<2x8xf32>
      %57 = vector.multi_reduction <maximumf>, %56, %cst_24 [2] : vector<2x8x8xf32> to vector<2x8xf32>
      %58 = vector.shape_cast %57 : vector<2x8xf32> to vector<2x8x1xf32>
      %59 = vector.broadcast %58 : vector<2x8x1xf32> to vector<2x8x8xf32>
      %60 = arith.subf %56, %59 : vector<2x8x8xf32>
      %61 = math.exp %60 : vector<2x8x8xf32>
      %cst_25 = arith.constant dense<0.000000e+00> : vector<2x8xf32>
      %62 = vector.multi_reduction <add>, %61, %cst_25 [2] : vector<2x8x8xf32> to vector<2x8xf32>
      %63 = vector.shape_cast %62 : vector<2x8xf32> to vector<2x8x1xf32>
      %64 = vector.broadcast %63 : vector<2x8x1xf32> to vector<2x8x8xf32>
      %65 = arith.divf %61, %64 : vector<2x8x8xf32>
      "tpu.trace_start"() <{level = 10 : i32, message = "bqk,bkd->bqd"}> : () -> ()
      %cst_26 = arith.constant dense<0.000000e+00> : vector<2x8x16xf32>
      %66 = tpu.matmul %65, %55, %cst_26 {dimension_numbers = #tpu.dot_dimension_numbers<[2], [1], [1], [2], [0, 0, 0, 1, 1, 2], [0], [0]>} : vector<2x8x8xf32>, vector<2x8x16xf32>, vector<2x8x16xf32> -> vector<2x8x16xf32>
      "tpu.trace_stop"() : () -> ()
      %67 = vector.extract_strided_slice %24 {offsets = [0, 0, 48], sizes = [2, 8, 16], strides = [1, 1, 1]} : vector<2x8x384xf32> to vector<2x8x16xf32>
      %68 = vector.extract_strided_slice %24 {offsets = [0, 0, 176], sizes = [2, 8, 16], strides = [1, 1, 1]} : vector<2x8x384xf32> to vector<2x8x16xf32>
      %69 = vector.extract_strided_slice %24 {offsets = [0, 0, 304], sizes = [2, 8, 16], strides = [1, 1, 1]} : vector<2x8x384xf32> to vector<2x8x16xf32>
      "tpu.trace_start"() <{level = 10 : i32, message = "bqd,bkd->bqk"}> : () -> ()
      %cst_27 = arith.constant dense<0.000000e+00> : vector<2x8x8xf32>
      %70 = tpu.matmul %67, %68, %cst_27 {dimension_numbers = #tpu.dot_dimension_numbers<[2], [2], [1], [1], [0, 0, 0, 1, 1, 1], [0], [0]>} : vector<2x8x16xf32>, vector<2x8x16xf32>, vector<2x8x8xf32> -> vector<2x8x8xf32>
      "tpu.trace_stop"() : () -> ()
      %cst_28 = arith.constant dense<0xFF800000> : vector<2x8xf32>
      %71 = vector.multi_reduction <maximumf>, %70, %cst_28 [2] : vector<2x8x8xf32> to vector<2x8xf32>
      %72 = vector.shape_cast %71 : vector<2x8xf32> to vector<2x8x1xf32>
      %73 = vector.broadcast %72 : vector<2x8x1xf32> to vector<2x8x8xf32>
      %74 = arith.subf %70, %73 : vector<2x8x8xf32>
      %75 = math.exp %74 : vector<2x8x8xf32>
      %cst_29 = arith.constant dense<0.000000e+00> : vector<2x8xf32>
      %76 = vector.multi_reduction <add>, %75, %cst_29 [2] : vector<2x8x8xf32> to vector<2x8xf32>
      %77 = vector.shape_cast %76 : vector<2x8xf32> to vector<2x8x1xf32>
      %78 = vector.broadcast %77 : vector<2x8x1xf32> to vector<2x8x8xf32>
      %79 = arith.divf %75, %78 : vector<2x8x8xf32>
      "tpu.trace_start"() <{level = 10 : i32, message = "bqk,bkd->bqd"}> : () -> ()
      %cst_30 = arith.constant dense<0.000000e+00> : vector<2x8x16xf32>
      %80 = tpu.matmul %79, %69, %cst_30 {dimension_numbers = #tpu.dot_dimension_numbers<[2], [1], [1], [2], [0, 0, 0, 1, 1, 2], [0], [0]>} : vector<2x8x8xf32>, vector<2x8x16xf32>, vector<2x8x16xf32> -> vector<2x8x16xf32>
      "tpu.trace_stop"() : () -> ()
      %81 = vector.extract_strided_slice %24 {offsets = [0, 0, 64], sizes = [2, 8, 16], strides = [1, 1, 1]} : vector<2x8x384xf32> to vector<2x8x16xf32>
      %82 = vector.extract_strided_slice %24 {offsets = [0, 0, 192], sizes = [2, 8, 16], strides = [1, 1, 1]} : vector<2x8x384xf32> to vector<2x8x16xf32>
      %83 = vector.extract_strided_slice %24 {offsets = [0, 0, 320], sizes = [2, 8, 16], strides = [1, 1, 1]} : vector<2x8x384xf32> to vector<2x8x16xf32>
      "tpu.trace_start"() <{level = 10 : i32, message = "bqd,bkd->bqk"}> : () -> ()
      %cst_31 = arith.constant dense<0.000000e+00> : vector<2x8x8xf32>
      %84 = tpu.matmul %81, %82, %cst_31 {dimension_numbers = #tpu.dot_dimension_numbers<[2], [2], [1], [1], [0, 0, 0, 1, 1, 1], [0], [0]>} : vector<2x8x16xf32>, vector<2x8x16xf32>, vector<2x8x8xf32> -> vector<2x8x8xf32>
      "tpu.trace_stop"() : () -> ()
      %cst_32 = arith.constant dense<0xFF800000> : vector<2x8xf32>
      %85 = vector.multi_reduction <maximumf>, %84, %cst_32 [2] : vector<2x8x8xf32> to vector<2x8xf32>
      %86 = vector.shape_cast %85 : vector<2x8xf32> to vector<2x8x1xf32>
      %87 = vector.broadcast %86 : vector<2x8x1xf32> to vector<2x8x8xf32>
      %88 = arith.subf %84, %87 : vector<2x8x8xf32>
      %89 = math.exp %88 : vector<2x8x8xf32>
      %cst_33 = arith.constant dense<0.000000e+00> : vector<2x8xf32>
      %90 = vector.multi_reduction <add>, %89, %cst_33 [2] : vector<2x8x8xf32> to vector<2x8xf32>
      %91 = vector.shape_cast %90 : vector<2x8xf32> to vector<2x8x1xf32>
      %92 = vector.broadcast %91 : vector<2x8x1xf32> to vector<2x8x8xf32>
      %93 = arith.divf %89, %92 : vector<2x8x8xf32>
      "tpu.trace_start"() <{level = 10 : i32, message = "bqk,bkd->bqd"}> : () -> ()
      %cst_34 = arith.constant dense<0.000000e+00> : vector<2x8x16xf32>
      %94 = tpu.matmul %93, %83, %cst_34 {dimension_numbers = #tpu.dot_dimension_numbers<[2], [1], [1], [2], [0, 0, 0, 1, 1, 2], [0], [0]>} : vector<2x8x8xf32>, vector<2x8x16xf32>, vector<2x8x16xf32> -> vector<2x8x16xf32>
      "tpu.trace_stop"() : () -> ()
      %95 = vector.extract_strided_slice %24 {offsets = [0, 0, 80], sizes = [2, 8, 16], strides = [1, 1, 1]} : vector<2x8x384xf32> to vector<2x8x16xf32>
      %96 = vector.extract_strided_slice %24 {offsets = [0, 0, 208], sizes = [2, 8, 16], strides = [1, 1, 1]} : vector<2x8x384xf32> to vector<2x8x16xf32>
      %97 = vector.extract_strided_slice %24 {offsets = [0, 0, 336], sizes = [2, 8, 16], strides = [1, 1, 1]} : vector<2x8x384xf32> to vector<2x8x16xf32>
      "tpu.trace_start"() <{level = 10 : i32, message = "bqd,bkd->bqk"}> : () -> ()
      %cst_35 = arith.constant dense<0.000000e+00> : vector<2x8x8xf32>
      %98 = tpu.matmul %95, %96, %cst_35 {dimension_numbers = #tpu.dot_dimension_numbers<[2], [2], [1], [1], [0, 0, 0, 1, 1, 1], [0], [0]>} : vector<2x8x16xf32>, vector<2x8x16xf32>, vector<2x8x8xf32> -> vector<2x8x8xf32>
      "tpu.trace_stop"() : () -> ()
      %cst_36 = arith.constant dense<0xFF800000> : vector<2x8xf32>
      %99 = vector.multi_reduction <maximumf>, %98, %cst_36 [2] : vector<2x8x8xf32> to vector<2x8xf32>
      %100 = vector.shape_cast %99 : vector<2x8xf32> to vector<2x8x1xf32>
      %101 = vector.broadcast %100 : vector<2x8x1xf32> to vector<2x8x8xf32>
      %102 = arith.subf %98, %101 : vector<2x8x8xf32>
      %103 = math.exp %102 : vector<2x8x8xf32>
      %cst_37 = arith.constant dense<0.000000e+00> : vector<2x8xf32>
      %104 = vector.multi_reduction <add>, %103, %cst_37 [2] : vector<2x8x8xf32> to vector<2x8xf32>
      %105 = vector.shape_cast %104 : vector<2x8xf32> to vector<2x8x1xf32>
      %106 = vector.broadcast %105 : vector<2x8x1xf32> to vector<2x8x8xf32>
      %107 = arith.divf %103, %106 : vector<2x8x8xf32>
      "tpu.trace_start"() <{level = 10 : i32, message = "bqk,bkd->bqd"}> : () -> ()
      %cst_38 = arith.constant dense<0.000000e+00> : vector<2x8x16xf32>
      %108 = tpu.matmul %107, %97, %cst_38 {dimension_numbers = #tpu.dot_dimension_numbers<[2], [1], [1], [2], [0, 0, 0, 1, 1, 2], [0], [0]>} : vector<2x8x8xf32>, vector<2x8x16xf32>, vector<2x8x16xf32> -> vector<2x8x16xf32>
      "tpu.trace_stop"() : () -> ()
      %109 = vector.extract_strided_slice %24 {offsets = [0, 0, 96], sizes = [2, 8, 16], strides = [1, 1, 1]} : vector<2x8x384xf32> to vector<2x8x16xf32>
      %110 = vector.extract_strided_slice %24 {offsets = [0, 0, 224], sizes = [2, 8, 16], strides = [1, 1, 1]} : vector<2x8x384xf32> to vector<2x8x16xf32>
      %111 = vector.extract_strided_slice %24 {offsets = [0, 0, 352], sizes = [2, 8, 16], strides = [1, 1, 1]} : vector<2x8x384xf32> to vector<2x8x16xf32>
      "tpu.trace_start"() <{level = 10 : i32, message = "bqd,bkd->bqk"}> : () -> ()
      %cst_39 = arith.constant dense<0.000000e+00> : vector<2x8x8xf32>
      %112 = tpu.matmul %109, %110, %cst_39 {dimension_numbers = #tpu.dot_dimension_numbers<[2], [2], [1], [1], [0, 0, 0, 1, 1, 1], [0], [0]>} : vector<2x8x16xf32>, vector<2x8x16xf32>, vector<2x8x8xf32> -> vector<2x8x8xf32>
      "tpu.trace_stop"() : () -> ()
      %cst_40 = arith.constant dense<0xFF800000> : vector<2x8xf32>
      %113 = vector.multi_reduction <maximumf>, %112, %cst_40 [2] : vector<2x8x8xf32> to vector<2x8xf32>
      %114 = vector.shape_cast %113 : vector<2x8xf32> to vector<2x8x1xf32>
      %115 = vector.broadcast %114 : vector<2x8x1xf32> to vector<2x8x8xf32>
      %116 = arith.subf %112, %115 : vector<2x8x8xf32>
      %117 = math.exp %116 : vector<2x8x8xf32>
      %cst_41 = arith.constant dense<0.000000e+00> : vector<2x8xf32>
      %118 = vector.multi_reduction <add>, %117, %cst_41 [2] : vector<2x8x8xf32> to vector<2x8xf32>
      %119 = vector.shape_cast %118 : vector<2x8xf32> to vector<2x8x1xf32>
      %120 = vector.broadcast %119 : vector<2x8x1xf32> to vector<2x8x8xf32>
      %121 = arith.divf %117, %120 : vector<2x8x8xf32>
      "tpu.trace_start"() <{level = 10 : i32, message = "bqk,bkd->bqd"}> : () -> ()
      %cst_42 = arith.constant dense<0.000000e+00> : vector<2x8x16xf32>
      %122 = tpu.matmul %121, %111, %cst_42 {dimension_numbers = #tpu.dot_dimension_numbers<[2], [1], [1], [2], [0, 0, 0, 1, 1, 2], [0], [0]>} : vector<2x8x8xf32>, vector<2x8x16xf32>, vector<2x8x16xf32> -> vector<2x8x16xf32>
      "tpu.trace_stop"() : () -> ()
      %123 = vector.extract_strided_slice %24 {offsets = [0, 0, 112], sizes = [2, 8, 16], strides = [1, 1, 1]} : vector<2x8x384xf32> to vector<2x8x16xf32>
      %124 = vector.extract_strided_slice %24 {offsets = [0, 0, 240], sizes = [2, 8, 16], strides = [1, 1, 1]} : vector<2x8x384xf32> to vector<2x8x16xf32>
      %125 = vector.extract_strided_slice %24 {offsets = [0, 0, 368], sizes = [2, 8, 16], strides = [1, 1, 1]} : vector<2x8x384xf32> to vector<2x8x16xf32>
      "tpu.trace_start"() <{level = 10 : i32, message = "bqd,bkd->bqk"}> : () -> ()
      %cst_43 = arith.constant dense<0.000000e+00> : vector<2x8x8xf32>
      %126 = tpu.matmul %123, %124, %cst_43 {dimension_numbers = #tpu.dot_dimension_numbers<[2], [2], [1], [1], [0, 0, 0, 1, 1, 1], [0], [0]>} : vector<2x8x16xf32>, vector<2x8x16xf32>, vector<2x8x8xf32> -> vector<2x8x8xf32>
      "tpu.trace_stop"() : () -> ()
      %cst_44 = arith.constant dense<0xFF800000> : vector<2x8xf32>
      %127 = vector.multi_reduction <maximumf>, %126, %cst_44 [2] : vector<2x8x8xf32> to vector<2x8xf32>
      %128 = vector.shape_cast %127 : vector<2x8xf32> to vector<2x8x1xf32>
      %129 = vector.broadcast %128 : vector<2x8x1xf32> to vector<2x8x8xf32>
      %130 = arith.subf %126, %129 : vector<2x8x8xf32>
      %131 = math.exp %130 : vector<2x8x8xf32>
      %cst_45 = arith.constant dense<0.000000e+00> : vector<2x8xf32>
      %132 = vector.multi_reduction <add>, %131, %cst_45 [2] : vector<2x8x8xf32> to vector<2x8xf32>
      %133 = vector.shape_cast %132 : vector<2x8xf32> to vector<2x8x1xf32>
      %134 = vector.broadcast %133 : vector<2x8x1xf32> to vector<2x8x8xf32>
      %135 = arith.divf %131, %134 : vector<2x8x8xf32>
      "tpu.trace_start"() <{level = 10 : i32, message = "bqk,bkd->bqd"}> : () -> ()
      %cst_46 = arith.constant dense<0.000000e+00> : vector<2x8x16xf32>
      %136 = tpu.matmul %135, %125, %cst_46 {dimension_numbers = #tpu.dot_dimension_numbers<[2], [1], [1], [2], [0, 0, 0, 1, 1, 2], [0], [0]>} : vector<2x8x8xf32>, vector<2x8x16xf32>, vector<2x8x16xf32> -> vector<2x8x16xf32>
      "tpu.trace_stop"() : () -> ()
      %137 = tpu.concatenate %38, %52, %66, %80, %94, %108, %122, %136 in 2 : vector<2x8x16xf32>, vector<2x8x16xf32>, vector<2x8x16xf32>, vector<2x8x16xf32>, vector<2x8x16xf32>, vector<2x8x16xf32>, vector<2x8x16xf32>, vector<2x8x16xf32> -> vector<2x8x128xf32>
      %138 = vector.shape_cast %137 : vector<2x8x128xf32> to vector<16x128xf32>
      %139 = arith.truncf %138 : vector<16x128xf32> to vector<16x128xbf16>
      %140 = arith.index_cast %arg17 : i32 to index
      %c0_47 = arith.constant 0 : index
      %c0_48 = arith.constant 0 : index
      %141 = vector.load %arg4[%140, %c0_47, %c0_48] : memref<6x128x128xbf16, #tpu.memory_space<vmem>>, vector<1x128x128xbf16>
      %142 = vector.shape_cast %141 : vector<1x128x128xbf16> to vector<128x128xbf16>
      %cst_49 = arith.constant dense<0.000000e+00> : vector<16x128xf32>
      %143 = tpu.matmul %139, %142, %cst_49 {dimension_numbers = #tpu.dot_dimension_numbers<[1], [0], [0], [1], [0, 0, 1, 1], [], []>} : vector<16x128xbf16>, vector<128x128xbf16>, vector<16x128xf32> -> vector<16x128xf32>
      %144 = arith.index_cast %arg17 : i32 to index
      %c0_50 = arith.constant 0 : index
      %c0_51 = arith.constant 0 : index
      %145 = vector.load %arg5[%144, %c0_50, %c0_51] : memref<6x1x128xf32, #tpu.memory_space<vmem>>, vector<1x1x128xf32>
      %146 = vector.shape_cast %145 : vector<1x1x128xf32> to vector<1x128xf32>
      %147 = vector.broadcast %146 : vector<1x128xf32> to vector<16x128xf32>
      %148 = arith.addf %143, %147 : vector<16x128xf32>
      %149 = arith.addf %arg18, %148 : vector<16x128xf32>
      %150 = arith.index_cast %arg17 : i32 to index
      %c0_52 = arith.constant 0 : index
      %c0_53 = arith.constant 0 : index
      %151 = vector.load %arg6[%150, %c0_52, %c0_53] : memref<6x1x128xf32, #tpu.memory_space<vmem>>, vector<1x1x128xf32>
      %152 = vector.shape_cast %151 : vector<1x1x128xf32> to vector<1x128xf32>
      %153 = arith.index_cast %arg17 : i32 to index
      %c0_54 = arith.constant 0 : index
      %c0_55 = arith.constant 0 : index
      %154 = vector.load %arg7[%153, %c0_54, %c0_55] : memref<6x1x128xf32, #tpu.memory_space<vmem>>, vector<1x1x128xf32>
      %155 = vector.shape_cast %154 : vector<1x1x128xf32> to vector<1x128xf32>
      %cst_56 = arith.constant dense<0.000000e+00> : vector<16xf32>
      %156 = vector.multi_reduction <add>, %149, %cst_56 [1] : vector<16x128xf32> to vector<16xf32>
      %157 = vector.shape_cast %156 : vector<16xf32> to vector<16x1xf32>
      %cst_57 = arith.constant 1.280000e+02 : f32
      %158 = vector.broadcast %cst_57 : f32 to vector<16x1xf32>
      %159 = arith.divf %157, %158 : vector<16x1xf32>
      %160 = vector.broadcast %159 : vector<16x1xf32> to vector<16x128xf32>
      %161 = arith.subf %149, %160 : vector<16x128xf32>
      %162 = arith.mulf %161, %161 : vector<16x128xf32>
      %cst_58 = arith.constant dense<0.000000e+00> : vector<16xf32>
      %163 = vector.multi_reduction <add>, %162, %cst_58 [1] : vector<16x128xf32> to vector<16xf32>
      %164 = vector.shape_cast %163 : vector<16xf32> to vector<16x1xf32>
      %cst_59 = arith.constant 1.280000e+02 : f32
      %165 = vector.broadcast %cst_59 : f32 to vector<16x1xf32>
      %166 = arith.divf %164, %165 : vector<16x1xf32>
      %167 = vector.broadcast %159 : vector<16x1xf32> to vector<16x128xf32>
      %168 = arith.subf %149, %167 : vector<16x128xf32>
      %cst_60 = arith.constant 9.99999974E-6 : f32
      %169 = vector.broadcast %cst_60 : f32 to vector<16x1xf32>
      %170 = arith.addf %166, %169 : vector<16x1xf32>
      %171 = math.rsqrt %170 : vector<16x1xf32>
      %172 = vector.broadcast %171 : vector<16x1xf32> to vector<16x128xf32>
      %173 = arith.mulf %168, %172 : vector<16x128xf32>
      %174 = vector.broadcast %152 : vector<1x128xf32> to vector<16x128xf32>
      %175 = arith.mulf %173, %174 : vector<16x128xf32>
      %176 = vector.broadcast %155 : vector<1x128xf32> to vector<16x128xf32>
      %177 = arith.addf %175, %176 : vector<16x128xf32>
      %178 = arith.truncf %177 : vector<16x128xf32> to vector<16x128xbf16>
      %179 = arith.index_cast %arg17 : i32 to index
      %c0_61 = arith.constant 0 : index
      %c0_62 = arith.constant 0 : index
      %180 = vector.load %arg8[%179, %c0_61, %c0_62] : memref<6x128x2048xbf16, #tpu.memory_space<vmem>>, vector<1x128x2048xbf16>
      %181 = vector.shape_cast %180 : vector<1x128x2048xbf16> to vector<128x2048xbf16>
      %cst_63 = arith.constant dense<0.000000e+00> : vector<16x2048xf32>
      %182 = tpu.matmul %178, %181, %cst_63 {dimension_numbers = #tpu.dot_dimension_numbers<[1], [0], [0], [1], [0, 0, 1, 1], [], []>} : vector<16x128xbf16>, vector<128x2048xbf16>, vector<16x2048xf32> -> vector<16x2048xf32>
      %183 = arith.index_cast %arg17 : i32 to index
      %c0_64 = arith.constant 0 : index
      %c0_65 = arith.constant 0 : index
      %184 = vector.load %arg9[%183, %c0_64, %c0_65] : memref<6x1x2048xf32, #tpu.memory_space<vmem>>, vector<1x1x2048xf32>
      %185 = vector.shape_cast %184 : vector<1x1x2048xf32> to vector<1x2048xf32>
      %186 = vector.broadcast %185 : vector<1x2048xf32> to vector<16x2048xf32>
      %187 = arith.addf %182, %186 : vector<16x2048xf32>
      %cst_66 = arith.constant 0.000000e+00 : f32
      %188 = vector.broadcast %cst_66 : f32 to vector<16x2048xf32>
      %189 = arith.maximumf %187, %188 : vector<16x2048xf32>
      %190 = arith.truncf %189 : vector<16x2048xf32> to vector<16x2048xbf16>
      %191 = arith.index_cast %arg17 : i32 to index
      %c0_67 = arith.constant 0 : index
      %c0_68 = arith.constant 0 : index
      %192 = vector.load %arg10[%191, %c0_67, %c0_68] : memref<6x2048x128xbf16, #tpu.memory_space<vmem>>, vector<1x2048x128xbf16>
      %193 = vector.shape_cast %192 : vector<1x2048x128xbf16> to vector<2048x128xbf16>
      %cst_69 = arith.constant dense<0.000000e+00> : vector<16x128xf32>
      %194 = tpu.matmul %190, %193, %cst_69 {dimension_numbers = #tpu.dot_dimension_numbers<[1], [0], [0], [1], [0, 0, 1, 1], [], []>} : vector<16x2048xbf16>, vector<2048x128xbf16>, vector<16x128xf32> -> vector<16x128xf32>
      %195 = arith.index_cast %arg17 : i32 to index
      %c0_70 = arith.constant 0 : index
      %c0_71 = arith.constant 0 : index
      %196 = vector.load %arg11[%195, %c0_70, %c0_71] : memref<6x1x128xf32, #tpu.memory_space<vmem>>, vector<1x1x128xf32>
      %197 = vector.shape_cast %196 : vector<1x1x128xf32> to vector<1x128xf32>
      %198 = vector.broadcast %197 : vector<1x128xf32> to vector<16x128xf32>
      %199 = arith.addf %194, %198 : vector<16x128xf32>
      %200 = arith.addf %177, %199 : vector<16x128xf32>
      %201 = arith.index_cast %arg17 : i32 to index
      %c0_72 = arith.constant 0 : index
      %c0_73 = arith.constant 0 : index
      %202 = vector.load %arg12[%201, %c0_72, %c0_73] : memref<6x1x128xf32, #tpu.memory_space<vmem>>, vector<1x1x128xf32>
      %203 = vector.shape_cast %202 : vector<1x1x128xf32> to vector<1x128xf32>
      %204 = arith.index_cast %arg17 : i32 to index
      %c0_74 = arith.constant 0 : index
      %c0_75 = arith.constant 0 : index
      %205 = vector.load %arg13[%204, %c0_74, %c0_75] : memref<6x1x128xf32, #tpu.memory_space<vmem>>, vector<1x1x128xf32>
      %206 = vector.shape_cast %205 : vector<1x1x128xf32> to vector<1x128xf32>
      %cst_76 = arith.constant dense<0.000000e+00> : vector<16xf32>
      %207 = vector.multi_reduction <add>, %200, %cst_76 [1] : vector<16x128xf32> to vector<16xf32>
      %208 = vector.shape_cast %207 : vector<16xf32> to vector<16x1xf32>
      %cst_77 = arith.constant 1.280000e+02 : f32
      %209 = vector.broadcast %cst_77 : f32 to vector<16x1xf32>
      %210 = arith.divf %208, %209 : vector<16x1xf32>
      %211 = vector.broadcast %210 : vector<16x1xf32> to vector<16x128xf32>
      %212 = arith.subf %200, %211 : vector<16x128xf32>
      %213 = arith.mulf %212, %212 : vector<16x128xf32>
      %cst_78 = arith.constant dense<0.000000e+00> : vector<16xf32>
      %214 = vector.multi_reduction <add>, %213, %cst_78 [1] : vector<16x128xf32> to vector<16xf32>
      %215 = vector.shape_cast %214 : vector<16xf32> to vector<16x1xf32>
      %cst_79 = arith.constant 1.280000e+02 : f32
      %216 = vector.broadcast %cst_79 : f32 to vector<16x1xf32>
      %217 = arith.divf %215, %216 : vector<16x1xf32>
      %218 = vector.broadcast %210 : vector<16x1xf32> to vector<16x128xf32>
      %219 = arith.subf %200, %218 : vector<16x128xf32>
      %cst_80 = arith.constant 9.99999974E-6 : f32
      %220 = vector.broadcast %cst_80 : f32 to vector<16x1xf32>
      %221 = arith.addf %217, %220 : vector<16x1xf32>
      %222 = math.rsqrt %221 : vector<16x1xf32>
      %223 = vector.broadcast %222 : vector<16x1xf32> to vector<16x128xf32>
      %224 = arith.mulf %219, %223 : vector<16x128xf32>
      %225 = vector.broadcast %203 : vector<1x128xf32> to vector<16x128xf32>
      %226 = arith.mulf %224, %225 : vector<16x128xf32>
      %227 = vector.broadcast %206 : vector<1x128xf32> to vector<16x128xf32>
      %228 = arith.addf %226, %227 : vector<16x128xf32>
      scf.yield %228 : vector<16x128xf32>
    }
    %c6_i32_2 = arith.constant 6 : i32
    %4 = vector.shape_cast %3 : vector<16x128xf32> to vector<2x8x128xf32>
    %5 = vector.extract_strided_slice %4 {offsets = [0, 0, 0], sizes = [2, 1, 128], strides = [1, 1, 1]} : vector<2x8x128xf32> to vector<2x1x128xf32>
    %6 = vector.shape_cast %5 : vector<2x1x128xf32> to vector<2x128xf32>
    %c0_3 = arith.constant 0 : index
    %c0_4 = arith.constant 0 : index
    %7 = vector.load %arg14[%c0_3, %c0_4] : memref<128x128xf32, #tpu.memory_space<vmem>>, vector<128x128xf32>
    %cst = arith.constant dense<0.000000e+00> : vector<2x128xf32>
    %8 = tpu.matmul %6, %7, %cst {dimension_numbers = #tpu.dot_dimension_numbers<[1], [0], [0], [1], [0, 0, 1, 1], [], []>} : vector<2x128xf32>, vector<128x128xf32>, vector<2x128xf32> -> vector<2x128xf32>
    %c0_5 = arith.constant 0 : index
    %c0_6 = arith.constant 0 : index
    %9 = vector.load %arg15[%c0_5, %c0_6] : memref<1x128xf32, #tpu.memory_space<vmem>>, vector<1x128xf32>
    %10 = vector.broadcast %9 : vector<1x128xf32> to vector<2x128xf32>
    %11 = arith.addf %8, %10 : vector<2x128xf32>
    %12 = vector.shape_cast %11 : vector<2x128xf32> to vector<2x1x128xf32>
    %c0_7 = arith.constant 0 : index
    %c0_8 = arith.constant 0 : index
    %c0_9 = arith.constant 0 : index
    %13 = vector.load %arg16[%c0_7, %c0_8, %c0_9] : memref<2x1x128xf32, #tpu.memory_space<vmem>>, vector<2x1x128xf32>
    tpu.vector_store %arg16[%c0_7, %c0_8, %c0_9], %12 {strides = array<i32>} : memref<2x1x128xf32, #tpu.memory_space<vmem>>, vector<2x1x128xf32>,
    return
  }
  func.func @transform_0(%arg0: i32) -> (i32, i32, i32) {
    %c0_i32 = arith.constant 0 : i32
    %c0_i32_0 = arith.constant 0 : i32
    %c0_i32_1 = arith.constant 0 : i32
    return %arg0, %c0_i32, %c0_i32_0 : i32, i32, i32
  }
  func.func @transform_1(%arg0: i32) -> (i32, i32, i32) {
    %c0_i32 = arith.constant 0 : i32
    %c0_i32_0 = arith.constant 0 : i32
    %c0_i32_1 = arith.constant 0 : i32
    %c0_i32_2 = arith.constant 0 : i32
    return %c0_i32, %c0_i32_0, %c0_i32_1 : i32, i32, i32
  }
  func.func @transform_2(%arg0: i32) -> (i32, i32, i32) {
    %c0_i32 = arith.constant 0 : i32
    %c0_i32_0 = arith.constant 0 : i32
    %c0_i32_1 = arith.constant 0 : i32
    %c0_i32_2 = arith.constant 0 : i32
    return %c0_i32, %c0_i32_0, %c0_i32_1 : i32, i32, i32
  }
  func.func @transform_3(%arg0: i32) -> (i32, i32, i32) {
    %c0_i32 = arith.constant 0 : i32
    %c0_i32_0 = arith.constant 0 : i32
    %c0_i32_1 = arith.constant 0 : i32
    %c0_i32_2 = arith.constant 0 : i32
    return %c0_i32, %c0_i32_0, %c0_i32_1 : i32, i32, i32
  }
  func.func @transform_4(%arg0: i32) -> (i32, i32, i32) {
    %c0_i32 = arith.constant 0 : i32
    %c0_i32_0 = arith.constant 0 : i32
    %c0_i32_1 = arith.constant 0 : i32
    %c0_i32_2 = arith.constant 0 : i32
    return %c0_i32, %c0_i32_0, %c0_i32_1 : i32, i32, i32
  }
  func.func @transform_5(%arg0: i32) -> (i32, i32, i32) {
    %c0_i32 = arith.constant 0 : i32
    %c0_i32_0 = arith.constant 0 : i32
    %c0_i32_1 = arith.constant 0 : i32
    %c0_i32_2 = arith.constant 0 : i32
    return %c0_i32, %c0_i32_0, %c0_i32_1 : i32, i32, i32
  }
  func.func @transform_6(%arg0: i32) -> (i32, i32, i32) {
    %c0_i32 = arith.constant 0 : i32
    %c0_i32_0 = arith.constant 0 : i32
    %c0_i32_1 = arith.constant 0 : i32
    %c0_i32_2 = arith.constant 0 : i32
    return %c0_i32, %c0_i32_0, %c0_i32_1 : i32, i32, i32
  }
  func.func @transform_7(%arg0: i32) -> (i32, i32, i32) {
    %c0_i32 = arith.constant 0 : i32
    %c0_i32_0 = arith.constant 0 : i32
    %c0_i32_1 = arith.constant 0 : i32
    %c0_i32_2 = arith.constant 0 : i32
    return %c0_i32, %c0_i32_0, %c0_i32_1 : i32, i32, i32
  }
  func.func @transform_8(%arg0: i32) -> (i32, i32, i32) {
    %c0_i32 = arith.constant 0 : i32
    %c0_i32_0 = arith.constant 0 : i32
    %c0_i32_1 = arith.constant 0 : i32
    %c0_i32_2 = arith.constant 0 : i32
    return %c0_i32, %c0_i32_0, %c0_i32_1 : i32, i32, i32
  }
  func.func @transform_9(%arg0: i32) -> (i32, i32, i32) {
    %c0_i32 = arith.constant 0 : i32
    %c0_i32_0 = arith.constant 0 : i32
    %c0_i32_1 = arith.constant 0 : i32
    %c0_i32_2 = arith.constant 0 : i32
    return %c0_i32, %c0_i32_0, %c0_i32_1 : i32, i32, i32
  }
  func.func @transform_10(%arg0: i32) -> (i32, i32, i32) {
    %c0_i32 = arith.constant 0 : i32
    %c0_i32_0 = arith.constant 0 : i32
    %c0_i32_1 = arith.constant 0 : i32
    %c0_i32_2 = arith.constant 0 : i32
    return %c0_i32, %c0_i32_0, %c0_i32_1 : i32, i32, i32
  }
  func.func @transform_11(%arg0: i32) -> (i32, i32, i32) {
    %c0_i32 = arith.constant 0 : i32
    %c0_i32_0 = arith.constant 0 : i32
    %c0_i32_1 = arith.constant 0 : i32
    %c0_i32_2 = arith.constant 0 : i32
    return %c0_i32, %c0_i32_0, %c0_i32_1 : i32, i32, i32
  }
  func.func @transform_12(%arg0: i32) -> (i32, i32, i32) {
    %c0_i32 = arith.constant 0 : i32
    %c0_i32_0 = arith.constant 0 : i32
    %c0_i32_1 = arith.constant 0 : i32
    %c0_i32_2 = arith.constant 0 : i32
    return %c0_i32, %c0_i32_0, %c0_i32_1 : i32, i32, i32
  }
  func.func @transform_13(%arg0: i32) -> (i32, i32) {
    %c0_i32 = arith.constant 0 : i32
    %c0_i32_0 = arith.constant 0 : i32
    %c0_i32_1 = arith.constant 0 : i32
    return %c0_i32, %c0_i32_0 : i32, i32
  }
  func.func @transform_14(%arg0: i32) -> (i32, i32) {
    %c0_i32 = arith.constant 0 : i32
    %c0_i32_0 = arith.constant 0 : i32
    %c0_i32_1 = arith.constant 0 : i32
    return %c0_i32, %c0_i32_0 : i32, i32
  }
  func.func @transform_15(%arg0: i32) -> (i32, i32, i32) {
    %c0_i32 = arith.constant 0 : i32
    %c0_i32_0 = arith.constant 0 : i32
    %c0_i32_1 = arith.constant 0 : i32
    return %arg0, %c0_i32, %c0_i32_0 : i32, i32, i32
  }
}

</mosaic_0001>

<bundles_post_ra>
// kernel: simple_encoder_forward.1
= control target key start
LH: loop header
LB: loop body
LE: loop exit
PB: predicated region body
PF: predicated region fallthrough
CT: control target
= control target key end

     0   :  { %20 = vsyncpa [#allocation3], 0  ;;  %s8769_s0 = inlined_call_operand.vmem [shape: f32[2,8,128], index: 0, kind: input, shape index: {}]   ;;  %s8770_s1 = inlined_call_operand.hbm [shape: bf16[6,128,384], index: 1, kind: input, shape index: {}]   ;;  %s8771_s2 = inlined_call_operand.hbm [shape: f32[6,1,384], index: 2, kind: input, shape index: {}]   ;;  %s8772_s3 = inlined_call_operand.hbm [shape: bf16[6,128,128], index: 3, kind: input, shape index: {}]   ;;  %s8773_s4 = inlined_call_operand.hbm [shape: f32[6,1,128], index: 4, kind: input, shape index: {}]   ;;  %s8774_s5 = inlined_call_operand.hbm [shape: f32[6,1,128], index: 5, kind: input, shape index: {}]   ;;  %s8775_s6 = inlined_call_operand.hbm [shape: f32[6,1,128], index: 6, kind: input, shape index: {}]   ;;  %s8776_s7 = inlined_call_operand.hbm [shape: bf16[6,128,2048], index: 7, kind: input, shape index: {}]   ;;  %s8777_s8 = inlined_call_operand.hbm [shape: f32[6,1,2048], index: 8, kind: input, shape index: {}]   ;;  %s8778_s9 = inlined_call_operand.hbm [shape: bf16[6,2048,128], index: 9, kind: input, shape index: {}]   ;;  %s8779_s10 = inlined_call_operand.hbm [shape: f32[6,1,128], index: 10, kind: input, shape index: {}]   ;;  %s8780_s11 = inlined_call_operand.hbm [shape: f32[6,1,128], index: 11, kind: input, shape index: {}]   ;;  %s8781_s12 = inlined_call_operand.hbm [shape: f32[6,1,128], index: 12, kind: input, shape index: {}]   ;;  %s8782_s13 = inlined_call_operand.hbm [shape: f32[128,128], index: 13, kind: input, shape index: {}]   ;;  %s8783_s14 = inlined_call_operand.hbm [shape: f32[1,128], index: 14, kind: input, shape index: {}]   ;;  %s8784_s15 = inlined_call_operand.hbm [shape: f32[2,1,128], index: 15, kind: output, shape index: {}]  }
   0x1   :  { %21 = vsyncpa [#allocation6], 0 }
   0x2   :  { %22 = vsyncpa [#allocation9], 0 }
   0x3   :  { %23 = vsyncpa [#allocation12], 0 }
   0x4   :  { %24 = vsyncpa [#allocation15], 0 }
   0x5   :  { %25 = vsyncpa [#allocation18], 0 }
   0x6   :  { %26 = vsyncpa [#allocation21], 0 }
   0x7   :  { %27 = vsyncpa [#allocation24], 0 }
   0x8   :  { %28 = vsyncpa [#allocation4], 0  ;;  %s7769_s18 = smov [#allocation5]  }
   0x9   :  { %s48_s19 = sshll.u32 %s7769_s18, 4  ;;  %s49_s19 = int_to_ptr.vmem [resolvable:$true] %s48_s19 }
   0xa   :  { %s7435_s20 = scalar_lea.vmem %s49_s19, 288  ;;  %p7440_p1 = scmp.lt.s32.totalorder %s49_s19, %s49_s19 }
   0xb   :  { %p7436_p0 = scmp.ne.s32.totalorder %s49_s19, %s7435_s20  ;;  %p7441_p2 = scmp.lt.s32.totalorder %s7435_s20, %s7435_s20 }
   0xd   :  { %p7442_p3 = por %p7441_p2, %p7440_p1 }
   0xf   :  { %p7443_p4 = pnand %p7442_p3, %p7436_p0 }
  0x11   :  { %7446 = shalt.err (!%p7443_p4)
}
  0x12   :  { %s7770_s21 = smov 48   ;;  %s7771_s22 = smov 3  }
  0x13   :  { %54 = dma.hbm_to_vmem [thread:$0]  %s8771_s2, 288, %s49_s19, [#allocation6], %s7770_s21, %s7770_s21, %s7771_s22  }
  0x14   :  { %s7772_s25 = smov [#allocation8]  }
  0x15   :  { %s72_s26 = sshll.u32 %s7772_s25, 4  ;;  %s73_s26 = int_to_ptr.vmem [resolvable:$true] %s72_s26 }
  0x16   :  { %s7455_s27 = scalar_lea.vmem %s73_s26, 96  ;;  %p7460_p6 = scmp.lt.s32.totalorder %s73_s26, %s73_s26 }
  0x17   :  { %p7456_p5 = scmp.ne.s32.totalorder %s73_s26, %s7455_s27  ;;  %p7461_p7 = scmp.lt.s32.totalorder %s7455_s27, %s7455_s27 }
  0x19   :  { %p7462_p8 = por %p7461_p7, %p7460_p6 }
  0x1b   :  { %p7463_p9 = pnand %p7462_p8, %p7456_p5 }
  0x1d   :  { %7466 = shalt.err (!%p7463_p9)
}
  0x1e   :  { %s7773_s28 = smov 16   ;;  %s7774_s29 = smov 1  }
  0x1f   :  { %78 = dma.hbm_to_vmem [thread:$0]  %s8773_s4, 96, %s73_s26, [#allocation9], %s7773_s28, %s7773_s28, %s7774_s29  }
  0x20   :  { %s7775_s2 = smov [#allocation11]   ;;  %s7776_s18 = smov [#allocation14]  }
  0x21   :  { %s96_s17 = sshll.u32 %s7775_s2, 4  ;;  %s120_s19 = sshll.u32 %s7776_s18, 4  ;;  %s97_s17 = int_to_ptr.vmem [resolvable:$true] %s96_s17  ;;  %s121_s19 = int_to_ptr.vmem [resolvable:$true] %s120_s19 }
  0x22   :  { %s7475_s20 = scalar_lea.vmem %s97_s17, 96  ;;  %p7480_p11 = scmp.lt.s32.totalorder %s97_s17, %s97_s17 }
  0x23   :  { %p7476_p10 = scmp.ne.s32.totalorder %s97_s17, %s7475_s20  ;;  %p7481_p12 = scmp.lt.s32.totalorder %s7475_s20, %s7475_s20 }
  0x25   :  { %p7482_p13 = por %p7481_p12, %p7480_p11 }
  0x27   :  { %p7483_p0 = pnand %p7482_p13, %p7476_p10 }
  0x29   :  { %7486 = shalt.err (!%p7483_p0)
}
  0x2a   :  { %102 = dma.hbm_to_vmem [thread:$0]  %s8775_s6, 96, %s97_s17, [#allocation12], %s7773_s28, %s7773_s28, %s7774_s29  }
  0x2b   :  { %s7495_s4 = scalar_lea.vmem %s121_s19, 1536  ;;  %p7500_p2 = scmp.lt.s32.totalorder %s121_s19, %s121_s19 }
  0x2c   :  { %p7496_p1 = scmp.ne.s32.totalorder %s121_s19, %s7495_s4  ;;  %p7501_p3 = scmp.lt.s32.totalorder %s7495_s4, %s7495_s4 }
  0x2e   :  { %p7502_p4 = por %p7501_p3, %p7500_p2 }
  0x30   :  { %p7503_p5 = pnand %p7502_p4, %p7496_p1 }
  0x32   :  { %7506 = shalt.err (!%p7503_p5)
}
  0x33   :  { %s7777_s23 = smov 256   ;;  %s7778_s26 = smov [#allocation17]  }
  0x34   :  { %126 = dma.hbm_to_vmem [thread:$0]  %s8777_s8, 1536, %s121_s19, [#allocation15], %s7777_s23, %s7777_s23, %s7773_s28  }
  0x35   :  { %s144_s27 = sshll.u32 %s7778_s26, 4  ;;  %s7779_s30 = smov [#allocation20]   ;;  %s145_s27 = int_to_ptr.vmem [resolvable:$true] %s144_s27 }
  0x36   :  { %s168_s16 = sshll.u32 %s7779_s30, 4  ;;  %s7515_s2 = scalar_lea.vmem %s145_s27, 96  ;;  %s169_s16 = int_to_ptr.vmem [resolvable:$true] %s168_s16 }
  0x37   :  { %p7516_p6 = scmp.ne.s32.totalorder %s145_s27, %s7515_s2  ;;  %p7520_p7 = scmp.lt.s32.totalorder %s145_s27, %s145_s27 }
  0x38   :  { %p7521_p8 = scmp.lt.s32.totalorder %s7515_s2, %s7515_s2 }
  0x3a   :  { %p7522_p9 = por %p7521_p8, %p7520_p7 }
  0x3c   :  { %p7523_p10 = pnand %p7522_p9, %p7516_p6 }
  0x3e   :  { %7526 = shalt.err (!%p7523_p10)
}
  0x3f   :  { %150 = dma.hbm_to_vmem [thread:$0]  %s8779_s10, 96, %s145_s27, [#allocation18], %s7773_s28, %s7773_s28, %s7774_s29  }
  0x40   :  { %s7535_s8 = scalar_lea.vmem %s169_s16, 96  ;;  %p7540_p12 = scmp.lt.s32.totalorder %s169_s16, %s169_s16 }
  0x41   :  { %p7536_p11 = scmp.ne.s32.totalorder %s169_s16, %s7535_s8  ;;  %p7541_p13 = scmp.lt.s32.totalorder %s7535_s8, %s7535_s8 }
  0x43   :  { %p7542_p0 = por %p7541_p13, %p7540_p12 }
  0x45   :  { %p7543_p1 = pnand %p7542_p0, %p7536_p11 }
  0x47   :  { %7546 = shalt.err (!%p7543_p1)
}
  0x48   :  { %174 = dma.hbm_to_vmem [thread:$0]  %s8781_s12, 96, %s169_s16, [#allocation21], %s7773_s28, %s7773_s28, %s7774_s29  }
  0x49   :  { %s7780_s20 = smov [#allocation2]  }
  0x4a   :  { %s36_s21 = sshll.u32 %s7780_s20, 4  ;;  %s37_s21 = int_to_ptr.vmem [resolvable:$true] %s36_s21 }
  0x4b   :  { %s7555_s22 = scalar_lea.vmem %s37_s21, 18432  ;;  %p7560_p3 = scmp.lt.s32.totalorder %s37_s21, %s37_s21 }
  0x4c   :  { %p7556_p2 = scmp.ne.s32.totalorder %s37_s21, %s7555_s22  ;;  %p7561_p4 = scmp.lt.s32.totalorder %s7555_s22, %s7555_s22 }
  0x4e   :  { %p7562_p5 = por %p7561_p4, %p7560_p3 }
  0x50   :  { %p7563_p6 = pnand %p7562_p5, %p7556_p2 }
  0x52   :  { %7566 = shalt.err (!%p7563_p6)
}
  0x53   :  { %s7781_s10 = smov 192   ;;  %s7782_s4 = smov 12  }
  0x54   :  { %42 = dma.hbm_to_vmem [thread:$0]  %s8770_s1, 18432, %s37_s21, [#allocation3], %s7781_s10, %s7781_s10, %s7782_s4  }
  0x55   :  { %s7783_s25 = smov [#allocation7]  }
  0x56   :  { %s60_s26 = sshll.u32 %s7783_s25, 4  ;;  %s61_s26 = int_to_ptr.vmem [resolvable:$true] %s60_s26 }
  0x57   :  { %s7575_s12 = scalar_lea.vmem %s61_s26, 6144  ;;  %p7580_p8 = scmp.lt.s32.totalorder %s61_s26, %s61_s26 }
  0x58   :  { %p7576_p7 = scmp.ne.s32.totalorder %s61_s26, %s7575_s12  ;;  %p7581_p9 = scmp.lt.s32.totalorder %s7575_s12, %s7575_s12 }
  0x5a   :  { %p7582_p10 = por %p7581_p9, %p7580_p8 }
  0x5c   :  { %p7583_p11 = pnand %p7582_p10, %p7576_p7 }
  0x5e   :  { %7586 = shalt.err (!%p7583_p11)
}
  0x5f   :  { %s7784_s27 = smov 64   ;;  %s7785_s30 = smov 4  }
  0x60   :  { %66 = dma.hbm_to_vmem [thread:$0]  %s8772_s3, 6144, %s61_s26, [#allocation6], %s7784_s27, %s7784_s27, %s7785_s30  }
  0x61   :  { %s7786_s1 = smov [#allocation10]   ;;  %s7787_s17 = smov [#allocation13]  }
  0x62   :  { %s84_s6 = sshll.u32 %s7786_s1, 4  ;;  %s108_s8 = sshll.u32 %s7787_s17, 4  ;;  %s85_s6 = int_to_ptr.vmem [resolvable:$true] %s84_s6  ;;  %s109_s8 = int_to_ptr.vmem [resolvable:$true] %s108_s8 }
  0x63   :  { %s7595_s18 = scalar_lea.vmem %s85_s6, 96  ;;  %p7600_p13 = scmp.lt.s32.totalorder %s85_s6, %s85_s6 }
  0x64   :  { %p7596_p12 = scmp.ne.s32.totalorder %s85_s6, %s7595_s18  ;;  %p7601_p0 = scmp.lt.s32.totalorder %s7595_s18, %s7595_s18 }
  0x66   :  { %p7602_p1 = por %p7601_p0, %p7600_p13 }
  0x68   :  { %p7603_p2 = pnand %p7602_p1, %p7596_p12 }
  0x6a   :  { %7606 = shalt.err (!%p7603_p2)
}
  0x6b   :  { %90 = dma.hbm_to_vmem [thread:$0]  %s8774_s5, 96, %s85_s6, [#allocation9], %s7773_s28, %s7773_s28, %s7774_s29  }
  0x6c   :  { %s7615_s3 = scalar_lea.vmem %s109_s8, 98304  ;;  %p7620_p4 = scmp.lt.s32.totalorder %s109_s8, %s109_s8 }
  0x6d   :  { %p7616_p3 = scmp.ne.s32.totalorder %s109_s8, %s7615_s3  ;;  %p7621_p5 = scmp.lt.s32.totalorder %s7615_s3, %s7615_s3 }
  0x6f   :  { %p7622_p6 = por %p7621_p5, %p7620_p4 }
  0x71   :  { %p7623_p7 = pnand %p7622_p6, %p7616_p3 }
  0x73   :  { %7626 = shalt.err (!%p7623_p7)
}
  0x74   :  { %s7788_s21 = smov 1024   ;;  %s7789_s4 = smov [#allocation16]  }
  0x75   :  { %114 = dma.hbm_to_vmem [thread:$0]  %s8776_s7, 98304, %s109_s8, [#allocation12], %s7788_s21, %s7788_s21, %s7784_s27  }
  0x76   :  { %s132_s23 = sshll.u32 %s7789_s4, 4  ;;  %s7790_s24 = smov [#allocation19]   ;;  %s133_s23 = int_to_ptr.vmem [resolvable:$true] %s132_s23 }
  0x77   :  { %s156_s25 = sshll.u32 %s7790_s24, 4  ;;  %s7635_s5 = scalar_lea.vmem %s133_s23, 98304  ;;  %s157_s25 = int_to_ptr.vmem [resolvable:$true] %s156_s25 }
  0x78   :  { %p7636_p8 = scmp.ne.s32.totalorder %s133_s23, %s7635_s5  ;;  %p7640_p9 = scmp.lt.s32.totalorder %s133_s23, %s133_s23 }
  0x79   :  { %p7641_p10 = scmp.lt.s32.totalorder %s7635_s5, %s7635_s5 }
  0x7b   :  { %p7642_p11 = por %p7641_p10, %p7640_p9 }
  0x7d   :  { %p7643_p12 = pnand %p7642_p11, %p7636_p8 }
  0x7f   :  { %7646 = shalt.err (!%p7643_p12)
}
  0x80   :  { %138 = dma.hbm_to_vmem [thread:$0]  %s8778_s9, 98304, %s133_s23, [#allocation15], %s7784_s27, %s7784_s27, %s7785_s30  }
  0x81   :  { %s7655_s7 = scalar_lea.vmem %s157_s25, 96  ;;  %p7660_p0 = scmp.lt.s32.totalorder %s157_s25, %s157_s25 }
  0x82   :  { %p7656_p13 = scmp.ne.s32.totalorder %s157_s25, %s7655_s7  ;;  %p7661_p1 = scmp.lt.s32.totalorder %s7655_s7, %s7655_s7 }
  0x84   :  { %p7662_p2 = por %p7661_p1, %p7660_p0 }
  0x86   :  { %p7663_p3 = pnand %p7662_p2, %p7656_p13 }
  0x88   :  { %7666 = shalt.err (!%p7663_p3)
}
  0x89   :  { %162 = dma.hbm_to_vmem [thread:$0]  %s8780_s11, 96, %s157_s25, [#allocation18], %s7773_s28, %s7773_s28, %s7774_s29  }
  0x8a   :  { %s7791_s1 = smov [#allocation22]  }
  0x8b   :  { %s180_s6 = sshll.u32 %s7791_s1, 4  ;;  %s181_s6 = int_to_ptr.vmem [resolvable:$true] %s180_s6 }
  0x8c   :  { %s7675_s17 = scalar_lea.vmem %s181_s6, 2048  ;;  %p7680_p5 = scmp.lt.s32.totalorder %s181_s6, %s181_s6 }
  0x8d   :  { %p7676_p4 = scmp.ne.s32.totalorder %s181_s6, %s7675_s17  ;;  %p7681_p6 = scmp.lt.s32.totalorder %s7675_s17, %s7675_s17 }
  0x8f   :  { %p7682_p7 = por %p7681_p6, %p7680_p5 }
  0x91   :  { %p7683_p8 = pnand %p7682_p7, %p7676_p4 }
  0x93   :  { %7686 = shalt.err (!%p7683_p8)
}
  0x94   :  { %s7792_s9 = smov 128   ;;  %s7793_s27 = smov 8  }
  0x95   :  { %186 = dma.hbm_to_vmem [thread:$0]  %s8782_s13, 2048, %s181_s6, [#allocation21], %s7792_s9, %s7792_s9, %s7793_s27  }
  0x96   :  { %s7794_s18 = smov [#allocation23]  }
  0x97   :  { %s193_s19 = sshll.u32 %s7794_s18, 4  ;;  %s194_s19 = int_to_ptr.vmem [resolvable:$true] %s193_s19 }
  0x98   :  { %s7695_s11 = scalar_lea.vmem %s194_s19, 16  ;;  %s7699_s20 = scalar_lea.vmem %s194_s19, 32 }
  0x99   :  { %p7696_p9 = scmp.ne.s32.totalorder %s194_s19, %s7695_s11  ;;  %p7700_p10 = scmp.lt.s32.totalorder %s194_s19, %s194_s19 }
  0x9a   :  { %p7701_p11 = scmp.lt.s32.totalorder %s7699_s20, %s7695_s11 }
  0x9c   :  { %p7702_p12 = por %p7701_p11, %p7700_p10 }
  0x9e   :  { %p7703_p13 = pnand %p7702_p12, %p7696_p9 }
  0xa0   :  { %7706 = shalt.err (!%p7703_p13)
}
  0xa1   :  { %196 = dma.hbm_to_vmem [thread:$0]  %s8783_s14, 16, %s194_s19, [#allocation24]  }
  0xa2   :  { %7739 = dma.done.wait [#allocation3], 18432  }
  0xa3   :  { %7740 = vsyncadd [#allocation3], 4294948864 }
  0xa4   :  { %7741 = dma.done.wait [#allocation6], 6432  }
  0xa5   :  { %7742 = vsyncadd [#allocation6], 4294960864 }
  0xa6   :  { %7743 = dma.done.wait [#allocation9], 192  }
  0xa7   :  { %7744 = vsyncadd [#allocation9], 4294967104 }
  0xa8   :  { %7745 = dma.done.wait [#allocation12], 98400  }
  0xa9   :  { %7746 = vsyncadd [#allocation12], 4294868896 }
  0xaa   :  { %7747 = dma.done.wait [#allocation15], 99840  }
  0xab   :  { %7748 = vsyncadd [#allocation15], 4294867456 }
  0xac   :  { %7749 = dma.done.wait [#allocation18], 192  }
  0xad   :  { %7750 = vsyncadd [#allocation18], 4294967104 }
  0xae   :  { %7751 = dma.done.wait [#allocation21], 2144  }
  0xaf   :  { %7752 = vsyncadd [#allocation21], 4294965152 }
  0xb0   :  { %7753 = dma.done.wait [#allocation24], 16  }
  0xb1   :  { %7754 = vsyncadd [#allocation24], 4294967280  ;;  %v240_v0 = vld [vmem:[%s8769_s0] sm:$0xff]   ;;  %v241_v1 = vld [vmem:[%s8769_s0 + $0x8] sm:$0xff]   ;;  %s7967_s4 = smov 0  }
  0xb2 LB: > { %v7795_v2 = vmov 0   ;;  %v7796_v3 = vmov 0.0   ;;  %s6574_s0 = smul.u32 192, %s7767_s4  ;;  %vm7797_vm0 = vmmov 0   ;;  %v250_v26 = vpack.c.bf16 %v7759_v1, %v7763_v0  ;;  %s7798_s5 = smov 112   ;;  %s7767_s4 = sphi %s7967_s4, %s247_s4   ;;  %v7763_v0 = vphi %v240_v0, %v8786_v0   ;;  %v7759_v1 = vphi %v241_v1, %v8785_v1  }
  0xb3   : > { %465 = vmatprep.mubr.bf16.mxu0 %v7795_v2  ;;  %6853 = vmatprep.subr.bf16.mxu1 %v7796_v3  ;;  %v290_v29 = vlaneseq  ;;  %s286_s24 = smul.u32 3, %s7767_s4  ;;  %vm517_vm1 = vcmask 130048   ;;  %vm670_vm2 = vcmask 64512   ;;  %s7799_s26 = smov 96   ;;  %vm3209_vm3 = vcmask 261120  }
  0xb4   : > { %6869 = vmatprep.mubr.msk.bf16.mxu1 %vm7797_vm0, %v7796_v3  ;;  %s7983_s23 = scalar_lea.vmem [#allocation2], %s6574_s0  ;;  %s7800_s12 = smov 80   ;;  %vm3212_vm4 = vcmask 392192   ;;  %vm3215_vm5 = vcmask 523264   ;;  %vm3218_vm6 = vcmask 654336   ;;  %vm3221_vm7 = vcmask 785408  }
  0xb5   : > { %v7187_v4 = vld [vmem:[%s7983_s23 + $0xac] ss:$12 sps:$4 sm:$0xff]   ;;  %v7189_v5 = vld [vmem:[%s7983_s23 + $0xa8] ss:$12 sps:$4 sm:$0xff]   ;;  %v7192_v7 = vld [vmem:[%s7983_s23 + $0x90] ss:$12 sps:$4 sm:$0xff]  }
  0xb6   : > { %433 = vmatprep.subr.bf16.mxu0 %v7187_v4  ;;  %v7190_v6 = vld [vmem:[%s7983_s23 + $0x94] ss:$12 sps:$4 sm:$0xff]   ;;  %v7193_v8 = vld [vmem:[%s7983_s23 + $0x7c] ss:$12 sps:$4 sm:$0xff]   ;;  %v7195_v9 = vld [vmem:[%s7983_s23 + $0x78] ss:$12 sps:$4 sm:$0xff]  }
  0xb7   : > { %434 = vmatpush1.bf16.msra.mxu0 %v7189_v5  ;;  %v7196_v10 = vld [vmem:[%s7983_s23 + $0x64] ss:$12 sps:$4 sm:$0xff]   ;;  %v7198_v11 = vld [vmem:[%s7983_s23 + $0x60] ss:$12 sps:$4 sm:$0xff]   ;;  %v7201_v15 = vld [vmem:[%s7983_s23 + $0x48] ss:$12 sps:$4 sm:$0xff]  }
  0xb8   : > { %435 = vmatprep.subr.bf16.mxu0 %v7190_v6  ;;  %v7211_v12 = vld [vmem:[%s7983_s23 + $0xb0] ss:$12 sps:$4 sm:$0xff]   ;;  %v7199_v13 = vld [vmem:[%s7983_s23 + $0x4c] ss:$12 sps:$4 sm:$0xff]   ;;  %v7202_v16 = vld [vmem:[%s7983_s23 + $0x34] ss:$12 sps:$4 sm:$0xff]  }
  0xb9   : > { %6854 = vmatpush3.bf16.msra.mxu1 %v7211_v12  ;;  %v7212_v14 = vld [vmem:[%s7983_s23 + $0x98] ss:$12 sps:$4 sm:$0xff]   ;;  %v7213_v17 = vld [vmem:[%s7983_s23 + $0x80] ss:$12 sps:$4 sm:$0xff]   ;;  %v7204_v18 = vld [vmem:[%s7983_s23 + $0x30] ss:$12 sps:$4 sm:$0xff]  }
  0xba   : > { %6855 = vmatprep.subr.bf16.mxu1 %v7796_v3  ;;  %v7205_v19 = vld [vmem:[%s7983_s23 + $0x1c] ss:$12 sps:$4 sm:$0xff]   ;;  %v7207_v21 = vld [vmem:[%s7983_s23 + $0x18] ss:$12 sps:$4 sm:$0xff]   ;;  %v7210_v24 = vld [vmem:[%s7983_s23] ss:$12 sps:$4 sm:$0xff]  }
  0xbb   : > { %436 = vmatpush1.bf16.msra.mxu0 %v7192_v7  ;;  %v7214_v20 = vld [vmem:[%s7983_s23 + $0x68] ss:$12 sps:$4 sm:$0xff]   ;;  %v7208_v22 = vld [vmem:[%s7983_s23 + $0x4] ss:$12 sps:$4 sm:$0xff]   ;;  %v7217_v27 = vld [vmem:[%s7983_s23 + $0x20] ss:$12 sps:$4 sm:$0xff]  }
  0xbc   : > { %437 = vmatprep.subr.bf16.mxu0 %v7193_v8  ;;  %v7215_v23 = vld [vmem:[%s7983_s23 + $0x50] ss:$12 sps:$4 sm:$0xff]   ;;  %v7216_v25 = vld [vmem:[%s7983_s23 + $0x38] ss:$12 sps:$4 sm:$0xff]   ;;  %v7218_v28 = vld [vmem:[%s7983_s23 + $0x8] ss:$12 sps:$4 sm:$0xff]  }
  0xbd   : > { %6856 = vmatpush3.bf16.msra.mxu1 %v7212_v14  ;;  %v8025_v30 = vshrl.u32 %v290_v29, 7  ;;  %s287_s25 = scalar_lea.vmem [#allocation5], %s286_s24  ;;  %s7801_s7 = smov 64   ;;  %vm3224_vm8 = vcmask 916480  }
  0xbe   : > { %6857 = vmatprep.subr.bf16.mxu1 %v7796_v3  ;;  %v288_v32 = vld [vmem:[%s287_s25] sm:$0x7]  ;;  %s7802_s16 = smov 48   ;;  %s7803_s2 = smov 32  }
  0xbf   : > { %438 = vmatpush1.bf16.msra.mxu0 %v7195_v9  ;;  %v8028_v31 = vsub.s32 0, %v8025_v30  ;;  %v8031_v33 = vsub.s32 1, %v8025_v30  ;;  %v8042_v40 = vsub.s32 2, %v8025_v30  ;;  %s7804_s1 = smov 16   ;;  %s6575_s6 = sshll.u32 %s7767_s4, 6 }
  0xc0   : > { %439 = vmatprep.subr.bf16.mxu0 %v7196_v10  ;;  %s3230_s17 = scalar_lea.vmem [#allocation7], %s6575_s6  ;;  %s3247_s9 = scalar_lea.vmem [#allocation8], %s7767_s4 }
  0xc1   : > { %6858 = vmatpush3.bf16.msra.mxu1 %v7213_v17  ;;  %v293_v34 = vrot.slane %v288_v32, %v8028_v31  ;;  %v297_v35 = vrot.slane %v288_v32, %v8031_v33  ;;  %v301_v44 = vrot.slane %v288_v32, %v8042_v40  ;;  %s6576_s27 = sshll.u32 %s7767_s4, 10  ;;  %s3346_s18 = scalar_lea.vmem [#allocation10], %s7767_s4 }
  0xc2   : > { %6859 = vmatprep.subr.bf16.mxu1 %v7796_v3  ;;  %s8388_s30 = scalar_lea.vmem [#allocation13], %s6576_s27  ;;  %s8394_s8 = scalar_lea.vmem [#allocation16], %s6576_s27 }
  0xc3   : > { %440 = vmatpush1.bf16.msra.mxu0 %v7198_v11  ;;  %s3348_s19 = scalar_lea.vmem [#allocation11], %s7767_s4  ;;  %s6296_s11 = sshll.u32 %s7767_s4, 4 }
  0xc4   : > { %441 = vmatprep.subr.bf16.mxu0 %v7199_v13  ;;  %s3521_s20 = scalar_lea.vmem [#allocation14], %s6296_s11  ;;  %s4896_s3 = scalar_lea.vmem [#allocation17], %s7767_s4 }
  0xc5   : > { %6860 = vmatpush3.bf16.msra.mxu1 %v7214_v20  ;;  %s6002_s21 = scalar_lea.vmem [#allocation19], %s7767_s4  ;;  %s6004_s13 = scalar_lea.vmem [#allocation20], %s7767_s4 }
  0xc6   : > { %6861 = vmatprep.subr.bf16.mxu1 %v7796_v3  ;;  %s247_s4 = sadd.s32 1, %s7767_s4  }
  0xc7   : > { %442 = vmatpush1.bf16.msra.mxu0 %v7201_v15  ;;  %p244_p0 = scmp.ge.s32.totalorder %s247_s4, 6  }
  0xc8   : > { %443 = vmatprep.subr.bf16.mxu0 %v7202_v16  ;;  %vm7806_vm9 = vmmov (%p244_p0), 0   ;;  %vm6070_vm10 = vcmask (%p244_p0), 1041409   ;;  %s7808_s22 = smov (%p244_p0), [#allocation25]  }
  0xc9   : > { %6862 = vmatpush3.bf16.msra.mxu1 %v7215_v23  ;;  %s6175_s14 = sshll.u32 (%p244_p0), %s7808_s22, 4  ;;  %s6176_s14 = int_to_ptr.vmem [resolvable:$true] %s6175_s14 }
  0xca   : > { %6863 = vmatprep.subr.bf16.mxu1 %v7796_v3  ;;  %s7707_s10 = scalar_lea.vmem (%p244_p0), %s6176_s14, 32  ;;  %p7712_p2 = scmp.lt.s32.totalorder (%p244_p0), %s6176_s14, %s6176_s14 }
  0xcb   : > { %444 = vmatpush1.bf16.msra.mxu0 %v7204_v18  ;;  %p7708_p1 = scmp.ne.s32.totalorder (%p244_p0), %s6176_s14, %s7707_s10  ;;  %p7713_p3 = scmp.lt.s32.totalorder (%p244_p0), %s7707_s10, %s7707_s10 }
  0xcc   : > { %445 = vmatprep.subr.bf16.mxu0 %v7205_v19 }
  0xcd   : > { %6864 = vmatpush3.bf16.msra.mxu1 %v7216_v25  ;;  %p7714_p4 = por (%p244_p0), %p7713_p3, %p7712_p2 }
  0xce   : > { %6865 = vmatprep.subr.bf16.mxu1 %v7796_v3 }
  0xcf   : > { %446 = vmatpush1.bf16.msra.mxu0 %v7207_v21  ;;  %p7715_p5 = pnand (%p244_p0), %p7714_p4, %p7708_p1 }
  0xd0   : > { %447 = vmatprep.subr.bf16.mxu0 %v7208_v22 }
  0xd1   : > { %6866 = vmatpush3.bf16.msra.mxu1 %v7217_v27 }
  0xd2   : > { %6867 = vmatprep.subr.bf16.mxu1 %v7796_v3 }
  0xd3   : > { %448 = vmatpush1.bf16.msra.mxu0 %v7210_v24 }
  0xd4   : > { %6913 = vmatprep.subr.mxu0 %v7796_v3 }
  0xd5   : > { %6868 = vmatpush3.bf16.msra.mxu1 %v7218_v28 }
  0xd6   : > { %466 = vmatmul.mubr.bf16.vlgmr.msra.gmra.mxu0 %v250_v26  ;;  %6873 = vmatprep.subr.mxu1 %v7796_v3 }
  0xd7   : > { %6915 = vmatprep.mubr.msk.f32.mxu0 %vm7797_vm0, %v7796_v3 }
  0xd8   : > { %6870 = vmatmul.mubr.bf16.vlgmr.msra.gmra.mxu1 %v250_v26 }
  0xd9   : > { %6875 = vmatprep.mubr.msk.f32.mxu1 %vm7797_vm0, %v7796_v3 }
 0x196   : > { %v467_v36 = vpop.f32.mrf.mxu0 }
 0x197   : > { %v8035_v37 = vadd.f32 %v467_v36, %v293_v34 }
 0x198   : > { %v469_v38 = vpop.f32.mrf.mxu0  ;;  %v510_v46 = vpop.f32.mrf.mxu1 }
 0x199   : > { %v8037_v39 = vadd.f32 %v469_v38, %v297_v35  ;;  %839 = vrot.lane.b32.xlu1 %v8035_v37, %s7798_s5  ;;  %v8061_v47 = vadd.f32 %v510_v46, %v301_v44 }
 0x19a   : > { %v471_v41 = vpop.f32.mrf.mxu0  ;;  %v6871_v48 = vpop.f32.mrf.mxu1 }
 0x19b   : > { %6874 = vmatpush3.xpose.msk.msra.mxu1 %vm517_vm1, %v8037_v39  ;;  %v8056_v45 = vadd.f32 %v471_v41, %v293_v34 }
 0x19c   : > { %v473_v42 = vpop.f32.mrf.mxu0  ;;  %6878 = vmatprep.subr.mxu1 %v7796_v3  ;;  %v513_v49 = vpop.f32.mrf.mxu1 }
 0x19d   : > { %v8047_v43 = vadd.f32 %v473_v42, %v297_v35  ;;  %v8069_v50 = vadd.f32 %v513_v49, %v301_v44 }
 0x19e   : > { %6876 = vmatmul.mubr.msk.f32.vlgmr.msra.gmra.mxu1 %vm517_vm1, %v8035_v37  ;;  %v6872_v51 = vpop.f32.mrf.mxu1 }
 0x19f   : > { %919 = vrot.lane.b32.xlu1 %v8047_v43, %s7798_s5  ;;  %6879 = vmatpush3.xpose.msk.msra.mxu1 %vm517_vm1, %v8047_v43 }
 0x1a0   : > { %6880 = vmatprep.mubr.msk.f32.mxu1 %vm7797_vm0, %v7796_v3  ;;  %6883 = vmatprep.subr.mxu1 %v7796_v3 }
 0x1a2   : > { %6881 = vmatmul.mubr.msk.f32.vlgmr.msra.gmra.mxu1 %vm517_vm1, %v8056_v45 }
 0x1a3   : > { %6884 = vmatpush3.msra.mxu1 %v8061_v47  ;;  %6885 = vmatprep.mubr.msk.f32.mxu1 %vm7797_vm0, %v7796_v3 }
 0x1a4   : > { %6888 = vmatprep.subr.mxu1 %v7796_v3 }
 0x20b   : > { %v840_v8 = vpop.permute.xlu1 %839 }
 0x211   : > { %v920_v9 = vpop.permute.xlu1 %919 }
 0x25e   : > { %v590_v52 = vpop.f32.mrf.mxu1 }
 0x25f   : > { %v671_v53 = vsel %vm670_vm2, %v590_v52, -inf }
 0x260   : > { %672 = vmax.xlane.f32.xlu0 %v671_v53  ;;  %v6877_v54 = vpop.f32.mrf.mxu1 }
 0x262   : > { %v666_v55 = vpop.f32.mrf.mxu1 }
 0x263   : > { %v674_v56 = vsel %vm670_vm2, %v666_v55, -inf }
 0x264   : > { %675 = vmax.xlane.f32.xlu0 %v674_v56  ;;  %v6882_v57 = vpop.f32.mrf.mxu1 }
 0x27a   : > { %841 = vrot.lane.b32.xlu0 %v8037_v39, %s7798_s5 }
 0x2e9   : > { %v673_v58 = vpop.xlane.xlu0 %672 }
 0x2ea   : > { %v677_v59 = vsub.f32 %v590_v52, %v673_v58 }
 0x2ec   : > { %v679_v60 = vmul.f32 1.442695, %v677_v59 }
 0x2ed   : > { %v676_v61 = vpop.xlane.xlu0 %675 }
 0x2ee   : > { %7355 = vpow2.f32 %v679_v60  ;;  %v678_v62 = vsub.f32 %v666_v55, %v676_v61 }
 0x2f0   : > { %v681_v63 = vmul.f32 1.442695, %v678_v62 }
 0x2f1   : > { %v842_v16 = vpop.permute.xlu0 %841 }
 0x2f2   : > { %7357 = vpow2.f32 %v681_v63 }
 0x2fb   : > { %v7356_v4 = vpop.eup %7355 }
 0x2fc   : > { %v683_v5 = vsel %vm670_vm2, %v7356_v4, 0.0 }
 0x2fd   : > { %684 = vadd.xlane.f32.xlu1 %v683_v5 }
 0x2ff   : > { %v7358_v6 = vpop.eup %7357 }
 0x300   : > { %v686_v7 = vsel %vm670_vm2, %v7358_v6, 0.0 }
 0x301   : > { %687 = vadd.xlane.f32.xlu1 %v686_v7 }
 0x312   : > { %917 = vrot.lane.b32.xlu1 %v8056_v45, %s7798_s5 }
 0x386   : > { %v685_v10 = vpop.xlane.xlu1 %684 }
 0x387   : > { %7359 = vrcp.f32 %v685_v10 }
 0x38a   : > { %v688_v11 = vpop.xlane.xlu1 %687 }
 0x38b   : > { %7361 = vrcp.f32 %v688_v11 }
 0x38e   : > { %v918_v17 = vpop.permute.xlu1 %917 }
 0x394   : > { %v7360_v12 = vpop.eup %7359 }
 0x395   : > { %v690_v13 = vmul.f32 %v7360_v12, %v7356_v4 }
 0x397   : > { %6886 = vmatmul.mubr.msk.f32.vlgmr.msra.gmra.mxu1 %vm670_vm2, %v690_v13 }
 0x398   : > { %v7362_v14 = vpop.eup %7361  ;;  %6889 = vmatpush3.msra.mxu1 %v8069_v50  ;;  %6890 = vmatprep.mubr.msk.f32.mxu1 %vm7797_vm0, %v7796_v3 }
 0x399   : > { %6893 = vmatprep.subr.mxu1 %v7796_v3  ;;  %v692_v15 = vmul.f32 %v7362_v14, %v7358_v6 }
 0x39b   : > { %6891 = vmatmul.mubr.msk.f32.vlgmr.msra.gmra.mxu1 %vm670_vm2, %v692_v15 }
 0x39c   : > { %6894 = vmatpush3.xpose.msk.msra.mxu1 %vm517_vm1, %v842_v16  ;;  %6895 = vmatprep.mubr.msk.f32.mxu1 %vm7797_vm0, %v7796_v3 }
 0x39d   : > { %6898 = vmatprep.subr.mxu1 %v7796_v3 }
 0x39f   : > { %6896 = vmatmul.mubr.msk.f32.vlgmr.msra.gmra.mxu1 %vm517_vm1, %v840_v8 }
 0x3a0   : > { %6899 = vmatpush3.xpose.msk.msra.mxu1 %vm517_vm1, %v920_v9  ;;  %6900 = vmatprep.mubr.msk.f32.mxu1 %vm7797_vm0, %v7796_v3 }
 0x3a1   : > { %6903 = vmatprep.subr.mxu1 %v7796_v3 }
 0x3a3   : > { %6901 = vmatmul.mubr.msk.f32.vlgmr.msra.gmra.mxu1 %vm517_vm1, %v918_v17 }
 0x3a4   : > { %6905 = vmatprep.mubr.msk.f32.mxu1 %vm7797_vm0, %v7796_v3 }
 0x457   : > { %v8097_v18 = vpop.f32.mrf.mxu1 }
 0x459   : > { %v6887_v19 = vpop.f32.mrf.mxu1 }
 0x45b   : > { %v8099_v20 = vpop.f32.mrf.mxu1 }
 0x45d   : > { %v6892_v21 = vpop.f32.mrf.mxu1 }
 0x45f   : > { %v913_v22 = vpop.f32.mrf.mxu1 }
 0x460   : > { %v995_v23 = vsel %vm670_vm2, %v913_v22, -inf }
 0x461   : > { %996 = vmax.xlane.f32.xlu0 %v995_v23  ;;  %v6897_v24 = vpop.f32.mrf.mxu1 }
 0x463   : > { %v991_v25 = vpop.f32.mrf.mxu1 }
 0x464   : > { %v998_v26 = vsel %vm670_vm2, %v991_v25, -inf }
 0x465   : > { %999 = vmax.xlane.f32.xlu1 %v998_v26  ;;  %v6902_v27 = vpop.f32.mrf.mxu1 }
 0x476   : > { %1095 = vrot.lane.b32.xlu1 %v8069_v50, %s7798_s5 }
 0x47a   : > { %1173 = vrot.lane.b32.xlu1 %v8037_v39, %s7799_s26 }
 0x47e   : > { %1251 = vrot.lane.b32.xlu1 %v8047_v43, %s7799_s26 }
 0x482   : > { %1249 = vrot.lane.b32.xlu1 %v8056_v45, %s7799_s26 }
 0x4ea   : > { %v997_v28 = vpop.xlane.xlu0 %996 }
 0x4eb   : > { %v1001_v29 = vsub.f32 %v913_v22, %v997_v28 }
 0x4ed   : > { %v1003_v32 = vmul.f32 1.442695, %v1001_v29 }
 0x4ee   : > { %v1000_v34 = vpop.xlane.xlu1 %999 }
 0x4ef   : > { %7363 = vpow2.f32 %v1003_v32  ;;  %v1002_v35 = vsub.f32 %v991_v25, %v1000_v34 }
 0x4f1   : > { %v1005_v36 = vmul.f32 1.442695, %v1002_v35 }
 0x4f2   : > { %v1096_v38 = vpop.permute.xlu1 %1095 }
 0x4f3   : > { %7365 = vpow2.f32 %v1005_v36 }
 0x4f6   : > { %v1174_v41 = vpop.permute.xlu1 %1173 }
 0x4f7   : > { %6914 = vmatpush3.xpose.msk.msra.mxu0 %vm517_vm1, %v1174_v41 }
 0x4f8   : > { %6923 = vmatprep.subr.mxu0 %v7796_v3 }
 0x4fa   : > { %v1252_v57 = vpop.permute.xlu1 %1251 }
 0x4fc   : > { %v7364_v42 = vpop.eup %7363 }
 0x4fd   : > { %v1007_v44 = vsel %vm670_vm2, %v7364_v42, 0.0 }
 0x4fe   : > { %1008 = vadd.xlane.f32.xlu0 %v1007_v44  ;;  %v1250_v59 = vpop.permute.xlu1 %1249 }
 0x500   : > { %v7366_v46 = vpop.eup %7365 }
 0x501   : > { %v1010_v48 = vsel %vm670_vm2, %v7366_v46, 0.0 }
 0x502   : > { %1011 = vadd.xlane.f32.xlu0 %v1010_v48 }
 0x518   : > { %1018 = vrot.lane.b32.xlu0 %v8061_v47, %s7798_s5 }
 0x51c   : > { %1171 = vrot.lane.b32.xlu0 %v8035_v37, %s7799_s26 }
 0x587   : > { %v1009_v49 = vpop.xlane.xlu0 %1008 }
 0x588   : > { %7367 = vrcp.f32 %v1009_v49 }
 0x58b   : > { %v1012_v51 = vpop.xlane.xlu0 %1011 }
 0x58c   : > { %7369 = vrcp.f32 %v1012_v51 }
 0x58f   : > { %v1019_v52 = vpop.permute.xlu0 %1018 }
 0x590   : > { %6904 = vmatpush3.msra.mxu1 %v1019_v52 }
 0x591   : > { %6908 = vmatprep.subr.mxu1 %v7796_v3 }
 0x593   : > { %v1172_v53 = vpop.permute.xlu0 %1171 }
 0x594   : > { %6916 = vmatmul.mubr.msk.f32.vlgmr.msra.gmra.mxu0 %vm517_vm1, %v1172_v53 }
 0x595   : > { %v7368_v54 = vpop.eup %7367  ;;  %6925 = vmatprep.mubr.msk.f32.mxu0 %vm7797_vm0, %v7796_v3 }
 0x596   : > { %v1014_v55 = vmul.f32 %v7368_v54, %v7364_v42 }
 0x598   : > { %6906 = vmatmul.mubr.msk.f32.vlgmr.msra.gmra.mxu1 %vm670_vm2, %v1014_v55 }
 0x599   : > { %v7370_v56 = vpop.eup %7369  ;;  %6909 = vmatpush3.msra.mxu1 %v1096_v38  ;;  %6910 = vmatprep.mubr.msk.f32.mxu1 %vm7797_vm0, %v7796_v3 }
 0x59a   : > { %6918 = vmatprep.subr.mxu1 %v7796_v3  ;;  %v1016_v58 = vmul.f32 %v7370_v56, %v7366_v46 }
 0x59c   : > { %6911 = vmatmul.mubr.msk.f32.vlgmr.msra.gmra.mxu1 %vm670_vm2, %v1016_v58 }
 0x59d   : > { %6919 = vmatpush3.xpose.msk.msra.mxu1 %vm517_vm1, %v1252_v57  ;;  %6920 = vmatprep.mubr.msk.f32.mxu1 %vm7797_vm0, %v7796_v3 }
 0x59e   : > { %6928 = vmatprep.subr.mxu1 %v7796_v3 }
 0x5a0   : > { %6921 = vmatmul.mubr.msk.f32.vlgmr.msra.gmra.mxu1 %vm517_vm1, %v1250_v59 }
 0x5a1   : > { %6930 = vmatprep.mubr.msk.f32.mxu1 %vm7797_vm0, %v7796_v3 }
 0x654   : > { %v1245_v60 = vpop.f32.mrf.mxu0 }
 0x655   : > { %v1327_v61 = vsel %vm670_vm2, %v1245_v60, -inf }
 0x656   : > { %1328 = vmax.xlane.f32.xlu0 %v1327_v61  ;;  %v6917_v62 = vpop.f32.mrf.mxu0 }
 0x658   : > { %v8136_v63 = vpop.f32.mrf.mxu1 }
 0x65a   : > { %v6907_v4 = vpop.f32.mrf.mxu1 }
 0x65c   : > { %v8138_v5 = vpop.f32.mrf.mxu1 }
 0x65d   : > { %v7152_v6 = vpack.i.bf16 %v8138_v5, %v8136_v63 }
 0x65e   : > { %v6912_v7 = vpop.f32.mrf.mxu1 }
 0x660   : > { %v1323_v8 = vpop.f32.mrf.mxu1 }
 0x661   : > { %v1330_v9 = vsel %vm670_vm2, %v1323_v8, -inf }
 0x662   : > { %1331 = vmax.xlane.f32.xlu1 %v1330_v9  ;;  %v6922_v10 = vpop.f32.mrf.mxu1 }
 0x673   : > { %1425 = vrot.lane.b32.xlu1 %v8069_v50, %s7799_s26 }
 0x677   : > { %1503 = vrot.lane.b32.xlu1 %v8037_v39, %s7800_s12 }
 0x67b   : > { %1581 = vrot.lane.b32.xlu1 %v8047_v43, %s7800_s12 }
 0x67f   : > { %1579 = vrot.lane.b32.xlu1 %v8056_v45, %s7800_s12 }
 0x6df   : > { %v1329_v11 = vpop.xlane.xlu0 %1328 }
 0x6e0   : > { %v1333_v12 = vsub.f32 %v1245_v60, %v1329_v11 }
 0x6e2   : > { %v1335_v13 = vmul.f32 1.442695, %v1333_v12 }
 0x6e4   : > { %7371 = vpow2.f32 %v1335_v13 }
 0x6eb   : > { %v1332_v14 = vpop.xlane.xlu1 %1331 }
 0x6ec   : > { %v1334_v15 = vsub.f32 %v1323_v8, %v1332_v14 }
 0x6ee   : > { %v1337_v16 = vmul.f32 1.442695, %v1334_v15 }
 0x6ef   : > { %v1426_v17 = vpop.permute.xlu1 %1425 }
 0x6f0   : > { %7373 = vpow2.f32 %v1337_v16  ;;  %6929 = vmatpush3.msra.mxu1 %v1426_v17 }
 0x6f1   : > { %v7372_v19 = vpop.eup %7371  ;;  %6938 = vmatprep.subr.mxu1 %v7796_v3 }
 0x6f2   : > { %v1339_v21 = vsel %vm670_vm2, %v7372_v19, 0.0 }
 0x6f3   : > { %1340 = vadd.xlane.f32.xlu0 %v1339_v21  ;;  %v1504_v29 = vpop.permute.xlu1 %1503 }
 0x6f7   : > { %v1582_v35 = vpop.permute.xlu1 %1581 }
 0x6fb   : > { %v1580_v38 = vpop.permute.xlu1 %1579 }
 0x6fd   : > { %v7374_v22 = vpop.eup %7373 }
 0x6fe   : > { %v1342_v23 = vsel %vm670_vm2, %v7374_v22, 0.0 }
 0x6ff   : > { %1343 = vadd.xlane.f32.xlu0 %v1342_v23 }
 0x715   : > { %1349 = vrot.lane.b32.xlu0 %v8061_v47, %s7799_s26 }
 0x719   : > { %1501 = vrot.lane.b32.xlu0 %v8035_v37, %s7800_s12 }
 0x77c   : > { %v1341_v24 = vpop.xlane.xlu0 %1340 }
 0x77d   : > { %7375 = vrcp.f32 %v1341_v24 }
 0x788   : > { %v1344_v25 = vpop.xlane.xlu0 %1343 }
 0x789   : > { %7377 = vrcp.f32 %v1344_v25 }
 0x78a   : > { %v7376_v26 = vpop.eup %7375 }
 0x78b   : > { %v1346_v27 = vmul.f32 %v7376_v26, %v7372_v19 }
 0x78c   : > { %v1350_v28 = vpop.permute.xlu0 %1349 }
 0x78d   : > { %6924 = vmatpush3.msra.mxu0 %v1350_v28 }
 0x78e   : > { %6926 = vmatmul.mubr.msk.f32.vlgmr.msra.gmra.mxu0 %vm670_vm2, %v1346_v27  ;;  %6933 = vmatprep.subr.mxu0 %v7796_v3 }
 0x78f   : > { %6934 = vmatpush3.xpose.msk.msra.mxu0 %vm517_vm1, %v1504_v29  ;;  %6935 = vmatprep.mubr.msk.f32.mxu0 %vm7797_vm0, %v7796_v3 }
 0x790   : > { %v1502_v32 = vpop.permute.xlu0 %1501  ;;  %6943 = vmatprep.subr.mxu0 %v7796_v3 }
 0x792   : > { %6936 = vmatmul.mubr.msk.f32.vlgmr.msra.gmra.mxu0 %vm517_vm1, %v1502_v32 }
 0x793   : > { %6945 = vmatprep.mubr.msk.f32.mxu0 %vm7797_vm0, %v7796_v3 }
 0x796   : > { %v7378_v34 = vpop.eup %7377 }
 0x797   : > { %v1348_v36 = vmul.f32 %v7378_v34, %v7374_v22 }
 0x799   : > { %6931 = vmatmul.mubr.msk.f32.vlgmr.msra.gmra.mxu1 %vm670_vm2, %v1348_v36 }
 0x79a   : > { %6939 = vmatpush3.xpose.msk.msra.mxu1 %vm517_vm1, %v1582_v35  ;;  %6940 = vmatprep.mubr.msk.f32.mxu1 %vm7797_vm0, %v7796_v3 }
 0x79b   : > { %6948 = vmatprep.subr.mxu1 %v7796_v3 }
 0x79d   : > { %6941 = vmatmul.mubr.msk.f32.vlgmr.msra.gmra.mxu1 %vm517_vm1, %v1580_v38 }
 0x79e   : > { %6950 = vmatprep.mubr.msk.f32.mxu1 %vm7797_vm0, %v7796_v3 }
 0x84e   : > { %v8175_v41 = vpop.f32.mrf.mxu0 }
 0x850   : > { %v6927_v42 = vpop.f32.mrf.mxu0 }
 0x852   : > { %v1575_v44 = vpop.f32.mrf.mxu0 }
 0x853   : > { %v1657_v46 = vsel %vm670_vm2, %v1575_v44, -inf }
 0x854   : > { %1658 = vmax.xlane.f32.xlu0 %v1657_v46  ;;  %v6937_v48 = vpop.f32.mrf.mxu0 }
 0x859   : > { %v8178_v49 = vpop.f32.mrf.mxu1 }
 0x85a   : > { %v7157_v51 = vpack.i.bf16 %v8178_v49, %v8175_v41 }
 0x85b   : > { %v6932_v52 = vpop.f32.mrf.mxu1 }
 0x85d   : > { %v1653_v53 = vpop.f32.mrf.mxu1 }
 0x85e   : > { %v1660_v54 = vsel %vm670_vm2, %v1653_v53, -inf }
 0x85f   : > { %1661 = vmax.xlane.f32.xlu1 %v1660_v54  ;;  %v6942_v55 = vpop.f32.mrf.mxu1 }
 0x870   : > { %1755 = vrot.lane.b32.xlu1 %v8069_v50, %s7800_s12 }
 0x874   : > { %1833 = vrot.lane.b32.xlu1 %v8037_v39, %s7801_s7 }
 0x878   : > { %1911 = vrot.lane.b32.xlu1 %v8047_v43, %s7801_s7 }
 0x87c   : > { %1909 = vrot.lane.b32.xlu1 %v8056_v45, %s7801_s7 }
 0x8dd   : > { %v1659_v56 = vpop.xlane.xlu0 %1658 }
 0x8de   : > { %v1663_v57 = vsub.f32 %v1575_v44, %v1659_v56 }
 0x8e0   : > { %v1665_v58 = vmul.f32 1.442695, %v1663_v57 }
 0x8e2   : > { %7379 = vpow2.f32 %v1665_v58 }
 0x8e8   : > { %v1662_v59 = vpop.xlane.xlu1 %1661 }
 0x8e9   : > { %v1664_v60 = vsub.f32 %v1653_v53, %v1662_v59 }
 0x8eb   : > { %v1667_v61 = vmul.f32 1.442695, %v1664_v60 }
 0x8ec   : > { %v1756_v62 = vpop.permute.xlu1 %1755 }
 0x8ed   : > { %7381 = vpow2.f32 %v1667_v61  ;;  %6949 = vmatpush3.msra.mxu1 %v1756_v62 }
 0x8ee   : > { %6958 = vmatprep.subr.mxu1 %v7796_v3 }
 0x8ef   : > { %v7380_v4 = vpop.eup %7379 }
 0x8f0   : > { %v1669_v7 = vsel %vm670_vm2, %v7380_v4, 0.0  ;;  %v1834_v15 = vpop.permute.xlu1 %1833 }
 0x8f1   : > { %1670 = vadd.xlane.f32.xlu0 %v1669_v7 }
 0x8f4   : > { %v1912_v19 = vpop.permute.xlu1 %1911 }
 0x8f8   : > { %v1910_v22 = vpop.permute.xlu1 %1909 }
 0x8fa   : > { %v7382_v8 = vpop.eup %7381 }
 0x8fb   : > { %v1672_v9 = vsel %vm670_vm2, %v7382_v8, 0.0 }
 0x8fc   : > { %1673 = vadd.xlane.f32.xlu0 %v1672_v9 }
 0x912   : > { %1679 = vrot.lane.b32.xlu0 %v8061_v47, %s7800_s12 }
 0x916   : > { %1831 = vrot.lane.b32.xlu0 %v8035_v37, %s7801_s7 }
 0x97a   : > { %v1671_v10 = vpop.xlane.xlu0 %1670 }
 0x97b   : > { %7383 = vrcp.f32 %v1671_v10 }
 0x985   : > { %v1674_v11 = vpop.xlane.xlu0 %1673 }
 0x986   : > { %7385 = vrcp.f32 %v1674_v11 }
 0x988   : > { %v7384_v12 = vpop.eup %7383 }
 0x989   : > { %v1680_v13 = vpop.permute.xlu0 %1679  ;;  %v1676_v14 = vmul.f32 %v7384_v12, %v7380_v4 }
 0x98a   : > { %6944 = vmatpush3.msra.mxu0 %v1680_v13 }
 0x98b   : > { %6946 = vmatmul.mubr.msk.f32.vlgmr.msra.gmra.mxu0 %vm670_vm2, %v1676_v14  ;;  %6953 = vmatprep.subr.mxu0 %v7796_v3 }
 0x98c   : > { %6954 = vmatpush3.xpose.msk.msra.mxu0 %vm517_vm1, %v1834_v15  ;;  %6955 = vmatprep.mubr.msk.f32.mxu0 %vm7797_vm0, %v7796_v3 }
 0x98d   : > { %v1832_v16 = vpop.permute.xlu0 %1831  ;;  %6963 = vmatprep.subr.mxu0 %v7796_v3 }
 0x98f   : > { %6956 = vmatmul.mubr.msk.f32.vlgmr.msra.gmra.mxu0 %vm517_vm1, %v1832_v16 }
 0x990   : > { %6965 = vmatprep.mubr.msk.f32.mxu0 %vm7797_vm0, %v7796_v3 }
 0x993   : > { %v7386_v17 = vpop.eup %7385 }
 0x994   : > { %v1678_v21 = vmul.f32 %v7386_v17, %v7382_v8 }
 0x996   : > { %6951 = vmatmul.mubr.msk.f32.vlgmr.msra.gmra.mxu1 %vm670_vm2, %v1678_v21 }
 0x997   : > { %6959 = vmatpush3.xpose.msk.msra.mxu1 %vm517_vm1, %v1912_v19  ;;  %6960 = vmatprep.mubr.msk.f32.mxu1 %vm7797_vm0, %v7796_v3 }
 0x998   : > { %6968 = vmatprep.subr.mxu1 %v7796_v3 }
 0x99a   : > { %6961 = vmatmul.mubr.msk.f32.vlgmr.msra.gmra.mxu1 %vm517_vm1, %v1910_v22 }
 0x99b   : > { %6970 = vmatprep.mubr.msk.f32.mxu1 %vm7797_vm0, %v7796_v3 }
 0xa4b   : > { %v8215_v23 = vpop.f32.mrf.mxu0 }
 0xa4d   : > { %v6947_v24 = vpop.f32.mrf.mxu0 }
 0xa4f   : > { %v1905_v25 = vpop.f32.mrf.mxu0 }
 0xa50   : > { %v1987_v26 = vsel %vm670_vm2, %v1905_v25, -inf }
 0xa51   : > { %1988 = vmax.xlane.f32.xlu0 %v1987_v26  ;;  %v6957_v27 = vpop.f32.mrf.mxu0 }
 0xa56   : > { %v8218_v28 = vpop.f32.mrf.mxu1 }
 0xa57   : > { %v7162_v29 = vpack.i.bf16 %v8218_v28, %v8215_v23  ;;  %v7219_v28 = vld [vmem:[%s3230_s17 + $0x38] sm:$0xff]  }
 0xa58   : > { %v6952_v32 = vpop.f32.mrf.mxu1 }
 0xa5a   : > { %v1983_v34 = vpop.f32.mrf.mxu1 }
 0xa5b   : > { %v1990_v35 = vsel %vm670_vm2, %v1983_v34, -inf }
 0xa5c   : > { %1991 = vmax.xlane.f32.xlu1 %v1990_v35  ;;  %v6962_v36 = vpop.f32.mrf.mxu1 }
 0xa6d   : > { %2085 = vrot.lane.b32.xlu1 %v8069_v50, %s7801_s7 }
 0xa71   : > { %2163 = vrot.lane.b32.xlu1 %v8037_v39, %s7802_s16 }
 0xa75   : > { %2241 = vrot.lane.b32.xlu1 %v8047_v43, %s7802_s16 }
 0xa79   : > { %2239 = vrot.lane.b32.xlu1 %v8056_v45, %s7802_s16 }
 0xada   : > { %v1989_v38 = vpop.xlane.xlu0 %1988 }
 0xadb   : > { %v1993_v42 = vsub.f32 %v1905_v25, %v1989_v38 }
 0xadd   : > { %v1995_v44 = vmul.f32 1.442695, %v1993_v42 }
 0xadf   : > { %7387 = vpow2.f32 %v1995_v44 }
 0xae5   : > { %v1992_v46 = vpop.xlane.xlu1 %1991 }
 0xae6   : > { %v1994_v48 = vsub.f32 %v1983_v34, %v1992_v46 }
 0xae8   : > { %v1997_v52 = vmul.f32 1.442695, %v1994_v48 }
 0xae9   : > { %v2086_v53 = vpop.permute.xlu1 %2085 }
 0xaea   : > { %7389 = vpow2.f32 %v1997_v52  ;;  %6969 = vmatpush3.msra.mxu1 %v2086_v53 }
 0xaeb   : > { %6978 = vmatprep.subr.mxu1 %v7796_v3 }
 0xaec   : > { %v7388_v54 = vpop.eup %7387 }
 0xaed   : > { %v1999_v55 = vsel %vm670_vm2, %v7388_v54, 0.0  ;;  %v2164_v4 = vpop.permute.xlu1 %2163 }
 0xaee   : > { %2000 = vadd.xlane.f32.xlu0 %v1999_v55 }
 0xaf1   : > { %v2242_v9 = vpop.permute.xlu1 %2241 }
 0xaf5   : > { %v2240_v11 = vpop.permute.xlu1 %2239 }
 0xaf7   : > { %v7390_v56 = vpop.eup %7389 }
 0xaf8   : > { %v2002_v57 = vsel %vm670_vm2, %v7390_v56, 0.0 }
 0xaf9   : > { %2003 = vadd.xlane.f32.xlu0 %v2002_v57 }
 0xb0f   : > { %2009 = vrot.lane.b32.xlu0 %v8061_v47, %s7801_s7 }
 0xb13   : > { %2161 = vrot.lane.b32.xlu0 %v8035_v37, %s7802_s16 }
 0xb77   : > { %v2001_v58 = vpop.xlane.xlu0 %2000 }
 0xb78   : > { %7391 = vrcp.f32 %v2001_v58 }
 0xb82   : > { %v2004_v59 = vpop.xlane.xlu0 %2003 }
 0xb83   : > { %7393 = vrcp.f32 %v2004_v59 }
 0xb85   : > { %v7392_v60 = vpop.eup %7391 }
 0xb86   : > { %v2010_v61 = vpop.permute.xlu0 %2009  ;;  %v2006_v62 = vmul.f32 %v7392_v60, %v7388_v54 }
 0xb87   : > { %6964 = vmatpush3.msra.mxu0 %v2010_v61 }
 0xb88   : > { %6966 = vmatmul.mubr.msk.f32.vlgmr.msra.gmra.mxu0 %vm670_vm2, %v2006_v62  ;;  %6973 = vmatprep.subr.mxu0 %v7796_v3 }
 0xb89   : > { %6974 = vmatpush3.xpose.msk.msra.mxu0 %vm517_vm1, %v2164_v4  ;;  %6975 = vmatprep.mubr.msk.f32.mxu0 %vm7797_vm0, %v7796_v3 }
 0xb8a   : > { %v2162_v7 = vpop.permute.xlu0 %2161  ;;  %6983 = vmatprep.subr.mxu0 %v7796_v3 }
 0xb8c   : > { %6976 = vmatmul.mubr.msk.f32.vlgmr.msra.gmra.mxu0 %vm517_vm1, %v2162_v7 }
 0xb8d   : > { %6985 = vmatprep.mubr.msk.f32.mxu0 %vm7797_vm0, %v7796_v3 }
 0xb90   : > { %v7394_v8 = vpop.eup %7393 }
 0xb91   : > { %v2008_v10 = vmul.f32 %v7394_v8, %v7390_v56 }
 0xb93   : > { %6971 = vmatmul.mubr.msk.f32.vlgmr.msra.gmra.mxu1 %vm670_vm2, %v2008_v10 }
 0xb94   : > { %6979 = vmatpush3.xpose.msk.msra.mxu1 %vm517_vm1, %v2242_v9  ;;  %6980 = vmatprep.mubr.msk.f32.mxu1 %vm7797_vm0, %v7796_v3 }
 0xb95   : > { %6988 = vmatprep.subr.mxu1 %v7796_v3 }
 0xb97   : > { %6981 = vmatmul.mubr.msk.f32.vlgmr.msra.gmra.mxu1 %vm517_vm1, %v2240_v11 }
 0xb98   : > { %6990 = vmatprep.mubr.msk.f32.mxu1 %vm7797_vm0, %v7796_v3 }
 0xc48   : > { %v8255_v12 = vpop.f32.mrf.mxu0 }
 0xc4a   : > { %v6967_v13 = vpop.f32.mrf.mxu0 }
 0xc4c   : > { %v2235_v14 = vpop.f32.mrf.mxu0 }
 0xc4d   : > { %v2317_v15 = vsel %vm670_vm2, %v2235_v14, -inf }
 0xc4e   : > { %2318 = vmax.xlane.f32.xlu0 %v2317_v15  ;;  %v6977_v16 = vpop.f32.mrf.mxu0 }
 0xc53   : > { %v8258_v17 = vpop.f32.mrf.mxu1 }
 0xc54   : > { %v7167_v19 = vpack.i.bf16 %v8258_v17, %v8255_v12 }
 0xc55   : > { %v6972_v21 = vpop.f32.mrf.mxu1 }
 0xc57   : > { %v2313_v22 = vpop.f32.mrf.mxu1 }
 0xc58   : > { %v2320_v24 = vsel %vm670_vm2, %v2313_v22, -inf }
 0xc59   : > { %2321 = vmax.xlane.f32.xlu1 %v2320_v24  ;;  %v6982_v25 = vpop.f32.mrf.mxu1 }
 0xc6a   : > { %2415 = vrot.lane.b32.xlu1 %v8069_v50, %s7802_s16 }
 0xc6e   : > { %2493 = vrot.lane.b32.xlu1 %v8037_v39, %s7803_s2 }
 0xc72   : > { %2571 = vrot.lane.b32.xlu1 %v8047_v43, %s7803_s2 }
 0xc76   : > { %2569 = vrot.lane.b32.xlu1 %v8056_v45, %s7803_s2 }
 0xcd7   : > { %v2319_v26 = vpop.xlane.xlu0 %2318 }
 0xcd8   : > { %v2323_v27 = vsub.f32 %v2235_v14, %v2319_v26 }
 0xcda   : > { %v2325_v32 = vmul.f32 1.442695, %v2323_v27 }
 0xcdc   : > { %7395 = vpow2.f32 %v2325_v32 }
 0xce2   : > { %v2322_v34 = vpop.xlane.xlu1 %2321 }
 0xce3   : > { %v2324_v35 = vsub.f32 %v2313_v22, %v2322_v34 }
 0xce5   : > { %v2327_v36 = vmul.f32 1.442695, %v2324_v35 }
 0xce6   : > { %v2416_v38 = vpop.permute.xlu1 %2415 }
 0xce7   : > { %7397 = vpow2.f32 %v2327_v36  ;;  %6989 = vmatpush3.msra.mxu1 %v2416_v38 }
 0xce8   : > { %6998 = vmatprep.subr.mxu1 %v7796_v3 }
 0xce9   : > { %v7396_v42 = vpop.eup %7395 }
 0xcea   : > { %v2329_v44 = vsel %vm670_vm2, %v7396_v42, 0.0  ;;  %v2494_v57 = vpop.permute.xlu1 %2493 }
 0xceb   : > { %2330 = vadd.xlane.f32.xlu0 %v2329_v44 }
 0xcee   : > { %v2572_v60 = vpop.permute.xlu1 %2571 }
 0xcf2   : > { %v2570_v62 = vpop.permute.xlu1 %2569 }
 0xcf4   : > { %v7398_v46 = vpop.eup %7397 }
 0xcf5   : > { %v2332_v48 = vsel %vm670_vm2, %v7398_v46, 0.0 }
 0xcf6   : > { %2333 = vadd.xlane.f32.xlu0 %v2332_v48 }
 0xd0c   : > { %2339 = vrot.lane.b32.xlu0 %v8061_v47, %s7802_s16 }
 0xd10   : > { %2491 = vrot.lane.b32.xlu0 %v8035_v37, %s7803_s2 }
 0xd74   : > { %v2331_v52 = vpop.xlane.xlu0 %2330 }
 0xd75   : > { %7399 = vrcp.f32 %v2331_v52 }
 0xd7f   : > { %v2334_v53 = vpop.xlane.xlu0 %2333 }
 0xd80   : > { %7401 = vrcp.f32 %v2334_v53 }
 0xd82   : > { %v7400_v54 = vpop.eup %7399 }
 0xd83   : > { %v2340_v55 = vpop.permute.xlu0 %2339  ;;  %v2336_v56 = vmul.f32 %v7400_v54, %v7396_v42 }
 0xd84   : > { %6984 = vmatpush3.msra.mxu0 %v2340_v55 }
 0xd85   : > { %6986 = vmatmul.mubr.msk.f32.vlgmr.msra.gmra.mxu0 %vm670_vm2, %v2336_v56  ;;  %6993 = vmatprep.subr.mxu0 %v7796_v3 }
 0xd86   : > { %6994 = vmatpush3.xpose.msk.msra.mxu0 %vm517_vm1, %v2494_v57  ;;  %6995 = vmatprep.mubr.msk.f32.mxu0 %vm7797_vm0, %v7796_v3 }
 0xd87   : > { %v2492_v58 = vpop.permute.xlu0 %2491  ;;  %7003 = vmatprep.subr.mxu0 %v7796_v3 }
 0xd89   : > { %6996 = vmatmul.mubr.msk.f32.vlgmr.msra.gmra.mxu0 %vm517_vm1, %v2492_v58 }
 0xd8a   : > { %7005 = vmatprep.mubr.msk.f32.mxu0 %vm7797_vm0, %v7796_v3 }
 0xd8d   : > { %v7402_v59 = vpop.eup %7401 }
 0xd8e   : > { %v2338_v61 = vmul.f32 %v7402_v59, %v7398_v46 }
 0xd90   : > { %6991 = vmatmul.mubr.msk.f32.vlgmr.msra.gmra.mxu1 %vm670_vm2, %v2338_v61 }
 0xd91   : > { %6999 = vmatpush3.xpose.msk.msra.mxu1 %vm517_vm1, %v2572_v60  ;;  %7000 = vmatprep.mubr.msk.f32.mxu1 %vm7797_vm0, %v7796_v3 }
 0xd92   : > { %7008 = vmatprep.subr.mxu1 %v7796_v3 }
 0xd94   : > { %7001 = vmatmul.mubr.msk.f32.vlgmr.msra.gmra.mxu1 %vm517_vm1, %v2570_v62 }
 0xd95   : > { %7010 = vmatprep.mubr.msk.f32.mxu1 %vm7797_vm0, %v7796_v3 }
 0xe45   : > { %v8295_v4 = vpop.f32.mrf.mxu0 }
 0xe47   : > { %v6987_v7 = vpop.f32.mrf.mxu0 }
 0xe49   : > { %v2565_v8 = vpop.f32.mrf.mxu0 }
 0xe4a   : > { %v2647_v9 = vsel %vm670_vm2, %v2565_v8, -inf }
 0xe4b   : > { %2648 = vmax.xlane.f32.xlu0 %v2647_v9  ;;  %v6997_v10 = vpop.f32.mrf.mxu0 }
 0xe50   : > { %v8298_v11 = vpop.f32.mrf.mxu1 }
 0xe51   : > { %v7172_v13 = vpack.i.bf16 %v8298_v11, %v8295_v4  ;;  %v7221_v4 = vld [vmem:[%s3230_s17 + $0x28] sm:$0xff]   ;;  %v7222_v11 = vld [vmem:[%s3230_s17 + $0x20] sm:$0xff]  }
 0xe52   : > { %v6992_v14 = vpop.f32.mrf.mxu1 }
 0xe54   : > { %v2643_v15 = vpop.f32.mrf.mxu1 }
 0xe55   : > { %v2650_v16 = vsel %vm670_vm2, %v2643_v15, -inf }
 0xe56   : > { %2651 = vmax.xlane.f32.xlu1 %v2650_v16  ;;  %v7002_v21 = vpop.f32.mrf.mxu1 }
 0xe67   : > { %2745 = vrot.lane.b32.xlu1 %v8069_v50, %s7803_s2 }
 0xe6b   : > { %2823 = vrot.lane.b32.xlu1 %v8037_v39, %s7804_s1 }
 0xe6f   : > { %2901 = vrot.lane.b32.xlu1 %v8047_v43, %s7804_s1 }
 0xe73   : > { %2899 = vrot.lane.b32.xlu1 %v8056_v45, %s7804_s1 }
 0xed4   : > { %v2649_v22 = vpop.xlane.xlu0 %2648 }
 0xed5   : > { %v2653_v24 = vsub.f32 %v2565_v8, %v2649_v22 }
 0xed7   : > { %v2655_v25 = vmul.f32 1.442695, %v2653_v24 }
 0xed9   : > { %7403 = vpow2.f32 %v2655_v25  ;;  %v7224_v25 = vld [vmem:[%s3230_s17 + $0x10] sm:$0xff]  }
 0xedf   : > { %v2652_v26 = vpop.xlane.xlu1 %2651 }
 0xee0   : > { %v2654_v27 = vsub.f32 %v2643_v15, %v2652_v26  ;;  %v7225_v26 = vld [vmem:[%s3230_s17 + $0x8] sm:$0xff]  }
 0xee2   : > { %v2657_v32 = vmul.f32 1.442695, %v2654_v27 }
 0xee3   : > { %v2746_v34 = vpop.permute.xlu1 %2745 }
 0xee4   : > { %7405 = vpow2.f32 %v2657_v32  ;;  %7009 = vmatpush3.msra.mxu1 %v2746_v34  ;;  %v7226_v34 = vld [vmem:[%s3230_s17] sm:$0xff]  }
 0xee5   : > { %7018 = vmatprep.subr.mxu1 %v7796_v3 }
 0xee6   : > { %v7404_v35 = vpop.eup %7403 }
 0xee7   : > { %v2659_v39 = vsel %vm670_vm2, %v7404_v35, 0.0  ;;  %v2824_v48 = vpop.permute.xlu1 %2823 }
 0xee8   : > { %2660 = vadd.xlane.f32.xlu0 %v2659_v39 }
 0xeeb   : > { %v2902_v53 = vpop.permute.xlu1 %2901 }
 0xeef   : > { %v2900_v55 = vpop.permute.xlu1 %2899 }
 0xef1   : > { %v7406_v43 = vpop.eup %7405 }
 0xef2   : > { %v2662_v36 = vsel %vm670_vm2, %v7406_v43, 0.0 }
 0xef3   : > { %2663 = vadd.xlane.f32.xlu0 %v2662_v36 }
 0xf09   : > { %2669 = vrot.lane.b32.xlu0 %v8061_v47, %s7803_s2 }
 0xf0d   : > { %2821 = vrot.lane.b32.xlu0 %v8035_v37, %s7804_s1 }
 0xf71   : > { %v2661_v45 = vpop.xlane.xlu0 %2660 }
 0xf72   : > { %7407 = vrcp.f32 %v2661_v45 }
 0xf7c   : > { %v2664_v38 = vpop.xlane.xlu0 %2663 }
 0xf7d   : > { %7409 = vrcp.f32 %v2664_v38 }
 0xf7f   : > { %v7408_v42 = vpop.eup %7407 }
 0xf80   : > { %v2670_v44 = vpop.permute.xlu0 %2669  ;;  %v2666_v46 = vmul.f32 %v7408_v42, %v7404_v35 }
 0xf81   : > { %7004 = vmatpush3.msra.mxu0 %v2670_v44 }
 0xf82   : > { %7006 = vmatmul.mubr.msk.f32.vlgmr.msra.gmra.mxu0 %vm670_vm2, %v2666_v46  ;;  %7013 = vmatprep.subr.mxu0 %v7796_v3 }
 0xf83   : > { %7014 = vmatpush3.xpose.msk.msra.mxu0 %vm517_vm1, %v2824_v48  ;;  %7015 = vmatprep.mubr.msk.f32.mxu0 %vm7797_vm0, %v7796_v3 }
 0xf84   : > { %v2822_v52 = vpop.permute.xlu0 %2821  ;;  %7023 = vmatprep.subr.mxu0 %v7796_v3 }
 0xf86   : > { %7016 = vmatmul.mubr.msk.f32.vlgmr.msra.gmra.mxu0 %vm517_vm1, %v2822_v52 }
 0xf87   : > { %7025 = vmatprep.mubr.msk.f32.mxu0 %vm7797_vm0, %v7796_v3 }
 0xf8a   : > { %v7410_v37 = vpop.eup %7409 }
 0xf8b   : > { %v2668_v54 = vmul.f32 %v7410_v37, %v7406_v43 }
 0xf8d   : > { %7011 = vmatmul.mubr.msk.f32.vlgmr.msra.gmra.mxu1 %vm670_vm2, %v2668_v54 }
 0xf8e   : > { %7019 = vmatpush3.xpose.msk.msra.mxu1 %vm517_vm1, %v2902_v53  ;;  %7020 = vmatprep.mubr.msk.f32.mxu1 %vm7797_vm0, %v7796_v3 }
 0xf8f   : > { %7028 = vmatprep.subr.mxu1 %v7796_v3 }
 0xf91   : > { %7021 = vmatmul.mubr.msk.f32.vlgmr.msra.gmra.mxu1 %vm517_vm1, %v2900_v55 }
 0xf92   : > { %7030 = vmatprep.mubr.msk.f32.mxu1 %vm7797_vm0, %v7796_v3 }
0x1042   : > { %v2741_v56 = vpop.f32.mrf.mxu0 }
0x1044   : > { %v7007_v57 = vpop.f32.mrf.mxu0 }
0x1046   : > { %v2895_v58 = vpop.f32.mrf.mxu0 }
0x1047   : > { %v2977_v59 = vsel %vm670_vm2, %v2895_v58, -inf }
0x1048   : > { %2978 = vmax.xlane.f32.xlu0 %v2977_v59  ;;  %v7017_v60 = vpop.f32.mrf.mxu0 }
0x104d   : > { %v2817_v61 = vpop.f32.mrf.mxu1 }
0x104e   : > { %v7177_v10 = vpack.i.bf16 %v2817_v61, %v2741_v56 }
0x104f   : > { %v7012_v62 = vpop.f32.mrf.mxu1 }
0x1051   : > { %v2973_v7 = vpop.f32.mrf.mxu1 }
0x1052   : > { %v2980_v8 = vsel %vm670_vm2, %v2973_v7, -inf }
0x1053   : > { %2981 = vmax.xlane.f32.xlu1 %v2980_v8  ;;  %v7022_v9 = vpop.f32.mrf.mxu1 }
0x1064   : > { %3075 = vrot.lane.b32.xlu1 %v8069_v50, %s7804_s1 }
0x1068   : > { %7153 = vrot.lane.b32.xlu1 %v7152_v6, %s7804_s1 }
0x106c   : > { %7158 = vrot.lane.b32.xlu1 %v7157_v51, %s7803_s2 }
0x1070   : > { %7168 = vrot.lane.b32.xlu1 %v7167_v19, %s7801_s7 }
0x1074   : > { %7178 = vrot.lane.b32.xlu1 %v7177_v10, %s7799_s26 }
0x10d1   : > { %v2979_v14 = vpop.xlane.xlu0 %2978 }
0x10d2   : > { %v2983_v50 = vsub.f32 %v2895_v58, %v2979_v14 }
0x10d4   : > { %v2985_v15 = vmul.f32 1.442695, %v2983_v50 }
0x10d6   : > { %7411 = vpow2.f32 %v2985_v15 }
0x10dc   : > { %v2982_v16 = vpop.xlane.xlu1 %2981 }
0x10dd   : > { %v2984_v63 = vsub.f32 %v2973_v7, %v2982_v16 }
0x10df   : > { %v2987_v5 = vmul.f32 1.442695, %v2984_v63 }
0x10e0   : > { %v3076_v6 = vpop.permute.xlu1 %3075 }
0x10e1   : > { %7413 = vpow2.f32 %v2987_v5  ;;  %7029 = vmatpush3.msra.mxu1 %v3076_v6 }
0x10e3   : > { %v7412_v41 = vpop.eup %7411 }
0x10e4   : > { %v2989_v49 = vsel %vm670_vm2, %v7412_v41, 0.0  ;;  %v7154_v36 = vpop.permute.xlu1 %7153 }
0x10e5   : > { %2990 = vadd.xlane.f32.xlu0 %v2989_v49  ;;  %v7156_v42 = vunpack.i.h.bf16 %v7154_v36  ;;  %v7155_v44 = vunpack.i.l.bf16 %v7154_v36 }
0x10e7   : > { %v3208_v54 = vsel %vm517_vm1, %v8099_v20, %v7156_v42  ;;  %v3207_v55 = vsel %vm517_vm1, %v8097_v18, %v7155_v44  ;;  %v3497_v42 = vld [vmem:[%s8388_s30 + $0x340] sm:$0xff]  ;;  %v3490_v44 = vld [vmem:[%s8388_s30 + $0x308] sm:$0xff] }
0x10e8   : > { %v7159_v45 = vpop.permute.xlu1 %7158 }
0x10e9   : > { %v7161_v46 = vunpack.i.h.bf16 %v7159_v45  ;;  %v7160_v48 = vunpack.i.l.bf16 %v7159_v45 }
0x10eb   : > { %v3210_v56 = vsel %vm3209_vm3, %v3207_v55, %v7160_v48  ;;  %v3211_v57 = vsel %vm3209_vm3, %v3208_v54, %v7161_v46  ;;  %v3498_v48 = vld [vmem:[%s8388_s30 + $0x348] sm:$0xff]  ;;  %v3481_v54 = vld [vmem:[%s8388_s30 + $0x2c0] sm:$0xff] }
0x10ec   : > { %v7169_v52 = vpop.permute.xlu1 %7168  ;;  %v3474_v55 = vld [vmem:[%s8388_s30 + $0x288] sm:$0xff] }
0x10ed   : > { %v7171_v62 = vunpack.i.h.bf16 %v7169_v52  ;;  %v7170_v7 = vunpack.i.l.bf16 %v7169_v52 }
0x10ee   : > { %v7414_v51 = vpop.eup %7413 }
0x10ef   : > { %v2992_v12 = vsel %vm670_vm2, %v7414_v51, 0.0 }
0x10f0   : > { %2993 = vadd.xlane.f32.xlu0 %v2992_v12  ;;  %v7179_v8 = vpop.permute.xlu1 %7178  ;;  %v6298_v12 = vld [vmem:[%s3247_s9] ss:$0 sm:$0xff] }
0x10f1   : > { %v7181_v20 = vunpack.i.h.bf16 %v7179_v8  ;;  %v7180_v15 = vunpack.i.l.bf16 %v7179_v8 }
0x1106   : > { %2999 = vrot.lane.b32.xlu0 %v8061_v47, %s7804_s1 }
0x110a   : > { %7163 = vrot.lane.b32.xlu0 %v7162_v29, %s7802_s16  ;;  %v7220_v29 = vld [vmem:[%s3230_s17 + $0x30] sm:$0xff]  }
0x110e   : > { %7173 = vrot.lane.b32.xlu0 %v7172_v13, %s7800_s12  ;;  %v7223_v13 = vld [vmem:[%s3230_s17 + $0x18] sm:$0xff]  }
0x116e   : > { %v2991_v17 = vpop.xlane.xlu0 %2990 }
0x116f   : > { %7415 = vrcp.f32 %v2991_v17 }
0x1179   : > { %v2994_v19 = vpop.xlane.xlu0 %2993 }
0x117a   : > { %7417 = vrcp.f32 %v2994_v19 }
0x117c   : > { %v7416_v21 = vpop.eup %7415 }
0x117d   : > { %v3000_v22 = vpop.permute.xlu0 %2999  ;;  %v2996_v24 = vmul.f32 %v7416_v21, %v7412_v41 }
0x117e   : > { %7024 = vmatpush3.msra.mxu0 %v3000_v22 }
0x117f   : > { %7026 = vmatmul.mubr.msk.f32.vlgmr.msra.gmra.mxu0 %vm670_vm2, %v2996_v24  ;;  %7033 = vmatprep.subr.bf16.mxu0 %v7796_v3 }
0x1180   : > { %7049 = vmatprep.mubr.msk.bf16.mxu0 %vm7797_vm0, %v7796_v3  ;;  %7034 = vmatpush3.bf16.msra.mxu0 %v7219_v28 }
0x1181   : > { %7035 = vmatprep.subr.bf16.mxu0 %v7796_v3  ;;  %v7164_v38 = vpop.permute.xlu0 %7163 }
0x1182   : > { %v7166_v37 = vunpack.i.h.bf16 %v7164_v38 }
0x1184   : > { %7036 = vmatpush3.bf16.msra.mxu0 %v7220_v29  ;;  %v3214_v59 = vsel %vm3212_vm4, %v3211_v57, %v7166_v37  ;;  %v3505_v29 = vld [vmem:[%s8388_s30 + $0x380] sm:$0xff]  ;;  %v6409_v37 = vcombine.low %v3490_v44, %v3498_v48  ;;  %v3482_v57 = vld [vmem:[%s8388_s30 + $0x2c8] sm:$0xff] }
0x1185   : > { %7037 = vmatprep.subr.bf16.mxu0 %v7796_v3  ;;  %v7174_v53 = vpop.permute.xlu0 %7173  ;;  %v3217_v10 = vsel %vm3215_vm5, %v3214_v59, %v7171_v62  ;;  %v6393_v59 = vcombine.low %v3474_v55, %v3482_v57  ;;  %v3465_v62 = vld [vmem:[%s8388_s30 + $0x240] sm:$0xff] }
0x1186   : > { %v7176_v60 = vunpack.i.h.bf16 %v7174_v53  ;;  %v7175_v61 = vunpack.i.l.bf16 %v7174_v53  ;;  %v3473_v53 = vld [vmem:[%s8388_s30 + $0x280] sm:$0xff] }
0x1187   : > { %v7418_v47 = vpop.eup %7417 }
0x1188   : > { %v2998_v23 = vmul.f32 %v7418_v47, %v7414_v51  ;;  %7038 = vmatpush3.bf16.msra.mxu0 %v7221_v4  ;;  %v3220_v50 = vsel %vm3218_vm6, %v3217_v10, %v7176_v60  ;;  %v3513_v4 = vld [vmem:[%s8388_s30 + $0x3c0] sm:$0xff]  ;;  %v6394_v60 = vcombine.high %v3474_v55, %v3482_v57 }
0x1189   : > { %7039 = vmatprep.subr.bf16.mxu0 %v7796_v3  ;;  %v3223_v6 = vsel %vm3221_vm7, %v3220_v50, %v7181_v20  ;;  %v3441_v20 = vld [vmem:[%s8388_s30 + $0x180] sm:$0xff] }
0x118a   : > { %7031 = vmatmul.mubr.msk.f32.vlgmr.msra.gmra.mxu1 %vm670_vm2, %v2998_v23 }
0x118b   : > { %4278 = vmatprep.mubr.bf16.mxu1 %v7795_v2 }
0x118c   : > { %7040 = vmatpush3.bf16.msra.mxu0 %v7222_v11  ;;  %v3506_v11 = vld [vmem:[%s8388_s30 + $0x388] sm:$0xff] }
0x118d   : > { %7041 = vmatprep.subr.bf16.mxu0 %v7796_v3 }
0x1190   : > { %7042 = vmatpush3.bf16.msra.mxu0 %v7223_v13  ;;  %v6423_v13 = vcombine.low %v3505_v29, %v3513_v4 }
0x1191   : > { %7043 = vmatprep.subr.bf16.mxu0 %v7796_v3 }
0x1194   : > { %7044 = vmatpush3.bf16.msra.mxu0 %v7224_v25  ;;  %v6424_v25 = vcombine.high %v3505_v29, %v3513_v4  ;;  %v3418_v4 = vld [vmem:[%s8388_s30 + $0xc8] sm:$0xff] }
0x1195   : > { %7045 = vmatprep.subr.bf16.mxu0 %v7796_v3 }
0x1196   : > { %4246 = vmatprep.subr.bf16.mxu1 %v6424_v25 }
0x1197   : > { %4247 = vmatpush1.bf16.msra.mxu1 %v6423_v13 }
0x1198   : > { %7046 = vmatpush3.bf16.msra.mxu0 %v7225_v26 }
0x1199   : > { %7047 = vmatprep.subr.bf16.mxu0 %v7796_v3  ;;  %v7165_v3 = vunpack.i.l.bf16 %v7164_v38  ;;  %v3489_v38 = vld [vmem:[%s8388_s30 + $0x300] sm:$0xff] }
0x119a   : > { %v6408_v46 = vcombine.high %v3489_v38, %v3497_v42  ;;  %v6407_v52 = vcombine.low %v3489_v38, %v3497_v42  ;;  %v3515_v38 = vld [vmem:[%s8388_s30 + $0x3d0] sm:$0xff]  ;;  %v3508_v42 = vld [vmem:[%s8388_s30 + $0x398] sm:$0xff] }
0x119b   : > { %v3213_v58 = vsel %vm3212_vm4, %v3210_v56, %v7165_v3  ;;  %v6410_v3 = vcombine.high %v3490_v44, %v3498_v48  ;;  %v6392_v56 = vcombine.high %v3473_v53, %v3481_v54  ;;  %v3516_v48 = vld [vmem:[%s8388_s30 + $0x3d8] sm:$0xff] }
0x119c   : > { %7048 = vmatpush3.bf16.msra.mxu0 %v7226_v34  ;;  %v3216_v9 = vsel %vm3215_vm5, %v3213_v58, %v7170_v7  ;;  %4248 = vmatprep.subr.bf16.mxu1 %v6408_v46  ;;  %v6391_v58 = vcombine.low %v3473_v53, %v3481_v54  ;;  %v3458_v7 = vld [vmem:[%s8388_s30 + $0x208] sm:$0xff] }
0x119d   : > { %v3219_v14 = vsel %vm3218_vm6, %v3216_v9, %v7175_v61  ;;  %4249 = vmatpush1.bf16.msra.mxu1 %v6407_v52  ;;  %v3457_v61 = vld [vmem:[%s8388_s30 + $0x200] sm:$0xff]  ;;  %v3466_v9 = vld [vmem:[%s8388_s30 + $0x248] sm:$0xff]  ;;  %v6429_v52 = vcombine.low %v3508_v42, %v3516_v48 }
0x119e   : > { %v3222_v5 = vsel %vm3221_vm7, %v3219_v14, %v7180_v15  ;;  %4250 = vmatprep.subr.bf16.mxu1 %v6392_v56  ;;  %v6376_v8 = vcombine.high %v3457_v61, %v3465_v62  ;;  %v6375_v10 = vcombine.low %v3457_v61, %v3465_v62  ;;  %v6377_v14 = vcombine.low %v3458_v7, %v3466_v9  ;;  %v3449_v15 = vld [vmem:[%s8388_s30 + $0x1c0] sm:$0xff] }
0x119f   : > { %v6378_v50 = vcombine.high %v3458_v7, %v3466_v9 }
0x11a1   : > { %4251 = vmatpush1.bf16.msra.mxu1 %v6391_v58 }
0x11a2   : > { %4252 = vmatprep.subr.bf16.mxu1 %v6376_v8  ;;  %v6308_v8 = vld [vmem:[%s3348_s19] ss:$0 sm:$0xff] }
0x11a5   : > { %4253 = vmatpush1.bf16.msra.mxu1 %v6375_v10  ;;  %v3491_v10 = vld [vmem:[%s8388_s30 + $0x310] sm:$0xff] }
0x123f   : > { %v3071_v27 = vpop.f32.mrf.mxu0 }
0x1241   : > { %v7027_v32 = vpop.f32.mrf.mxu0 }
0x124a   : > { %v3147_v35 = vpop.f32.mrf.mxu1 }
0x124b   : > { %v7182_v39 = vpack.i.bf16 %v3147_v35, %v3071_v27 }
0x124c   : > { %v7032_v43 = vpop.f32.mrf.mxu1 }
0x124d   : > { %7183 = vrot.lane.b32.xlu0 %v7182_v39, %s7798_s5 }
0x12bf   : > { %v7184_v18 = vpop.permute.xlu0 %7183 }
0x12c0   : > { %v7186_v16 = vunpack.i.h.bf16 %v7184_v18  ;;  %v7185_v63 = vunpack.i.l.bf16 %v7184_v18  ;;  %v3442_v18 = vld [vmem:[%s8388_s30 + $0x188] sm:$0xff] }
0x12c2   : > { %v3226_v41 = vsel %vm3224_vm8, %v3223_v6, %v7186_v16  ;;  %v3225_v49 = vsel %vm3224_vm8, %v3222_v5, %v7185_v63  ;;  %v6360_v16 = vcombine.high %v3441_v20, %v3449_v15  ;;  %v3450_v63 = vld [vmem:[%s8388_s30 + $0x1c8] sm:$0xff]  ;;  %v6359_v5 = vcombine.low %v3441_v20, %v3449_v15  ;;  %v3500_v20 = vld [vmem:[%s8388_s30 + $0x358] sm:$0xff] }
0x12c3   : > { %v3227_v51 = vpack.c.bf16 %v3226_v41, %v3225_v49  ;;  %v6361_v6 = vcombine.low %v3442_v18, %v3450_v63  ;;  %v6362_v41 = vcombine.high %v3442_v18, %v3450_v63  ;;  %v3425_v49 = vld [vmem:[%s8388_s30 + $0x100] sm:$0xff] }
0x12c4   : > { %4254 = vmatprep.subr.bf16.mxu1 %v6360_v16 }
0x12c5   : > { %7050 = vmatmul.mubr.bf16.vlgmr.msra.gmra.mxu0 %v3227_v51  ;;  %4255 = vmatpush1.bf16.msra.mxu1 %v6359_v5  ;;  %v3433_v51 = vld [vmem:[%s8388_s30 + $0x140] sm:$0xff]  ;;  %v3483_v5 = vld [vmem:[%s8388_s30 + $0x2d0] sm:$0xff] }
0x12c6   : > { %4321 = vmatprep.mubr.bf16.mxu0 %v7795_v2 }
0x1385   : > { %v3337_v17 = vpop.f32.mrf.mxu0 }
0x1386   : > { %v3338_v19 = vadd.f32 %v6298_v12, %v3337_v17  ;;  %v6344_v17 = vcombine.high %v3425_v49, %v3433_v51 }
0x1387   : > { %v7051_v21 = vpop.f32.mrf.mxu0 }
0x1388   : > { %v3344_v22 = vadd.f32 %v7763_v0, %v3338_v19  ;;  %v3514_v0 = vld [vmem:[%s8388_s30 + $0x3c8] sm:$0xff]  ;;  %v6343_v21 = vcombine.low %v3425_v49, %v3433_v51  ;;  %4256 = vmatprep.subr.bf16.mxu1 %v6344_v17 }
0x1389   : > { %v3340_v24 = vpop.f32.mrf.mxu0  ;;  %v6425_v26 = vcombine.low %v3506_v11, %v3514_v0  ;;  %v6426_v27 = vcombine.high %v3506_v11, %v3514_v0  ;;  %v3434_v19 = vld [vmem:[%s8388_s30 + $0x148] sm:$0xff]  ;;  %v3393_v0 = vld [vmem:[%s8388_s30] sm:$0xff] }
0x138a   : > { %v3341_v47 = vadd.f32 %v6298_v12, %v3340_v24  ;;  %3350 = vadd.xlane.f32.xlu1 %v3344_v22  ;;  %v3426_v12 = vld [vmem:[%s8388_s30 + $0x108] sm:$0xff]  ;;  %4257 = vmatpush1.bf16.msra.mxu1 %v6343_v21  ;;  %v3467_v21 = vld [vmem:[%s8388_s30 + $0x250] sm:$0xff] }
0x138b   : > { %v7052_v23 = vpop.f32.mrf.mxu0  ;;  %4289 = vmatprep.subr.bf16.mxu0 %v6426_v27  ;;  %v6346_v24 = vcombine.high %v3426_v12, %v3434_v19  ;;  %v3394_v27 = vld [vmem:[%s8388_s30 + $0x8] sm:$0xff] }
0x138c   : > { %v3345_v28 = vadd.f32 %v7759_v1, %v3341_v47  ;;  %4290 = vmatpush1.bf16.msra.mxu0 %v6425_v26  ;;  %v3409_v47 = vld [vmem:[%s8388_s30 + $0x80] sm:$0xff] }
0x138d   : > { %4291 = vmatprep.subr.bf16.mxu0 %v6410_v3  ;;  %v3417_v23 = vld [vmem:[%s8388_s30 + $0xc0] sm:$0xff] }
0x138e   : > { %3352 = vadd.xlane.f32.xlu0 %v3345_v28  ;;  %v6328_v29 = vcombine.high %v3409_v47, %v3417_v23  ;;  %v6327_v11 = vcombine.low %v3409_v47, %v3417_v23  ;;  %v3401_v26 = vld [vmem:[%s8388_s30 + $0x40] sm:$0xff] }
0x1390   : > { %4292 = vmatpush1.bf16.msra.mxu0 %v6409_v37  ;;  %4258 = vmatprep.subr.bf16.mxu1 %v6328_v29  ;;  %v6430_v37 = vcombine.high %v3508_v42, %v3516_v48  ;;  %v3419_v48 = vld [vmem:[%s8388_s30 + $0xd0] sm:$0xff] }
0x1391   : > { %4293 = vmatprep.subr.bf16.mxu0 %v6394_v60  ;;  %4259 = vmatpush1.bf16.msra.mxu1 %v6327_v11  ;;  %v6307_v60 = vld [vmem:[%s3346_s18] ss:$0 sm:$0xff]  ;;  %v3451_v11 = vld [vmem:[%s8388_s30 + $0x1d0] sm:$0xff] }
0x1394   : > { %4294 = vmatpush1.bf16.msra.mxu0 %v6393_v59 }
0x1395   : > { %4295 = vmatprep.subr.bf16.mxu0 %v6378_v50  ;;  %v3492_v50 = vld [vmem:[%s8388_s30 + $0x318] sm:$0xff] }
0x1396   : > { %v6414_v63 = vcombine.high %v3492_v50, %v3500_v20  ;;  %v6413_v51 = vcombine.low %v3492_v50, %v3500_v20 }
0x1398   : > { %4296 = vmatpush1.bf16.msra.mxu0 %v6377_v14  ;;  %v3499_v14 = vld [vmem:[%s8388_s30 + $0x350] sm:$0xff] }
0x1399   : > { %4297 = vmatprep.subr.bf16.mxu0 %v6362_v41  ;;  %v6412_v16 = vcombine.high %v3491_v10, %v3499_v14  ;;  %v3484_v41 = vld [vmem:[%s8388_s30 + $0x2d8] sm:$0xff]  ;;  %v6411_v49 = vcombine.low %v3491_v10, %v3499_v14  ;;  %v3510_v10 = vld [vmem:[%s8388_s30 + $0x3a8] sm:$0xff] }
0x139a   : > { %v3518_v14 = vld [vmem:[%s8388_s30 + $0x3e8] sm:$0xff] }
0x139c   : > { %4298 = vmatpush1.bf16.msra.mxu0 %v6361_v6  ;;  %v3476_v6 = vld [vmem:[%s8388_s30 + $0x298] sm:$0xff] }
0x139d   : > { %4299 = vmatprep.subr.bf16.mxu0 %v6346_v24  ;;  %v6398_v17 = vcombine.high %v3476_v6, %v3484_v41  ;;  %v3468_v24 = vld [vmem:[%s8388_s30 + $0x258] sm:$0xff]  ;;  %v6397_v23 = vcombine.low %v3476_v6, %v3484_v41  ;;  %v3494_v6 = vld [vmem:[%s8388_s30 + $0x328] sm:$0xff] }
0x139e   : > { %v3502_v41 = vld [vmem:[%s8388_s30 + $0x368] sm:$0xff] }
0x1413   : > { %v3351_v1 = vpop.xlane.xlu1 %3350 }
0x1414   : > { %v3355_v32 = vmul.f32 0.0078125, %v3351_v1  ;;  %v6312_v1 = vcombine.high %v3393_v0, %v3401_v26 }
0x1416   : > { %v8396_v34 = vsub.f32 %v3344_v22, %v3355_v32  ;;  %v6345_v22 = vcombine.low %v3426_v12, %v3434_v19  ;;  %v3402_v32 = vld [vmem:[%s8388_s30 + $0x48] sm:$0xff]  ;;  %4260 = vmatprep.subr.bf16.mxu1 %v6312_v1  ;;  %v3459_v19 = vld [vmem:[%s8388_s30 + $0x210] sm:$0xff] }
0x1417   : > { %v3353_v35 = vpop.xlane.xlu0 %3352 }
0x1418   : > { %v3356_v39 = vmul.f32 0.0078125, %v3353_v35  ;;  %v3359_v43 = vmul.f32 %v8396_v34, %v8396_v34  ;;  %4300 = vmatpush1.bf16.msra.mxu0 %v6345_v22  ;;  %v6311_v35 = vcombine.low %v3393_v0, %v3401_v26  ;;  %v3460_v22 = vld [vmem:[%s8388_s30 + $0x218] sm:$0xff]  ;;  %v6379_v0 = vcombine.low %v3459_v19, %v3467_v21 }
0x1419   : > { %v6382_v29 = vcombine.high %v3460_v22, %v3468_v24  ;;  %v6381_v26 = vcombine.low %v3460_v22, %v3468_v24  ;;  %v3478_v22 = vld [vmem:[%s8388_s30 + $0x2a8] sm:$0xff] }
0x141a   : > { %v8400_v36 = vsub.f32 %v3345_v28, %v3356_v39  ;;  %3361 = vadd.xlane.f32.xlu0 %v3359_v43  ;;  %v3410_v28 = vld [vmem:[%s8388_s30 + $0x88] sm:$0xff]  ;;  %v6313_v39 = vcombine.low %v3394_v27, %v3402_v32  ;;  %v6314_v43 = vcombine.high %v3394_v27, %v3402_v32  ;;  %4261 = vmatpush1.bf16.msra.mxu1 %v6311_v35  ;;  %v3427_v32 = vld [vmem:[%s8388_s30 + $0x110] sm:$0xff] }
0x141b   : > { %v6329_v13 = vcombine.low %v3410_v28, %v3418_v4  ;;  %v6330_v25 = vcombine.high %v3410_v28, %v3418_v4  ;;  %v6380_v28 = vcombine.high %v3459_v19, %v3467_v21  ;;  %v3443_v4 = vld [vmem:[%s8388_s30 + $0x190] sm:$0xff]  ;;  %v3477_v19 = vld [vmem:[%s8388_s30 + $0x2a0] sm:$0xff]  ;;  %v3486_v24 = vld [vmem:[%s8388_s30 + $0x2e8] sm:$0xff] }
0x141c   : > { %v3360_v45 = vmul.f32 %v8400_v36, %v8400_v36  ;;  %v6364_v27 = vcombine.high %v3443_v4, %v3451_v11  ;;  %v3435_v35 = vld [vmem:[%s8388_s30 + $0x150] sm:$0xff]  ;;  %v3485_v21 = vld [vmem:[%s8388_s30 + $0x2e0] sm:$0xff] }
0x141d   : > { %4301 = vmatprep.subr.bf16.mxu0 %v6330_v25  ;;  %v3452_v25 = vld [vmem:[%s8388_s30 + $0x1d8] sm:$0xff]  ;;  %v6348_v42 = vcombine.high %v3427_v32, %v3435_v35 }
0x141e   : > { %3363 = vadd.xlane.f32.xlu0 %v3360_v45  ;;  %4302 = vmatpush1.bf16.msra.mxu0 %v6329_v13  ;;  %v3507_v45 = vld [vmem:[%s8388_s30 + $0x390] sm:$0xff]  ;;  %v3444_v13 = vld [vmem:[%s8388_s30 + $0x198] sm:$0xff] }
0x141f   : > { %4303 = vmatprep.subr.bf16.mxu0 %v6314_v43  ;;  %v6427_v44 = vcombine.low %v3507_v45, %v3515_v38  ;;  %v6428_v46 = vcombine.high %v3507_v45, %v3515_v38  ;;  %v6366_v1 = vcombine.high %v3444_v13, %v3452_v25  ;;  %v3436_v43 = vld [vmem:[%s8388_s30 + $0x158] sm:$0xff]  ;;  %v6363_v45 = vcombine.low %v3443_v4, %v3451_v11  ;;  %v3461_v4 = vld [vmem:[%s8388_s30 + $0x220] sm:$0xff] }
0x1420   : > { %v6365_v38 = vcombine.low %v3444_v13, %v3452_v25  ;;  %v3469_v11 = vld [vmem:[%s8388_s30 + $0x260] sm:$0xff]  ;;  %v3462_v13 = vld [vmem:[%s8388_s30 + $0x228] sm:$0xff] }
0x1421   : > { %4332 = vmatprep.subr.bf16.mxu1 %v6428_v46  ;;  %v3411_v46 = vld [vmem:[%s8388_s30 + $0x90] sm:$0xff]  ;;  %v3470_v25 = vld [vmem:[%s8388_s30 + $0x268] sm:$0xff] }
0x1422   : > { %4304 = vmatpush1.bf16.msra.mxu0 %v6313_v39  ;;  %v3428_v39 = vld [vmem:[%s8388_s30 + $0x118] sm:$0xff] }
0x1423   : > { %4375 = vmatprep.subr.bf16.mxu0 %v6430_v37  ;;  %v3420_v37 = vld [vmem:[%s8388_s30 + $0xd8] sm:$0xff] }
0x14a3   : > { %v3362_v3 = vpop.xlane.xlu0 %3361 }
0x14a4   : > { %v3365_v53 = vmul.f32 0.0078125, %v3362_v3  ;;  %v6347_v3 = vcombine.low %v3427_v32, %v3435_v35  ;;  %v3445_v32 = vld [vmem:[%s8388_s30 + $0x1a0] sm:$0xff] }
0x14a5   : > { %v3453_v35 = vld [vmem:[%s8388_s30 + $0x1e0] sm:$0xff] }
0x14a6   : > { %v3367_v54 = vadd.f32 1e-05, %v3365_v53  ;;  %v6349_v53 = vcombine.low %v3428_v39, %v3436_v43 }
0x14a7   : > { %v3364_v55 = vpop.xlane.xlu0 %3363 }
0x14a8   : > { %7419 = vrsqrt.f32 %v3367_v54  ;;  %v3366_v56 = vmul.f32 0.0078125, %v3364_v55  ;;  %v6332_v54 = vcombine.high %v3411_v46, %v3419_v48 }
0x14aa   : > { %v3368_v57 = vadd.f32 1e-05, %v3366_v56  ;;  %v3395_v56 = vld [vmem:[%s8388_s30 + $0x10] sm:$0xff] }
0x14ac   : > { %7421 = vrsqrt.f32 %v3368_v57  ;;  %v3403_v57 = vld [vmem:[%s8388_s30 + $0x50] sm:$0xff] }
0x14ad   : > { %v6315_v50 = vcombine.low %v3395_v56, %v3403_v57 }
0x14b5   : > { %v7420_v58 = vpop.eup %7419 }
0x14b6   : > { %v3371_v59 = vmul.f32 %v7420_v58, %v8396_v34  ;;  %v3396_v58 = vld [vmem:[%s8388_s30 + $0x18] sm:$0xff] }
0x14b8   : > { %v3379_v62 = vmul.f32 %v6307_v60, %v3371_v59  ;;  %v3404_v59 = vld [vmem:[%s8388_s30 + $0x58] sm:$0xff] }
0x14b9   : > { %v7422_v61 = vpop.eup %7421  ;;  %v6317_v20 = vcombine.low %v3396_v58, %v3404_v59 }
0x14ba   : > { %v3372_v7 = vmul.f32 %v7422_v61, %v8400_v36  ;;  %v8444_v15 = vadd.f32 %v6308_v8, %v3379_v62  ;;  %v3475_v36 = vld [vmem:[%s8388_s30 + $0x290] sm:$0xff]  ;;  %v6316_v62 = vcombine.high %v3395_v56, %v3403_v57  ;;  %v3413_v56 = vld [vmem:[%s8388_s30 + $0xa0] sm:$0xff] }
0x14bb   : > { %v6396_v12 = vcombine.high %v3475_v36, %v3483_v5  ;;  %v6395_v47 = vcombine.low %v3475_v36, %v3483_v5  ;;  %v3493_v36 = vld [vmem:[%s8388_s30 + $0x320] sm:$0xff] }
0x14bc   : > { %v3380_v9 = vmul.f32 %v6307_v60, %v3372_v7  ;;  %v6331_v60 = vcombine.low %v3411_v46, %v3419_v48  ;;  %v6318_v7 = vcombine.high %v3396_v58, %v3404_v59  ;;  %v3501_v5 = vld [vmem:[%s8388_s30 + $0x360] sm:$0xff]  ;;  %v3414_v58 = vld [vmem:[%s8388_s30 + $0xa8] sm:$0xff] }
0x14bd   : > { %v3429_v46 = vld [vmem:[%s8388_s30 + $0x120] sm:$0xff]  ;;  %v3422_v59 = vld [vmem:[%s8388_s30 + $0xe8] sm:$0xff] }
0x14be   : > { %v8446_v34 = vadd.f32 %v6308_v8, %v3380_v9  ;;  %v3509_v8 = vld [vmem:[%s8388_s30 + $0x3a0] sm:$0xff] }
0x14bf   : > { %v3517_v9 = vld [vmem:[%s8388_s30 + $0x3e0] sm:$0xff] }
0x14c0   : > { %v8450_v18 = vpack.c.bf16 %v8446_v34, %v8444_v15  ;;  %v3437_v48 = vld [vmem:[%s8388_s30 + $0x160] sm:$0xff] }
0x14c1   : > { %v3421_v57 = vld [vmem:[%s8388_s30 + $0xe0] sm:$0xff] }
0x14c2   : > { %4279 = vmatmul.mubr.bf16.vlgmr.msra.gmra.mxu1 %v8450_v18  ;;  %4322 = vmatmul.mubr.bf16.vlgmr.msra.gmra.mxu0 %v8450_v18 }
0x14c3   : > { %4333 = vmatpush1.bf16.msra.mxu1 %v6427_v44  ;;  %4376 = vmatpush1.bf16.msra.mxu0 %v6429_v52  ;;  %v6350_v44 = vcombine.high %v3428_v39, %v3436_v43  ;;  %v3412_v52 = vld [vmem:[%s8388_s30 + $0x98] sm:$0xff]  ;;  %v3446_v39 = vld [vmem:[%s8388_s30 + $0x1a8] sm:$0xff] }
0x14c4   : > { %4334 = vmatprep.subr.bf16.mxu1 %v6412_v16  ;;  %4377 = vmatprep.subr.bf16.mxu0 %v6414_v63  ;;  %v6334_v55 = vcombine.high %v3412_v52, %v3420_v37  ;;  %v6333_v61 = vcombine.low %v3412_v52, %v3420_v37  ;;  %v6432_v16 = vcombine.high %v3509_v8, %v3517_v9  ;;  %v3454_v43 = vld [vmem:[%s8388_s30 + $0x1e8] sm:$0xff] }
0x14c5   : > { %4364 = vmatprep.mubr.bf16.mxu1 %v7795_v2  ;;  %4407 = vmatprep.mubr.bf16.mxu0 %v7795_v2  ;;  %v6434_v63 = vcombine.high %v3510_v10, %v3518_v14  ;;  %v3430_v52 = vld [vmem:[%s8388_s30 + $0x128] sm:$0xff] }
0x14c6   : > { %v3438_v37 = vld [vmem:[%s8388_s30 + $0x168] sm:$0xff] }
0x14c7   : > { %4335 = vmatpush1.bf16.msra.mxu1 %v6411_v49  ;;  %4378 = vmatpush1.bf16.msra.mxu0 %v6413_v51  ;;  %v6431_v49 = vcombine.low %v3509_v8, %v3517_v9  ;;  %v6433_v51 = vcombine.low %v3510_v10, %v3518_v14  ;;  %v3397_v8 = vld [vmem:[%s8388_s30 + $0x20] sm:$0xff]  ;;  %v3398_v10 = vld [vmem:[%s8388_s30 + $0x28] sm:$0xff] }
0x14c8   : > { %4336 = vmatprep.subr.bf16.mxu1 %v6396_v12  ;;  %4379 = vmatprep.subr.bf16.mxu0 %v6398_v17  ;;  %v6416_v12 = vcombine.high %v3493_v36, %v3501_v5  ;;  %v6418_v17 = vcombine.high %v3494_v6, %v3502_v41  ;;  %v3405_v9 = vld [vmem:[%s8388_s30 + $0x60] sm:$0xff]  ;;  %v3406_v14 = vld [vmem:[%s8388_s30 + $0x68] sm:$0xff] }
0x14cb   : > { %4337 = vmatpush1.bf16.msra.mxu1 %v6395_v47  ;;  %4380 = vmatpush1.bf16.msra.mxu0 %v6397_v23  ;;  %v6415_v47 = vcombine.low %v3493_v36, %v3501_v5  ;;  %v6417_v23 = vcombine.low %v3494_v6, %v3502_v41  ;;  %v3511_v36 = vld [vmem:[%s8388_s30 + $0x3b0] sm:$0xff]  ;;  %v3512_v6 = vld [vmem:[%s8388_s30 + $0x3b8] sm:$0xff] }
0x14cc   : > { %4338 = vmatprep.subr.bf16.mxu1 %v6380_v28  ;;  %4381 = vmatprep.subr.bf16.mxu0 %v6382_v29  ;;  %v6400_v28 = vcombine.high %v3477_v19, %v3485_v21  ;;  %v6402_v29 = vcombine.high %v3478_v22, %v3486_v24  ;;  %v3519_v5 = vld [vmem:[%s8388_s30 + $0x3f0] sm:$0xff]  ;;  %v3520_v41 = vld [vmem:[%s8388_s30 + $0x3f8] sm:$0xff] }
0x14cf   : > { %4339 = vmatpush1.bf16.msra.mxu1 %v6379_v0  ;;  %4382 = vmatpush1.bf16.msra.mxu0 %v6381_v26  ;;  %v6399_v0 = vcombine.low %v3477_v19, %v3485_v21  ;;  %v6401_v26 = vcombine.low %v3478_v22, %v3486_v24  ;;  %v3495_v19 = vld [vmem:[%s8388_s30 + $0x330] sm:$0xff]  ;;  %v3496_v22 = vld [vmem:[%s8388_s30 + $0x338] sm:$0xff] }
0x14d0   : > { %4340 = vmatprep.subr.bf16.mxu1 %v6364_v27  ;;  %4383 = vmatprep.subr.bf16.mxu0 %v6366_v1  ;;  %v6384_v27 = vcombine.high %v3461_v4, %v3469_v11  ;;  %v6386_v1 = vcombine.high %v3462_v13, %v3470_v25  ;;  %v3503_v21 = vld [vmem:[%s8388_s30 + $0x370] sm:$0xff]  ;;  %v3504_v24 = vld [vmem:[%s8388_s30 + $0x378] sm:$0xff] }
0x14d3   : > { %4341 = vmatpush1.bf16.msra.mxu1 %v6363_v45  ;;  %4384 = vmatpush1.bf16.msra.mxu0 %v6365_v38  ;;  %v6383_v45 = vcombine.low %v3461_v4, %v3469_v11  ;;  %v6385_v38 = vcombine.low %v3462_v13, %v3470_v25  ;;  %v3479_v4 = vld [vmem:[%s8388_s30 + $0x2b0] sm:$0xff]  ;;  %v3480_v13 = vld [vmem:[%s8388_s30 + $0x2b8] sm:$0xff] }
0x14d4   : > { %4342 = vmatprep.subr.bf16.mxu1 %v6348_v42  ;;  %4385 = vmatprep.subr.bf16.mxu0 %v6350_v44  ;;  %v6368_v42 = vcombine.high %v3445_v32, %v3453_v35  ;;  %v6370_v44 = vcombine.high %v3446_v39, %v3454_v43  ;;  %v3487_v11 = vld [vmem:[%s8388_s30 + $0x2f0] sm:$0xff]  ;;  %v3488_v25 = vld [vmem:[%s8388_s30 + $0x2f8] sm:$0xff] }
0x14d7   : > { %4343 = vmatpush1.bf16.msra.mxu1 %v6347_v3  ;;  %4386 = vmatpush1.bf16.msra.mxu0 %v6349_v53  ;;  %v6367_v3 = vcombine.low %v3445_v32, %v3453_v35  ;;  %v6369_v53 = vcombine.low %v3446_v39, %v3454_v43  ;;  %v3463_v32 = vld [vmem:[%s8388_s30 + $0x230] sm:$0xff]  ;;  %v3464_v39 = vld [vmem:[%s8388_s30 + $0x238] sm:$0xff] }
0x14d8   : > { %4344 = vmatprep.subr.bf16.mxu1 %v6332_v54  ;;  %4387 = vmatprep.subr.bf16.mxu0 %v6334_v55  ;;  %v6352_v54 = vcombine.high %v3429_v46, %v3437_v48  ;;  %v6354_v55 = vcombine.high %v3430_v52, %v3438_v37  ;;  %v3471_v35 = vld [vmem:[%s8388_s30 + $0x270] sm:$0xff]  ;;  %v3472_v43 = vld [vmem:[%s8388_s30 + $0x278] sm:$0xff] }
0x14db   : > { %4345 = vmatpush1.bf16.msra.mxu1 %v6331_v60  ;;  %4388 = vmatpush1.bf16.msra.mxu0 %v6333_v61  ;;  %v6351_v60 = vcombine.low %v3429_v46, %v3437_v48  ;;  %v6353_v61 = vcombine.low %v3430_v52, %v3438_v37  ;;  %v3447_v46 = vld [vmem:[%s8388_s30 + $0x1b0] sm:$0xff]  ;;  %v3448_v52 = vld [vmem:[%s8388_s30 + $0x1b8] sm:$0xff] }
0x14dc   : > { %4346 = vmatprep.subr.bf16.mxu1 %v6316_v62  ;;  %4389 = vmatprep.subr.bf16.mxu0 %v6318_v7  ;;  %v6336_v62 = vcombine.high %v3413_v56, %v3421_v57  ;;  %v6338_v7 = vcombine.high %v3414_v58, %v3422_v59  ;;  %v3455_v48 = vld [vmem:[%s8388_s30 + $0x1f0] sm:$0xff]  ;;  %v3456_v37 = vld [vmem:[%s8388_s30 + $0x1f8] sm:$0xff] }
0x14df   : > { %4347 = vmatpush1.bf16.msra.mxu1 %v6315_v50  ;;  %4390 = vmatpush1.bf16.msra.mxu0 %v6317_v20  ;;  %v6335_v50 = vcombine.low %v3413_v56, %v3421_v57  ;;  %v6337_v20 = vcombine.low %v3414_v58, %v3422_v59  ;;  %v3439_v56 = vld [vmem:[%s8388_s30 + $0x170] sm:$0xff]  ;;  %v3432_v57 = vld [vmem:[%s8388_s30 + $0x138] sm:$0xff]  ;;  %v6371_v59 = vcombine.low %v3447_v46, %v3455_v48 }
0x14e0   : > { %4418 = vmatprep.subr.bf16.mxu1 %v6432_v16  ;;  %4461 = vmatprep.subr.bf16.mxu0 %v6434_v63  ;;  %v6320_v16 = vcombine.high %v3397_v8, %v3405_v9  ;;  %v6322_v63 = vcombine.high %v3398_v10, %v3406_v14  ;;  %v3440_v58 = vld [vmem:[%s8388_s30 + $0x178] sm:$0xff] }
0x14e2   : > { %4365 = vmatmul.mubr.bf16.vlgmr.msra.gmra.mxu1 %v8450_v18  ;;  %4408 = vmatmul.mubr.bf16.vlgmr.msra.gmra.mxu0 %v8450_v18 }
0x14e3   : > { %4419 = vmatpush1.bf16.msra.mxu1 %v6431_v49  ;;  %4462 = vmatpush1.bf16.msra.mxu0 %v6433_v51  ;;  %v6319_v49 = vcombine.low %v3397_v8, %v3405_v9  ;;  %v6321_v51 = vcombine.low %v3398_v10, %v3406_v14  ;;  %v3423_v8 = vld [vmem:[%s8388_s30 + $0xf0] sm:$0xff]  ;;  %v3416_v9 = vld [vmem:[%s8388_s30 + $0xb8] sm:$0xff] }
0x14e4   : > { %4420 = vmatprep.subr.bf16.mxu1 %v6416_v12  ;;  %4463 = vmatprep.subr.bf16.mxu0 %v6418_v17  ;;  %v6436_v12 = vcombine.high %v3511_v36, %v3519_v5  ;;  %v6438_v17 = vcombine.high %v3512_v6, %v3520_v41  ;;  %v3424_v10 = vld [vmem:[%s8388_s30 + $0xf8] sm:$0xff] }
0x14e5   : > { %4450 = vmatprep.mubr.bf16.mxu1 %v7795_v2  ;;  %4493 = vmatprep.mubr.bf16.mxu0 %v7795_v2 }
0x14e7   : > { %4421 = vmatpush1.bf16.msra.mxu1 %v6415_v47  ;;  %4464 = vmatpush1.bf16.msra.mxu0 %v6417_v23  ;;  %v6435_v47 = vcombine.low %v3511_v36, %v3519_v5  ;;  %v6437_v23 = vcombine.low %v3512_v6, %v3520_v41  ;;  %v3407_v36 = vld [vmem:[%s8388_s30 + $0x70] sm:$0xff]  ;;  %v3400_v5 = vld [vmem:[%s8388_s30 + $0x38] sm:$0xff] }
0x14e8   : > { %4422 = vmatprep.subr.bf16.mxu1 %v6400_v28  ;;  %4465 = vmatprep.subr.bf16.mxu0 %v6402_v29  ;;  %v6420_v28 = vcombine.high %v3495_v19, %v3503_v21  ;;  %v6422_v29 = vcombine.high %v3496_v22, %v3504_v24  ;;  %v3408_v6 = vld [vmem:[%s8388_s30 + $0x78] sm:$0xff] }
0x14eb   : > { %4423 = vmatpush1.bf16.msra.mxu1 %v6399_v0  ;;  %4466 = vmatpush1.bf16.msra.mxu0 %v6401_v26  ;;  %v6419_v0 = vcombine.low %v3495_v19, %v3503_v21  ;;  %v6421_v26 = vcombine.low %v3496_v22, %v3504_v24  ;;  %v6325_v19 = vcombine.low %v3400_v5, %v3408_v6  ;;  %v7227_v21 = vld [vmem:[%s8394_s8 + $0x78] sm:$0xff]  }
0x14ec   : > { %4424 = vmatprep.subr.bf16.mxu1 %v6384_v27  ;;  %4467 = vmatprep.subr.bf16.mxu0 %v6386_v1  ;;  %v6404_v27 = vcombine.high %v3479_v4, %v3487_v11  ;;  %v6406_v1 = vcombine.high %v3480_v13, %v3488_v25  ;;  %v7228_v22 = vld [vmem:[%s8394_s8 + $0xf8] sm:$0xff]  }
0x14ed   : > { %v7229_v24 = vld [vmem:[%s8394_s8 + $0x38] sm:$0xff]  }
0x14ef   : > { %4425 = vmatpush1.bf16.msra.mxu1 %v6383_v45  ;;  %4468 = vmatpush1.bf16.msra.mxu0 %v6385_v38  ;;  %v6403_v45 = vcombine.low %v3479_v4, %v3487_v11  ;;  %v6405_v38 = vcombine.low %v3480_v13, %v3488_v25  ;;  %v7234_v4 = vld [vmem:[%s8394_s8 + $0xb0] sm:$0xff]   ;;  %v7235_v11 = vld [vmem:[%s8394_s8 + $0x68] sm:$0xff]  }
0x14f0   : > { %4426 = vmatprep.subr.bf16.mxu1 %v6368_v42  ;;  %4469 = vmatprep.subr.bf16.mxu0 %v6370_v44  ;;  %v6388_v42 = vcombine.high %v3463_v32, %v3471_v35  ;;  %v6390_v44 = vcombine.high %v3464_v39, %v3472_v43  ;;  %v7236_v13 = vld [vmem:[%s8394_s8 + $0xe8] sm:$0xff]  }
0x14f1   : > { %v7237_v25 = vld [vmem:[%s8394_s8 + $0x28] sm:$0xff]  }
0x14f3   : > { %4427 = vmatpush1.bf16.msra.mxu1 %v6367_v3  ;;  %4470 = vmatpush1.bf16.msra.mxu0 %v6369_v53  ;;  %v6387_v3 = vcombine.low %v3463_v32, %v3471_v35  ;;  %v6372_v53 = vcombine.high %v3447_v46, %v3455_v48  ;;  %v7243_v32 = vld [vmem:[%s8394_s8 + $0x58] sm:$0xff]   ;;  %v7251_v46 = vld [vmem:[%s8394_s8 + $0x48] sm:$0xff]  }
0x14f4   : > { %4428 = vmatprep.subr.bf16.mxu1 %v6352_v54  ;;  %4471 = vmatprep.subr.bf16.mxu0 %v6354_v55  ;;  %v6374_v54 = vcombine.high %v3448_v52, %v3456_v37  ;;  %v3431_v55 = vld [vmem:[%s8388_s30 + $0x130] sm:$0xff]  ;;  %v7244_v35 = vld [vmem:[%s8394_s8 + $0xd8] sm:$0xff]   ;;  %v7252_v48 = vld [vmem:[%s8394_s8 + $0xc8] sm:$0xff]  }
0x14f5   : > { %v6355_v14 = vcombine.low %v3431_v55, %v3439_v56 }
0x14f7   : > { %4429 = vmatpush1.bf16.msra.mxu1 %v6351_v60  ;;  %4472 = vmatpush1.bf16.msra.mxu0 %v6353_v61  ;;  %v6373_v60 = vcombine.low %v3448_v52, %v3456_v37  ;;  %v6356_v61 = vcombine.high %v3431_v55, %v3439_v56  ;;  %v7253_v52 = vld [vmem:[%s8394_s8 + $0x8] sm:$0xff]   ;;  %v7259_v55 = vld [vmem:[%s8394_s8 + $0x178] sm:$0xff]  }
0x14f8   : > { %4430 = vmatprep.subr.bf16.mxu1 %v6336_v62  ;;  %4473 = vmatprep.subr.bf16.mxu0 %v6338_v7  ;;  %v6358_v62 = vcombine.high %v3432_v57, %v3440_v58  ;;  %v3415_v7 = vld [vmem:[%s8388_s30 + $0xb0] sm:$0xff]  ;;  %v7254_v37 = vld [vmem:[%s8394_s8 + $0x88] sm:$0xff]   ;;  %v7260_v56 = vld [vmem:[%s8394_s8 + $0x1f8] sm:$0xff]  }
0x14f9   : > { %v6339_v41 = vcombine.low %v3415_v7, %v3423_v8 }
0x14fb   : > { %4431 = vmatpush1.bf16.msra.mxu1 %v6335_v50  ;;  %4474 = vmatpush1.bf16.msra.mxu0 %v6337_v20  ;;  %v6357_v50 = vcombine.low %v3432_v57, %v3440_v58  ;;  %v6340_v20 = vcombine.high %v3415_v7, %v3423_v8  ;;  %v3540_v57 = vsub.s32 3, %v8025_v30  ;;  %v8590_v58 = vld [vmem:[%s3521_s20 + $0x8] sm:$0xff]  ;;  %v3556_v7 = vsub.s32 7, %v8025_v30 }
0x14fc   : > { %4432 = vmatprep.subr.bf16.mxu1 %v6320_v16  ;;  %4475 = vmatprep.subr.bf16.mxu0 %v6322_v63  ;;  %v6342_v16 = vcombine.high %v3416_v9, %v3424_v10  ;;  %v3399_v63 = vld [vmem:[%s8388_s30 + $0x30] sm:$0xff] }
0x14ff   : > { %4433 = vmatpush1.bf16.msra.mxu1 %v6319_v49  ;;  %4476 = vmatpush1.bf16.msra.mxu0 %v6321_v51  ;;  %v6341_v49 = vcombine.low %v3416_v9, %v3424_v10  ;;  %v6324_v51 = vcombine.high %v3399_v63, %v3407_v36 }
0x1500   : > { %4504 = vmatprep.subr.bf16.mxu1 %v6436_v12  ;;  %4547 = vmatprep.subr.bf16.mxu0 %v6438_v17  ;;  %v6326_v12 = vcombine.high %v3400_v5, %v3408_v6  ;;  %v6323_v17 = vcombine.low %v3399_v63, %v3407_v36 }
0x1502   : > { %4451 = vmatmul.mubr.bf16.vlgmr.msra.gmra.mxu1 %v8450_v18  ;;  %4494 = vmatmul.mubr.bf16.vlgmr.msra.gmra.mxu0 %v8450_v18 }
0x1503   : > { %4505 = vmatpush1.bf16.msra.mxu1 %v6435_v47  ;;  %4548 = vmatpush1.bf16.msra.mxu0 %v6437_v23  ;;  %v7230_v47 = vld [vmem:[%s8394_s8 + $0xb8] sm:$0xff]   ;;  %v7231_v23 = vld [vmem:[%s8394_s8 + $0x70] sm:$0xff]  }
0x1504   : > { %4506 = vmatprep.subr.bf16.mxu1 %v6420_v28  ;;  %4549 = vmatprep.subr.bf16.mxu0 %v6422_v29  ;;  %v7232_v28 = vld [vmem:[%s8394_s8 + $0xf0] sm:$0xff]  }
0x1505   : > { %4536 = vmatprep.mubr.bf16.mxu1 %v7795_v2  ;;  %4579 = vmatprep.mubr.bf16.mxu0 %v7795_v2  ;;  %v6389_v2 = vcombine.low %v3464_v39, %v3472_v43  ;;  %v7233_v29 = vld [vmem:[%s8394_s8 + $0x30] sm:$0xff]   ;;  %v7245_v39 = vld [vmem:[%s8394_s8 + $0x18] sm:$0xff]  }
0x1506   : > { %v7246_v43 = vld [vmem:[%s8394_s8 + $0x98] sm:$0xff]  }
0x1507   : > { %4507 = vmatpush1.bf16.msra.mxu1 %v6419_v0  ;;  %4550 = vmatpush1.bf16.msra.mxu0 %v6421_v26  ;;  %v7238_v0 = vld [vmem:[%s8394_s8 + $0xa8] sm:$0xff]   ;;  %v7240_v26 = vld [vmem:[%s8394_s8 + $0xe0] sm:$0xff]  }
0x1508   : > { %4508 = vmatprep.subr.bf16.mxu1 %v6404_v27  ;;  %4551 = vmatprep.subr.bf16.mxu0 %v6406_v1  ;;  %v7241_v27 = vld [vmem:[%s8394_s8 + $0x20] sm:$0xff]  }
0x1509   : > { %v7242_v1 = vld [vmem:[%s8394_s8 + $0xa0] sm:$0xff]  }
0x150b   : > { %4509 = vmatpush1.bf16.msra.mxu1 %v6403_v45  ;;  %4552 = vmatpush1.bf16.msra.mxu0 %v6405_v38  ;;  %v7247_v45 = vld [vmem:[%s8394_s8 + $0x50] sm:$0xff]  }
0x150c   : > { %4510 = vmatprep.subr.bf16.mxu1 %v6388_v42  ;;  %4553 = vmatprep.subr.bf16.mxu0 %v6390_v44  ;;  %v7248_v38 = vld [vmem:[%s8394_s8 + $0xd0] sm:$0xff]  }
0x150d   : > { %v7249_v42 = vld [vmem:[%s8394_s8 + $0x10] sm:$0xff]  }
0x150e   : > { %v7250_v44 = vld [vmem:[%s8394_s8 + $0x90] sm:$0xff]  }
0x150f   : > { %4511 = vmatpush1.bf16.msra.mxu1 %v6387_v3  ;;  %4554 = vmatpush1.bf16.msra.mxu0 %v6389_v2  ;;  %v7255_v3 = vld [vmem:[%s8394_s8 + $0x40] sm:$0xff]  }
0x1510   : > { %4512 = vmatprep.subr.bf16.mxu1 %v6372_v53  ;;  %4555 = vmatprep.subr.bf16.mxu0 %v6374_v54  ;;  %v7256_v2 = vld [vmem:[%s8394_s8 + $0xc0] sm:$0xff]  }
0x1511   : > { %v7257_v53 = vld [vmem:[%s8394_s8] sm:$0xff]  }
0x1512   : > { %v7258_v54 = vld [vmem:[%s8394_s8 + $0x80] sm:$0xff]  }
0x1513   : > { %4513 = vmatpush1.bf16.msra.mxu1 %v6371_v59  ;;  %4556 = vmatpush1.bf16.msra.mxu0 %v6373_v60  ;;  %v8593_v59 = vrot.slane %v8590_v58, %v3540_v57  ;;  %v3544_v60 = vsub.s32 4, %v8025_v30 }
0x1514   : > { %4514 = vmatprep.subr.bf16.mxu1 %v6356_v61  ;;  %4557 = vmatprep.subr.bf16.mxu0 %v6358_v62  ;;  %v3552_v61 = vsub.s32 6, %v8025_v30  ;;  %v3548_v62 = vsub.s32 5, %v8025_v30 }
0x1515   : > { %v8602_v8 = vrot.slane %v8590_v58, %v3544_v60 }
0x1516   : > { %v8607_v9 = vrot.slane %v8590_v58, %v3552_v61  ;;  %v8612_v10 = vrot.slane %v8590_v58, %v3548_v62 }
0x1517   : > { %4515 = vmatpush1.bf16.msra.mxu1 %v6355_v14  ;;  %4558 = vmatpush1.bf16.msra.mxu0 %v6357_v50  ;;  %v8617_v14 = vrot.slane %v8590_v58, %v3556_v7  ;;  %v8619_v50 = vld [vmem:[%s3521_s20] sm:$0xff] }
0x1518   : > { %4516 = vmatprep.subr.bf16.mxu1 %v6340_v20  ;;  %4559 = vmatprep.subr.bf16.mxu0 %v6342_v16  ;;  %v3533_v63 = vrot.slane %v8619_v50, %v8031_v33  ;;  %v3541_v36 = vrot.slane %v8619_v50, %v3540_v57  ;;  %v3529_v5 = vrot.slane %v8619_v50, %v8028_v31  ;;  %v7275_v57 = vld [vmem:[%s8394_s8 + $0x158] sm:$0xff]  }
0x1519   : > { %v3537_v6 = vrot.slane %v8619_v50, %v8042_v40 }
0x151b   : > { %4517 = vmatpush1.bf16.msra.mxu1 %v6339_v41  ;;  %4560 = vmatpush1.bf16.msra.mxu0 %v6341_v49 }
0x151c   : > { %4518 = vmatprep.subr.bf16.mxu1 %v6324_v51  ;;  %4561 = vmatprep.subr.bf16.mxu0 %v6326_v12 }
0x151f   : > { %4519 = vmatpush1.bf16.msra.mxu1 %v6323_v17  ;;  %4562 = vmatpush1.bf16.msra.mxu0 %v6325_v19 }
0x1520   : > { %6660 = vmatprep.subr.bf16.mxu1 %v7227_v21  ;;  %6682 = vmatprep.subr.bf16.mxu0 %v7228_v22 }
0x1522   : > { %4537 = vmatmul.mubr.bf16.vlgmr.msra.gmra.mxu1 %v8450_v18  ;;  %4580 = vmatmul.mubr.bf16.vlgmr.msra.gmra.mxu0 %v8450_v18  ;;  %v7239_v18 = vld [vmem:[%s8394_s8 + $0x60] sm:$0xff]  }
0x1523   : > { %6661 = vmatpush3.bf16.msra.mxu1 %v7229_v24  ;;  %6683 = vmatpush3.bf16.msra.mxu0 %v7230_v47 }
0x1524   : > { %6662 = vmatprep.subr.bf16.mxu1 %v7231_v23  ;;  %6684 = vmatprep.subr.bf16.mxu0 %v7232_v28 }
0x1527   : > { %6663 = vmatpush3.bf16.msra.mxu1 %v7233_v29  ;;  %6685 = vmatpush3.bf16.msra.mxu0 %v7234_v4 }
0x1528   : > { %6664 = vmatprep.subr.bf16.mxu1 %v7235_v11  ;;  %6686 = vmatprep.subr.bf16.mxu0 %v7236_v13 }
0x152b   : > { %6665 = vmatpush3.bf16.msra.mxu1 %v7237_v25  ;;  %6687 = vmatpush3.bf16.msra.mxu0 %v7238_v0 }
0x152c   : > { %6666 = vmatprep.subr.bf16.mxu1 %v7239_v18  ;;  %6688 = vmatprep.subr.bf16.mxu0 %v7240_v26 }
0x152f   : > { %6667 = vmatpush3.bf16.msra.mxu1 %v7241_v27  ;;  %6689 = vmatpush3.bf16.msra.mxu0 %v7242_v1 }
0x1530   : > { %6668 = vmatprep.subr.bf16.mxu1 %v7243_v32  ;;  %6690 = vmatprep.subr.bf16.mxu0 %v7244_v35 }
0x1533   : > { %6669 = vmatpush3.bf16.msra.mxu1 %v7245_v39  ;;  %6691 = vmatpush3.bf16.msra.mxu0 %v7246_v43  ;;  %v7261_v39 = vld [vmem:[%s8394_s8 + $0x138] sm:$0xff]  }
0x1534   : > { %6670 = vmatprep.subr.bf16.mxu1 %v7247_v45  ;;  %6692 = vmatprep.subr.bf16.mxu0 %v7248_v38  ;;  %v7262_v43 = vld [vmem:[%s8394_s8 + $0x1b8] sm:$0xff]  }
0x1537   : > { %6671 = vmatpush3.bf16.msra.mxu1 %v7249_v42  ;;  %6693 = vmatpush3.bf16.msra.mxu0 %v7250_v44  ;;  %v7263_v42 = vld [vmem:[%s8394_s8 + $0x170] sm:$0xff]  }
0x1538   : > { %6672 = vmatprep.subr.bf16.mxu1 %v7251_v46  ;;  %6694 = vmatprep.subr.bf16.mxu0 %v7252_v48  ;;  %v7264_v44 = vld [vmem:[%s8394_s8 + $0x1f0] sm:$0xff]  }
0x1539   : > { %v7265_v46 = vld [vmem:[%s8394_s8 + $0x130] sm:$0xff]  }
0x153a   : > { %v7266_v48 = vld [vmem:[%s8394_s8 + $0x1b0] sm:$0xff]  }
0x153b   : > { %6673 = vmatpush3.bf16.msra.mxu1 %v7253_v52  ;;  %6695 = vmatpush3.bf16.msra.mxu0 %v7254_v37  ;;  %v7267_v52 = vld [vmem:[%s8394_s8 + $0x168] sm:$0xff]  }
0x153c   : > { %6674 = vmatprep.subr.bf16.mxu1 %v7255_v3  ;;  %6696 = vmatprep.subr.bf16.mxu0 %v7256_v2  ;;  %v7268_v37 = vld [vmem:[%s8394_s8 + $0x1e8] sm:$0xff]  }
0x153d   : > { %v7269_v3 = vld [vmem:[%s8394_s8 + $0x128] sm:$0xff]  }
0x153e   : > { %v7270_v2 = vld [vmem:[%s8394_s8 + $0x1a8] sm:$0xff]  }
0x153f   : > { %6675 = vmatpush3.bf16.msra.mxu1 %v7257_v53  ;;  %6697 = vmatpush3.bf16.msra.mxu0 %v7258_v54  ;;  %v7271_v53 = vld [vmem:[%s8394_s8 + $0x160] sm:$0xff]  }
0x1540   : > { %6704 = vmatprep.subr.bf16.mxu1 %v7259_v55  ;;  %6726 = vmatprep.subr.bf16.mxu0 %v7260_v56  ;;  %v7272_v54 = vld [vmem:[%s8394_s8 + $0x1e0] sm:$0xff]  }
0x1541   : > { %v7273_v55 = vld [vmem:[%s8394_s8 + $0x120] sm:$0xff]  }
0x1542   : > { %v7274_v56 = vld [vmem:[%s8394_s8 + $0x1a0] sm:$0xff]  }
0x1582   : > { %v4280_v20 = vpop.f32.mrf.mxu1  ;;  %v4323_v16 = vpop.f32.mrf.mxu0 }
0x1583   : > { %v4281_v24 = vadd.f32 %v4280_v20, %v3529_v5  ;;  %v4324_v47 = vadd.f32 %v4323_v16, %v3537_v6  ;;  %v7276_v20 = vld [vmem:[%s8394_s8 + $0x1d8] sm:$0xff]  }
0x1584   : > { %v4282_v41 = vpop.f32.mrf.mxu1  ;;  %v4325_v49 = vpop.f32.mrf.mxu0  ;;  %v7277_v16 = vld [vmem:[%s8394_s8 + $0x118] sm:$0xff]  }
0x1585   : > { %v4283_v17 = vadd.f32 %v4282_v41, %v3533_v63  ;;  %v4326_v19 = vadd.f32 %v4325_v49, %v3541_v36  ;;  %v4590_v27 = vmax.f32 %v4281_v24, 0.0  ;;  %v4592_v1 = vmax.f32 %v4324_v47, 0.0  ;;  %v7282_v41 = vld [vmem:[%s8394_s8 + $0x190] sm:$0xff]  }
0x1586   : > { %v4284_v51 = vpop.f32.mrf.mxu1  ;;  %v4327_v12 = vpop.f32.mrf.mxu0  ;;  %v3553_v24 = vrot.slane %v8619_v50, %v3552_v61 }
0x1587   : > { %v4285_v21 = vadd.f32 %v4284_v51, %v3529_v5  ;;  %v4328_v22 = vadd.f32 %v4327_v12, %v3537_v6  ;;  %v4591_v25 = vmax.f32 %v4283_v17, 0.0  ;;  %v4593_v0 = vmax.f32 %v4326_v19, 0.0  ;;  %v7280_v5 = vld [vmem:[%s8394_s8 + $0x1d0] sm:$0xff]   ;;  %v7283_v12 = vld [vmem:[%s8394_s8 + $0x148] sm:$0xff]  }
0x1588   : > { %v4286_v23 = vpop.f32.mrf.mxu1  ;;  %v4329_v28 = vpop.f32.mrf.mxu0  ;;  %v7281_v6 = vld [vmem:[%s8394_s8 + $0x110] sm:$0xff]   ;;  %v7284_v17 = vld [vmem:[%s8394_s8 + $0x1c8] sm:$0xff]   ;;  %v3549_v19 = vrot.slane %v8619_v50, %v3548_v62 }
0x1589   : > { %v4287_v29 = vadd.f32 %v4286_v23, %v3533_v63  ;;  %v4330_v4 = vadd.f32 %v4329_v28, %v3541_v36  ;;  %v4606_v11 = vmax.f32 %v4285_v21, 0.0  ;;  %v4608_v13 = vmax.f32 %v4328_v22, 0.0  ;;  %v7278_v63 = vld [vmem:[%s8394_s8 + $0x198] sm:$0xff]   ;;  %v7279_v36 = vld [vmem:[%s8394_s8 + $0x150] sm:$0xff]   ;;  %v7285_v28 = vld [vmem:[%s8394_s8 + $0x108] sm:$0xff]  }
0x158a   : > { %v3557_v21 = vrot.slane %v8619_v50, %v3556_v7  ;;  %v3545_v22 = vrot.slane %v8619_v50, %v3544_v60  ;;  %v7287_v7 = vld [vmem:[%s8394_s8 + $0x140] sm:$0xff]  }
0x158b   : > { %v4607_v18 = vmax.f32 %v4287_v29, 0.0  ;;  %v4609_v26 = vmax.f32 %v4330_v4, 0.0  ;;  %v4622_v45 = vpack.c.bf16 %v4606_v11, %v4590_v27  ;;  %v4624_v38 = vpack.c.bf16 %v4608_v13, %v4592_v1  ;;  %v7286_v29 = vld [vmem:[%s8394_s8 + $0x188] sm:$0xff]   ;;  %v7288_v11 = vld [vmem:[%s8394_s8 + $0x1c0] sm:$0xff]  }
0x158d   : > { %v4623_v32 = vpack.c.bf16 %v4607_v18, %v4591_v25  ;;  %v4625_v35 = vpack.c.bf16 %v4609_v26, %v4593_v0 }
0x158f   : > { %5704 = vmatprep.mubr.bf16.mxu1 %v4623_v32  ;;  %5745 = vmatprep.mubr.bf16.mxu0 %v4625_v35  ;;  %v7289_v32 = vld [vmem:[%s8394_s8 + $0x100] sm:$0xff]  }
0x1590   : > { %5705 = vmatmul.mubr.bf16.vlgmr.msra.gmra.mxu1 %v4622_v45  ;;  %5746 = vmatmul.mubr.bf16.vlgmr.msra.gmra.mxu0 %v4624_v38  ;;  %v7290_v35 = vld [vmem:[%s8394_s8 + $0x180] sm:$0xff]   ;;  %v7291_v45 = vld [vmem:[%s8394_s8 + $0x278] sm:$0xff]  }
0x1591   : > { %6705 = vmatpush3.bf16.msra.mxu1 %v7261_v39  ;;  %6727 = vmatpush3.bf16.msra.mxu0 %v7262_v43  ;;  %v7292_v38 = vld [vmem:[%s8394_s8 + $0x2f8] sm:$0xff]  }
0x1592   : > { %6706 = vmatprep.subr.bf16.mxu1 %v7263_v42  ;;  %6728 = vmatprep.subr.bf16.mxu0 %v7264_v44 }
0x1595   : > { %6707 = vmatpush3.bf16.msra.mxu1 %v7265_v46  ;;  %6729 = vmatpush3.bf16.msra.mxu0 %v7266_v48 }
0x1596   : > { %6708 = vmatprep.subr.bf16.mxu1 %v7267_v52  ;;  %6730 = vmatprep.subr.bf16.mxu0 %v7268_v37 }
0x1599   : > { %6709 = vmatpush3.bf16.msra.mxu1 %v7269_v3  ;;  %6731 = vmatpush3.bf16.msra.mxu0 %v7270_v2 }
0x159a   : > { %6710 = vmatprep.subr.bf16.mxu1 %v7271_v53  ;;  %6732 = vmatprep.subr.bf16.mxu0 %v7272_v54  ;;  %v7293_v53 = vld [vmem:[%s8394_s8 + $0x238] sm:$0xff]  }
0x159b   : > { %v7294_v54 = vld [vmem:[%s8394_s8 + $0x2b8] sm:$0xff]  }
0x159d   : > { %6711 = vmatpush3.bf16.msra.mxu1 %v7273_v55  ;;  %6733 = vmatpush3.bf16.msra.mxu0 %v7274_v56 }
0x159e   : > { %6712 = vmatprep.subr.bf16.mxu1 %v7275_v57  ;;  %6734 = vmatprep.subr.bf16.mxu0 %v7276_v20  ;;  %v7295_v57 = vld [vmem:[%s8394_s8 + $0x270] sm:$0xff]  }
0x159f   : > { %v7296_v20 = vld [vmem:[%s8394_s8 + $0x2f0] sm:$0xff]  }
0x15a1   : > { %6713 = vmatpush3.bf16.msra.mxu1 %v7277_v16  ;;  %6735 = vmatpush3.bf16.msra.mxu0 %v7278_v63  ;;  %v7297_v16 = vld [vmem:[%s8394_s8 + $0x230] sm:$0xff]  }
0x15a2   : > { %v4366_v49 = vpop.f32.mrf.mxu1  ;;  %v4409_v51 = vpop.f32.mrf.mxu0  ;;  %6714 = vmatprep.subr.bf16.mxu1 %v7279_v36  ;;  %6736 = vmatprep.subr.bf16.mxu0 %v7280_v5  ;;  %v7298_v63 = vld [vmem:[%s8394_s8 + $0x2b0] sm:$0xff]   ;;  %v7299_v36 = vld [vmem:[%s8394_s8 + $0x268] sm:$0xff]  }
0x15a3   : > { %v4367_v61 = vadd.f32 %v4366_v49, %v3545_v22  ;;  %v4410_v50 = vadd.f32 %v4409_v51, %v3553_v24  ;;  %v7300_v5 = vld [vmem:[%s8394_s8 + $0x2e8] sm:$0xff]   ;;  %v7303_v49 = vld [vmem:[%s8394_s8 + $0x260] sm:$0xff]  }
0x15a4   : > { %v4368_v47 = vpop.f32.mrf.mxu1  ;;  %v4411_v23 = vpop.f32.mrf.mxu0  ;;  %v7304_v51 = vld [vmem:[%s8394_s8 + $0x2e0] sm:$0xff]  }
0x15a5   : > { %6715 = vmatpush3.bf16.msra.mxu1 %v7281_v6  ;;  %6737 = vmatpush3.bf16.msra.mxu0 %v7282_v41  ;;  %v4369_v13 = vadd.f32 %v4368_v47, %v3549_v19  ;;  %v4412_v60 = vadd.f32 %v4411_v23, %v3557_v21  ;;  %v4594_v52 = vmax.f32 %v4367_v61, 0.0  ;;  %v4596_v37 = vmax.f32 %v4410_v50, 0.0  ;;  %v7301_v6 = vld [vmem:[%s8394_s8 + $0x228] sm:$0xff]   ;;  %v7311_v47 = vld [vmem:[%s8394_s8 + $0x250] sm:$0xff]  }
0x15a6   : > { %v4370_v4 = vpop.f32.mrf.mxu1  ;;  %v4413_v62 = vpop.f32.mrf.mxu0  ;;  %6716 = vmatprep.subr.bf16.mxu1 %v7283_v12  ;;  %6738 = vmatprep.subr.bf16.mxu0 %v7284_v17  ;;  %v7302_v41 = vld [vmem:[%s8394_s8 + $0x2a8] sm:$0xff]   ;;  %v7305_v12 = vld [vmem:[%s8394_s8 + $0x220] sm:$0xff]   ;;  %v7312_v23 = vld [vmem:[%s8394_s8 + $0x2d0] sm:$0xff]  }
0x15a7   : > { %v4371_v25 = vadd.f32 %v4370_v4, %v3545_v22  ;;  %v4414_v0 = vadd.f32 %v4413_v62, %v3553_v24  ;;  %v4595_v42 = vmax.f32 %v4369_v13, 0.0  ;;  %v4597_v44 = vmax.f32 %v4412_v60, 0.0  ;;  %v7306_v17 = vld [vmem:[%s8394_s8 + $0x2a0] sm:$0xff]   ;;  %v7309_v22 = vld [vmem:[%s8394_s8 + $0x218] sm:$0xff]   ;;  %v7317_v50 = vld [vmem:[%s8394_s8 + $0x208] sm:$0xff]  }
0x15a8   : > { %v4372_v18 = vpop.f32.mrf.mxu1  ;;  %v4415_v26 = vpop.f32.mrf.mxu0  ;;  %v7310_v24 = vld [vmem:[%s8394_s8 + $0x298] sm:$0xff]   ;;  %v3565_v13 = vrot.slane %v8590_v58, %v8031_v33  ;;  %v3561_v60 = vrot.slane %v8590_v58, %v8028_v31  ;;  %v7320_v33 = vld [vmem:[%s8394_s8 + $0x2c0] sm:$0xff]  }
0x15a9   : > { %v4373_v27 = vadd.f32 %v4372_v18, %v3549_v19  ;;  %v4416_v1 = vadd.f32 %v4415_v26, %v3557_v21  ;;  %6717 = vmatpush3.bf16.msra.mxu1 %v7285_v28  ;;  %6739 = vmatpush3.bf16.msra.mxu0 %v7286_v29  ;;  %v4610_v39 = vmax.f32 %v4371_v25, 0.0  ;;  %v4612_v43 = vmax.f32 %v4414_v0, 0.0  ;;  %v7307_v19 = vld [vmem:[%s8394_s8 + $0x258] sm:$0xff]   ;;  %v7313_v28 = vld [vmem:[%s8394_s8 + $0x210] sm:$0xff]   ;;  %v7318_v18 = vld [vmem:[%s8394_s8 + $0x288] sm:$0xff]  }
0x15aa   : > { %6718 = vmatprep.subr.bf16.mxu1 %v7287_v7  ;;  %6740 = vmatprep.subr.bf16.mxu0 %v7288_v11  ;;  %v7308_v21 = vld [vmem:[%s8394_s8 + $0x2d8] sm:$0xff]   ;;  %v7314_v29 = vld [vmem:[%s8394_s8 + $0x290] sm:$0xff]   ;;  %v7315_v7 = vld [vmem:[%s8394_s8 + $0x248] sm:$0xff]   ;;  %v3569_v25 = vrot.slane %v8590_v58, %v8042_v40 }
0x15ab   : > { %v4611_v46 = vmax.f32 %v4373_v27, 0.0  ;;  %v4613_v48 = vmax.f32 %v4416_v1, 0.0  ;;  %v4626_v55 = vpack.c.bf16 %v4610_v39, %v4594_v52  ;;  %v4628_v56 = vpack.c.bf16 %v4612_v43, %v4596_v37  ;;  %v7316_v11 = vld [vmem:[%s8394_s8 + $0x2c8] sm:$0xff]   ;;  %v7319_v1 = vld [vmem:[%s8394_s8 + $0x240] sm:$0xff]   ;;  %v7323_v37 = vld [vmem:[%s8394_s8 + $0x378] sm:$0xff]  }
0x15ad   : > { %v4627_v3 = vpack.c.bf16 %v4611_v46, %v4595_v42  ;;  %v4629_v2 = vpack.c.bf16 %v4613_v48, %v4597_v44  ;;  %6719 = vmatpush3.bf16.msra.mxu1 %v7289_v32  ;;  %6741 = vmatpush3.bf16.msra.mxu0 %v7290_v35  ;;  %v7321_v44 = vld [vmem:[%s8394_s8 + $0x200] sm:$0xff]  }
0x15ae   : > { %6748 = vmatprep.subr.bf16.mxu1 %v7291_v45  ;;  %6770 = vmatprep.subr.bf16.mxu0 %v7292_v38  ;;  %v7322_v46 = vld [vmem:[%s8394_s8 + $0x280] sm:$0xff]  }
0x15af   : > { %5786 = vmatprep.mubr.bf16.mxu1 %v4627_v3  ;;  %5827 = vmatprep.mubr.bf16.mxu0 %v4629_v2  ;;  %v7324_v3 = vld [vmem:[%s8394_s8 + $0x3f8] sm:$0xff]  }
0x15b0   : > { %5787 = vmatmul.mubr.bf16.vlgmr.msra.gmra.mxu1 %v4626_v55  ;;  %5828 = vmatmul.mubr.bf16.vlgmr.msra.gmra.mxu0 %v4628_v56 }
0x15b1   : > { %6749 = vmatpush3.bf16.msra.mxu1 %v7293_v53  ;;  %6771 = vmatpush3.bf16.msra.mxu0 %v7294_v54 }
0x15b2   : > { %6750 = vmatprep.subr.bf16.mxu1 %v7295_v57  ;;  %6772 = vmatprep.subr.bf16.mxu0 %v7296_v20 }
0x15b5   : > { %6751 = vmatpush3.bf16.msra.mxu1 %v7297_v16  ;;  %6773 = vmatpush3.bf16.msra.mxu0 %v7298_v63  ;;  %v7325_v16 = vld [vmem:[%s8394_s8 + $0x338] sm:$0xff]  }
0x15b6   : > { %6752 = vmatprep.subr.bf16.mxu1 %v7299_v36  ;;  %6774 = vmatprep.subr.bf16.mxu0 %v7300_v5  ;;  %v7326_v63 = vld [vmem:[%s8394_s8 + $0x3b8] sm:$0xff]  }
0x15b9   : > { %6753 = vmatpush3.bf16.msra.mxu1 %v7301_v6  ;;  %6775 = vmatpush3.bf16.msra.mxu0 %v7302_v41  ;;  %v7327_v6 = vld [vmem:[%s8394_s8 + $0x370] sm:$0xff]  }
0x15ba   : > { %6754 = vmatprep.subr.bf16.mxu1 %v7303_v49  ;;  %6776 = vmatprep.subr.bf16.mxu0 %v7304_v51  ;;  %v7328_v41 = vld [vmem:[%s8394_s8 + $0x3f0] sm:$0xff]  }
0x15bb   : > { %v7329_v49 = vld [vmem:[%s8394_s8 + $0x330] sm:$0xff]  }
0x15bc   : > { %v7330_v51 = vld [vmem:[%s8394_s8 + $0x3b0] sm:$0xff]  }
0x15bd   : > { %6755 = vmatpush3.bf16.msra.mxu1 %v7305_v12  ;;  %6777 = vmatpush3.bf16.msra.mxu0 %v7306_v17  ;;  %v7331_v12 = vld [vmem:[%s8394_s8 + $0x368] sm:$0xff]  }
0x15be   : > { %6756 = vmatprep.subr.bf16.mxu1 %v7307_v19  ;;  %6778 = vmatprep.subr.bf16.mxu0 %v7308_v21  ;;  %v7332_v17 = vld [vmem:[%s8394_s8 + $0x3e8] sm:$0xff]  }
0x15bf   : > { %v7333_v19 = vld [vmem:[%s8394_s8 + $0x328] sm:$0xff]  }
0x15c0   : > { %v7334_v21 = vld [vmem:[%s8394_s8 + $0x3a8] sm:$0xff]  }
0x15c1   : > { %6757 = vmatpush3.bf16.msra.mxu1 %v7309_v22  ;;  %6779 = vmatpush3.bf16.msra.mxu0 %v7310_v24  ;;  %v7335_v22 = vld [vmem:[%s8394_s8 + $0x360] sm:$0xff]  }
0x15c2   : > { %v4452_v4 = vpop.f32.mrf.mxu1  ;;  %v4495_v62 = vpop.f32.mrf.mxu0  ;;  %6758 = vmatprep.subr.bf16.mxu1 %v7311_v47  ;;  %6780 = vmatprep.subr.bf16.mxu0 %v7312_v23  ;;  %v7336_v24 = vld [vmem:[%s8394_s8 + $0x3e0] sm:$0xff]  }
0x15c3   : > { %v4453_v58 = vadd.f32 %v4452_v4, %v3561_v60  ;;  %v4496_v39 = vadd.f32 %v4495_v62, %v3569_v25  ;;  %v7337_v47 = vld [vmem:[%s8394_s8 + $0x320] sm:$0xff]   ;;  %v7341_v4 = vld [vmem:[%s8394_s8 + $0x318] sm:$0xff]  }
0x15c4   : > { %v4454_v0 = vpop.f32.mrf.mxu1  ;;  %v4497_v61 = vpop.f32.mrf.mxu0  ;;  %v7338_v23 = vld [vmem:[%s8394_s8 + $0x3a0] sm:$0xff]   ;;  %v7342_v62 = vld [vmem:[%s8394_s8 + $0x398] sm:$0xff]  }
0x15c5   : > { %6759 = vmatpush3.bf16.msra.mxu1 %v7313_v28  ;;  %6781 = vmatpush3.bf16.msra.mxu0 %v7314_v29  ;;  %v4455_v32 = vadd.f32 %v4454_v0, %v3565_v13  ;;  %v4498_v31 = vadd.f32 %v4497_v61, %v8593_v59  ;;  %v4598_v56 = vmax.f32 %v4453_v58, 0.0  ;;  %v7339_v28 = vld [vmem:[%s8394_s8 + $0x358] sm:$0xff]   ;;  %v7347_v61 = vld [vmem:[%s8394_s8 + $0x348] sm:$0xff]  }
0x15c6   : > { %v4456_v26 = vpop.f32.mrf.mxu1  ;;  %v4499_v27 = vpop.f32.mrf.mxu0  ;;  %6760 = vmatprep.subr.bf16.mxu1 %v7315_v7  ;;  %6782 = vmatprep.subr.bf16.mxu0 %v7316_v11  ;;  %v7340_v29 = vld [vmem:[%s8394_s8 + $0x3d8] sm:$0xff]   ;;  %v7343_v7 = vld [vmem:[%s8394_s8 + $0x350] sm:$0xff]  }
0x15c7   : > { %v4457_v35 = vadd.f32 %v4456_v26, %v3561_v60  ;;  %v4500_v40 = vadd.f32 %v4499_v27, %v3569_v25  ;;  %v4599_v2 = vmax.f32 %v4455_v32, 0.0  ;;  %v4601_v53 = vmax.f32 %v4498_v31, 0.0  ;;  %v7344_v11 = vld [vmem:[%s8394_s8 + $0x3d0] sm:$0xff]   ;;  %v7349_v27 = vld [vmem:[%s8394_s8 + $0x308] sm:$0xff]   ;;  %v7351_v31 = vld [vmem:[%s8394_s8 + $0x340] sm:$0xff]  }
0x15c8   : > { %v4458_v43 = vpop.f32.mrf.mxu1  ;;  %v4501_v45 = vpop.f32.mrf.mxu0  ;;  %v7346_v60 = vld [vmem:[%s8394_s8 + $0x390] sm:$0xff]  }
0x15c9   : > { %v4459_v38 = vadd.f32 %v4458_v43, %v3565_v13  ;;  %v4502_v42 = vadd.f32 %v4501_v45, %v8593_v59  ;;  %6761 = vmatpush3.bf16.msra.mxu1 %v7317_v50  ;;  %6783 = vmatpush3.bf16.msra.mxu0 %v7318_v18  ;;  %v4614_v48 = vmax.f32 %v4457_v35, 0.0  ;;  %v4616_v52 = vmax.f32 %v4500_v40, 0.0  ;;  %v7345_v13 = vld [vmem:[%s8394_s8 + $0x310] sm:$0xff]   ;;  %v7348_v50 = vld [vmem:[%s8394_s8 + $0x3c8] sm:$0xff]   ;;  %v7352_v35 = vld [vmem:[%s8394_s8 + $0x3c0] sm:$0xff]  }
0x15ca   : > { %6762 = vmatprep.subr.bf16.mxu1 %v7319_v1  ;;  %6784 = vmatprep.subr.bf16.mxu0 %v7320_v33  ;;  %v4600_v59 = vmax.f32 %v4496_v39, 0.0  ;;  %v7350_v1 = vld [vmem:[%s8394_s8 + $0x388] sm:$0xff]  }
0x15cb   : > { %v4615_v54 = vmax.f32 %v4459_v38, 0.0  ;;  %v4617_v55 = vmax.f32 %v4502_v42, 0.0  ;;  %v4630_v36 = vpack.c.bf16 %v4614_v48, %v4598_v56 }
0x15cc   : > { %v4632_v5 = vpack.c.bf16 %v4616_v52, %v4600_v59  ;;  %v7353_v52 = vld [vmem:[%s8394_s8 + $0x300] sm:$0xff]  }
0x15cd   : > { %v4631_v57 = vpack.c.bf16 %v4615_v54, %v4599_v2  ;;  %v4633_v20 = vpack.c.bf16 %v4617_v55, %v4601_v53  ;;  %6763 = vmatpush3.bf16.msra.mxu1 %v7321_v44  ;;  %6785 = vmatpush3.bf16.msra.mxu0 %v7322_v46 }
0x15ce   : > { %6792 = vmatprep.subr.bf16.mxu1 %v7323_v37  ;;  %6814 = vmatprep.subr.bf16.mxu0 %v7324_v3  ;;  %v7354_v37 = vld [vmem:[%s8394_s8 + $0x380] sm:$0xff]  }
0x15cf   : > { %5868 = vmatprep.mubr.bf16.mxu1 %v4631_v57  ;;  %5909 = vmatprep.mubr.bf16.mxu0 %v4633_v20 }
0x15d0   : > { %5869 = vmatmul.mubr.bf16.vlgmr.msra.gmra.mxu1 %v4630_v36  ;;  %5910 = vmatmul.mubr.bf16.vlgmr.msra.gmra.mxu0 %v4632_v5 }
0x15d1   : > { %6793 = vmatpush3.bf16.msra.mxu1 %v7325_v16  ;;  %6815 = vmatpush3.bf16.msra.mxu0 %v7326_v63 }
0x15d2   : > { %6794 = vmatprep.subr.bf16.mxu1 %v7327_v6  ;;  %6816 = vmatprep.subr.bf16.mxu0 %v7328_v41 }
0x15d5   : > { %6795 = vmatpush3.bf16.msra.mxu1 %v7329_v49  ;;  %6817 = vmatpush3.bf16.msra.mxu0 %v7330_v51 }
0x15d6   : > { %6796 = vmatprep.subr.bf16.mxu1 %v7331_v12  ;;  %6818 = vmatprep.subr.bf16.mxu0 %v7332_v17 }
0x15d9   : > { %6797 = vmatpush3.bf16.msra.mxu1 %v7333_v19  ;;  %6819 = vmatpush3.bf16.msra.mxu0 %v7334_v21 }
0x15da   : > { %6798 = vmatprep.subr.bf16.mxu1 %v7335_v22  ;;  %6820 = vmatprep.subr.bf16.mxu0 %v7336_v24 }
0x15dd   : > { %6799 = vmatpush3.bf16.msra.mxu1 %v7337_v47  ;;  %6821 = vmatpush3.bf16.msra.mxu0 %v7338_v23  ;;  %v6440_v23 = vld [vmem:[%s4896_s3] ss:$0 sm:$0xff] }
0x15de   : > { %6800 = vmatprep.subr.bf16.mxu1 %v7339_v28  ;;  %6822 = vmatprep.subr.bf16.mxu0 %v7340_v29 }
0x15e1   : > { %6801 = vmatpush3.bf16.msra.mxu1 %v7341_v4  ;;  %6823 = vmatpush3.bf16.msra.mxu0 %v7342_v62 }
0x15e2   : > { %v4538_v25 = vpop.f32.mrf.mxu1  ;;  %v4581_v0 = vpop.f32.mrf.mxu0  ;;  %6802 = vmatprep.subr.bf16.mxu1 %v7343_v7  ;;  %6824 = vmatprep.subr.bf16.mxu0 %v7344_v11 }
0x15e3   : > { %v4539_v45 = vadd.f32 %v4538_v25, %v8602_v8  ;;  %v4582_v38 = vadd.f32 %v4581_v0, %v8607_v9 }
0x15e4   : > { %v4540_v18 = vpop.f32.mrf.mxu1  ;;  %v4583_v26 = vpop.f32.mrf.mxu0 }
0x15e5   : > { %6803 = vmatpush3.bf16.msra.mxu1 %v7345_v13  ;;  %6825 = vmatpush3.bf16.msra.mxu0 %v7346_v60  ;;  %v4541_v40 = vadd.f32 %v4540_v18, %v8612_v10  ;;  %v4584_v58 = vadd.f32 %v4583_v26, %v8617_v14  ;;  %v4602_v56 = vmax.f32 %v4539_v45, 0.0 }
0x15e6   : > { %v4542_v33 = vpop.f32.mrf.mxu1  ;;  %v4585_v32 = vpop.f32.mrf.mxu0  ;;  %6804 = vmatprep.subr.bf16.mxu1 %v7347_v61  ;;  %6826 = vmatprep.subr.bf16.mxu0 %v7348_v50 }
0x15e7   : > { %v4543_v39 = vadd.f32 %v4542_v33, %v8602_v8  ;;  %v4586_v43 = vadd.f32 %v4585_v32, %v8607_v9  ;;  %v4603_v53 = vmax.f32 %v4541_v40, 0.0  ;;  %v4605_v54 = vmax.f32 %v4584_v58, 0.0 }
0x15e8   : > { %v4544_v42 = vpop.f32.mrf.mxu1  ;;  %v4587_v44 = vpop.f32.mrf.mxu0  ;;  %v4604_v9 = vmax.f32 %v4582_v38, 0.0 }
0x15e9   : > { %v4545_v46 = vadd.f32 %v4544_v42, %v8612_v10  ;;  %v4588_v48 = vadd.f32 %v4587_v44, %v8617_v14  ;;  %6805 = vmatpush3.bf16.msra.mxu1 %v7349_v27  ;;  %6827 = vmatpush3.bf16.msra.mxu0 %v7350_v1  ;;  %v4618_v3 = vmax.f32 %v4543_v39, 0.0  ;;  %v4620_v2 = vmax.f32 %v4586_v43, 0.0 }
0x15ea   : > { %6806 = vmatprep.subr.bf16.mxu1 %v7351_v31  ;;  %6828 = vmatprep.subr.bf16.mxu0 %v7352_v35 }
0x15eb   : > { %v4619_v55 = vmax.f32 %v4545_v46, 0.0  ;;  %v4621_v8 = vmax.f32 %v4588_v48, 0.0  ;;  %v4634_v10 = vpack.c.bf16 %v4618_v3, %v4602_v56  ;;  %v4636_v14 = vpack.c.bf16 %v4620_v2, %v4604_v9 }
0x15ed   : > { %v4635_v59 = vpack.c.bf16 %v4619_v55, %v4603_v53  ;;  %v4637_v57 = vpack.c.bf16 %v4621_v8, %v4605_v54  ;;  %6807 = vmatpush3.bf16.msra.mxu1 %v7353_v52  ;;  %6829 = vmatpush3.bf16.msra.mxu0 %v7354_v37 }
0x15ef   : > { %5950 = vmatprep.mubr.bf16.mxu1 %v4635_v59  ;;  %5991 = vmatprep.mubr.bf16.mxu0 %v4637_v57 }
0x15f0   : > { %5951 = vmatmul.mubr.bf16.vlgmr.msra.gmra.mxu1 %v4634_v10  ;;  %5992 = vmatmul.mubr.bf16.vlgmr.msra.gmra.mxu0 %v4636_v14 }
0x1650   : > { %v6676_v20 = vpop.f32.mrf.mxu1  ;;  %v6698_v16 = vpop.f32.mrf.mxu0 }
0x1652   : > { %v6677_v63 = vpop.f32.mrf.mxu1  ;;  %v6699_v36 = vpop.f32.mrf.mxu0 }
0x1653   : > { %v6678_v47 = vadd.f32 %v6677_v63, %v6676_v20  ;;  %v6700_v13 = vadd.f32 %v6699_v36, %v6698_v16 }
0x1654   : > { %v6679_v5 = vpop.f32.mrf.mxu1  ;;  %v6701_v6 = vpop.f32.mrf.mxu0 }
0x1655   : > { %v5707_v62 = vadd.f32 %v6678_v47, %v6440_v23 }
0x1656   : > { %v6680_v41 = vpop.f32.mrf.mxu1  ;;  %v6702_v49 = vpop.f32.mrf.mxu0 }
0x1657   : > { %v6681_v7 = vadd.f32 %v6680_v41, %v6679_v5  ;;  %v5748_v0 = vadd.f32 %v6700_v13, %v5707_v62  ;;  %v6703_v18 = vadd.f32 %v6702_v49, %v6701_v6 }
0x1659   : > { %v5710_v61 = vadd.f32 %v6681_v7, %v6440_v23  ;;  %v6570_v7 = vld [vmem:[%s6004_s13] ss:$0 sm:$0xff] }
0x165b   : > { %v5751_v33 = vadd.f32 %v6703_v18, %v5710_v61  ;;  %v7805_v18 = vmov (%p244_p0), 0.0  }
0x165c   :  { %7053 = vmatprep.subr.mxu0 (%p244_p0), %v7805_v18  ;;  %7085 = vmatprep.mubr.msk.f32.mxu0 (%p244_p0), %vm7806_vm9, %v7805_v18 }
0x1670   : > { %v6720_v51 = vpop.f32.mrf.mxu1  ;;  %v6742_v12 = vpop.f32.mrf.mxu0 }
0x1672   : > { %v6721_v17 = vpop.f32.mrf.mxu1  ;;  %v6743_v19 = vpop.f32.mrf.mxu0 }
0x1673   : > { %v6722_v60 = vadd.f32 %v6721_v17, %v6720_v51  ;;  %v6744_v32 = vadd.f32 %v6743_v19, %v6742_v12 }
0x1674   : > { %v6723_v21 = vpop.f32.mrf.mxu1  ;;  %v6745_v22 = vpop.f32.mrf.mxu0 }
0x1675   : > { %v5789_v26 = vadd.f32 %v6722_v60, %v5748_v0 }
0x1676   : > { %v6724_v24 = vpop.f32.mrf.mxu1  ;;  %v6746_v28 = vpop.f32.mrf.mxu0 }
0x1677   : > { %v6725_v27 = vadd.f32 %v6724_v24, %v6723_v21  ;;  %v5830_v40 = vadd.f32 %v6744_v32, %v5789_v26  ;;  %v6747_v43 = vadd.f32 %v6746_v28, %v6745_v22  ;;  %v6058_v26 = vld [vmem:[#allocation22 + $0x70] sm:$0xff] (%p244_p0)  ;;  %v6055_v32 = vld [vmem:[#allocation22 + $0x58] sm:$0xff] (%p244_p0) }
0x1679   : > { %v5792_v58 = vadd.f32 %v6725_v27, %v5751_v33  ;;  %v6057_v27 = vld [vmem:[#allocation22 + $0x68] sm:$0xff] (%p244_p0)  ;;  %v6056_v33 = vld [vmem:[#allocation22 + $0x60] sm:$0xff] (%p244_p0) }
0x167b   : > { %v5833_v46 = vadd.f32 %v6747_v43, %v5792_v58  ;;  %v6050_v58 = vld [vmem:[#allocation22 + $0x30] sm:$0xff] (%p244_p0)  ;;  %v6048_v43 = vld [vmem:[#allocation22 + $0x20] sm:$0xff] (%p244_p0) }
0x1690   : > { %v6764_v29 = vpop.f32.mrf.mxu1  ;;  %v6786_v4 = vpop.f32.mrf.mxu0 }
0x1692   : > { %v6765_v11 = vpop.f32.mrf.mxu1  ;;  %v6787_v25 = vpop.f32.mrf.mxu0 }
0x1693   : > { %v6766_v31 = vadd.f32 %v6765_v11, %v6764_v29  ;;  %v6788_v48 = vadd.f32 %v6787_v25, %v6786_v4  ;;  %v6569_v4 = vld [vmem:[%s6002_s21] ss:$0 sm:$0xff] }
0x1694   : > { %v6767_v50 = vpop.f32.mrf.mxu1  ;;  %v6789_v1 = vpop.f32.mrf.mxu0 }
0x1695   : > { %v5871_v45 = vadd.f32 %v6766_v31, %v5830_v40  ;;  %v6054_v31 = vld [vmem:[#allocation22 + $0x50] sm:$0xff] (%p244_p0)  ;;  %v6051_v40 = vld [vmem:[#allocation22 + $0x38] sm:$0xff] (%p244_p0) }
0x1696   : > { %v6768_v35 = vpop.f32.mrf.mxu1  ;;  %v6790_v39 = vpop.f32.mrf.mxu0 }
0x1697   : > { %v6769_v38 = vadd.f32 %v6768_v35, %v6767_v50  ;;  %v5912_v3 = vadd.f32 %v6788_v48, %v5871_v45  ;;  %v6791_v8 = vadd.f32 %v6790_v39, %v6789_v1  ;;  %v6059_v50 = vld [vmem:[#allocation22 + $0x78] sm:$0xff] (%p244_p0)  ;;  %v6052_v35 = vld [vmem:[#allocation22 + $0x40] sm:$0xff] (%p244_p0)  ;;  %v6049_v39 = vld [vmem:[#allocation22 + $0x28] sm:$0xff] (%p244_p0) }
0x1698   :  { %7054 = vmatpush3.msra.mxu0 (%p244_p0), %v6059_v50  ;;  %v6047_v45 = vld [vmem:[#allocation22 + $0x18] sm:$0xff] (%p244_p0) }
0x1699   : > { %v5874_v2 = vadd.f32 %v6769_v38, %v5833_v46  ;;  %7055 = vmatprep.subr.mxu0 (%p244_p0), %v7805_v18  ;;  %v6046_v38 = vld [vmem:[#allocation22 + $0x10] sm:$0xff] (%p244_p0)  ;;  %v6044_v46 = vld [vmem:[#allocation22] sm:$0xff] (%p244_p0) }
0x169a   :  { %7056 = vmatpush3.msra.mxu0 (%p244_p0), %v6058_v26 }
0x169b   : > { %v5915_v10 = vadd.f32 %v6791_v8, %v5874_v2  ;;  %7057 = vmatprep.subr.mxu0 (%p244_p0), %v7805_v18  ;;  %v6571_v2 = vld [vmem:[#allocation23] ss:$0 sm:$0xff] (%p244_p0) }
0x169c   :  { %7058 = vmatpush3.msra.mxu0 (%p244_p0), %v6057_v27 }
0x169d   :  { %7059 = vmatprep.subr.mxu0 (%p244_p0), %v7805_v18 }
0x169e   :  { %7060 = vmatpush3.msra.mxu0 (%p244_p0), %v6056_v33 }
0x169f   :  { %7061 = vmatprep.subr.mxu0 (%p244_p0), %v7805_v18 }
0x16a0   :  { %7062 = vmatpush3.msra.mxu0 (%p244_p0), %v6055_v32 }
0x16a1   :  { %7063 = vmatprep.subr.mxu0 (%p244_p0), %v7805_v18 }
0x16a2   :  { %7064 = vmatpush3.msra.mxu0 (%p244_p0), %v6054_v31 }
0x16a3   :  { %7065 = vmatprep.subr.mxu0 (%p244_p0), %v7805_v18 }
0x16b0   : > { %v6808_v42 = vpop.f32.mrf.mxu1  ;;  %v6830_v44 = vpop.f32.mrf.mxu0 }
0x16b2   : > { %v6809_v52 = vpop.f32.mrf.mxu1  ;;  %v6831_v37 = vpop.f32.mrf.mxu0 }
0x16b3   : > { %v6810_v53 = vadd.f32 %v6809_v52, %v6808_v42  ;;  %v6832_v9 = vadd.f32 %v6831_v37, %v6830_v44  ;;  %v6045_v44 = vld [vmem:[#allocation22 + $0x8] sm:$0xff] (%p244_p0)  ;;  %v7807_v52 = vmov (%p244_p0), 1966171168  }
0x16b4   : > { %v6811_v54 = vpop.f32.mrf.mxu1  ;;  %v6833_v55 = vpop.f32.mrf.mxu0  ;;  %v6145_v37 = vunpack.c.l.s4 (%p244_p0), %v7807_v52 }
0x16b5   : > { %v5953_v56 = vadd.f32 %v6810_v53, %v5912_v3 }
0x16b6   : > { %v6812_v59 = vpop.f32.mrf.mxu1  ;;  %v6834_v57 = vpop.f32.mrf.mxu0  ;;  %v6146_v3 = vunpack.c.0.s8 (%p244_p0), %v6145_v37 }
0x16b7   : > { %v5994_v14 = vadd.f32 %v6832_v9, %v5953_v56  ;;  %v6813_v20 = vadd.f32 %v6812_v59, %v6811_v54  ;;  %v6835_v63 = vadd.f32 %v6834_v57, %v6833_v55 }
0x16b8   :  { %v6149_v53 = vsub.s32 (%p244_p0), %v6146_v3, %v8025_v30 }
0x16b9   : > { %v5956_v16 = vadd.f32 %v6813_v20, %v5915_v10  ;;  %v6000_v36 = vadd.f32 %v5994_v14, %v8444_v15 }
0x16bb   : > { %v5997_v5 = vadd.f32 %v6835_v63, %v5956_v16  ;;  %6006 = vadd.xlane.f32.xlu1 %v6000_v36 }
0x16bd   : > { %v6001_v6 = vadd.f32 %v5997_v5, %v8446_v34 }
0x16bf   : > { %6008 = vadd.xlane.f32.xlu0 %v6001_v6 }
0x1744   : > { %v6007_v41 = vpop.xlane.xlu1 %6006 }
0x1745   : > { %v6010_v49 = vmul.f32 0.0078125, %v6007_v41 }
0x1747   : > { %v6012_v51 = vsub.f32 %v6000_v36, %v6010_v49 }
0x1748   : > { %v6009_v12 = vpop.xlane.xlu0 %6008 }
0x1749   : > { %v6011_v17 = vmul.f32 0.0078125, %v6009_v12  ;;  %v6014_v19 = vmul.f32 %v6012_v51, %v6012_v51 }
0x174b   : > { %v6013_v21 = vsub.f32 %v6001_v6, %v6011_v17  ;;  %6016 = vadd.xlane.f32.xlu1 %v6014_v19 }
0x174d   : > { %v6015_v22 = vmul.f32 %v6013_v21, %v6013_v21 }
0x174f   : > { %6018 = vadd.xlane.f32.xlu0 %v6015_v22 }
0x17d4   : > { %v6017_v24 = vpop.xlane.xlu1 %6016 }
0x17d5   : > { %v6020_v47 = vmul.f32 0.0078125, %v6017_v24 }
0x17d7   : > { %v6022_v15 = vadd.f32 1e-05, %v6020_v47 }
0x17d8   : > { %v6019_v23 = vpop.xlane.xlu0 %6018 }
0x17d9   : > { %7423 = vrsqrt.f32 %v6022_v15  ;;  %v6021_v28 = vmul.f32 0.0078125, %v6019_v23 }
0x17db   : > { %v6023_v34 = vadd.f32 1e-05, %v6021_v28 }
0x17dd   : > { %7425 = vrsqrt.f32 %v6023_v34 }
0x17e6   : > { %v7424_v29 = vpop.eup %7423 }
0x17e7   : > { %v6026_v62 = vmul.f32 %v7424_v29, %v6012_v51 }
0x17e9   : > { %v6034_v11 = vmul.f32 %v6569_v4, %v6026_v62 }
0x17ea   : > { %v7426_v13 = vpop.eup %7425 }
0x17eb   : > { %v6042_v60 = vadd.f32 %v6570_v7, %v6034_v11   ;;  %v6027_v25 = vmul.f32 %v7426_v13, %v6013_v21 }
0x17ed   : > { %v6035_v0 = vmul.f32 %v6569_v4, %v6027_v25  ;;  %246 = sbr.rel (!%p244_p0) target bundleno = 178 (0xb2), region = 155 }
0x17ef   : > { %v6043_v61 = vadd.f32 %v6570_v7, %v6035_v0   ;;  %v8786_v0 = vmov %v6042_v60 }
0x17f1   : > { %v8785_v1 = vmov %v6043_v61  ;;  %v6069_v42 = vrot.slane (%p244_p0), %v6043_v61, 7 }
0x17f2   :  { %v6053_v1 = vld [vmem:[#allocation22 + $0x48] sm:$0xff] }
0x17f3   :  { %7066 = vmatpush3.msra.mxu0 %v6053_v1  ;;  %v6071_v48 = vsel %vm6070_vm10, %v6069_v42, %v6042_v60 }
0x17f4   :  { %7067 = vmatprep.subr.mxu0 %v7805_v18 }
0x17f5   :  { %7068 = vmatpush3.msra.mxu0 %v6052_v35 }
0x17f6   :  { %7069 = vmatprep.subr.mxu0 %v7805_v18 }
0x17f7   :  { %7070 = vmatpush3.msra.mxu0 %v6051_v40 }
0x17f8   :  { %7071 = vmatprep.subr.mxu0 %v7805_v18 }
0x17f9   :  { %7072 = vmatpush3.msra.mxu0 %v6050_v58 }
0x17fa   :  { %7073 = vmatprep.subr.mxu0 %v7805_v18 }
0x17fb   :  { %7074 = vmatpush3.msra.mxu0 %v6049_v39 }
0x17fc   :  { %7075 = vmatprep.subr.mxu0 %v7805_v18 }
0x17fd   :  { %7076 = vmatpush3.msra.mxu0 %v6048_v43 }
0x17fe   :  { %7077 = vmatprep.subr.mxu0 %v7805_v18 }
0x17ff   :  { %7078 = vmatpush3.msra.mxu0 %v6047_v45 }
0x1800   :  { %7079 = vmatprep.subr.mxu0 %v7805_v18 }
0x1801   :  { %7080 = vmatpush3.msra.mxu0 %v6046_v38 }
0x1802   :  { %7081 = vmatprep.subr.mxu0 %v7805_v18 }
0x1803   :  { %7082 = vmatpush3.msra.mxu0 %v6045_v44 }
0x1804   :  { %7083 = vmatprep.subr.mxu0 %v7805_v18 }
0x1805   :  { %7084 = vmatpush3.msra.mxu0 %v6044_v46 }
0x1806   :  { %7086 = vmatmul.mubr.f32.vlgmr.msra.gmra.mxu0 %v6071_v48 }
0x18c6   :  { %v6139_v54 = vpop.f32.mrf.mxu0 }
0x18c7   :  { %v6140_v55 = vadd.f32 %v6571_v2, %v6139_v54 }
0x18c8   :  { %v7087_v8 = vpop.f32.mrf.mxu0 }
0x18c9   :  { %v6150_v56 = vrot.slane %v6140_v55, %v6149_v53 }
0x18cb   :  { %6572 = vst.sshfl [vmem:[#allocation25] sm:$0x1 pattern:$0x73625140] %v6150_v56  ;;  %v6151_v9 = vcombine.high %v6150_v56, %v6150_v56 }
0x18cd   :  { %6573 = vst.sshfl [vmem:[#allocation25 + $0x1] sm:$0x1 pattern:$0x73625140] %v6151_v9 }
0x18ce   :  { %7718 = shalt.err (!%p7715_p5)
}
0x18cf   :  { %6181 = dma.vmem_to_hbm [thread:$0]  %s6176_s14, 32, %s8784_s15, [#allocation4], %s7773_s28, %s7773_s28, %s7774_s29  }
0x18d0   :  { %7755 = dma.done.wait [#allocation4], 32  }
0x18d1   :  { %7756 = vsyncadd [#allocation4], 4294967264 }
0x18d2   :  { %6185 = vsyncpa [#allocation3], 1 }
0x18d3   :  { %6186 = vsyncpa [#allocation6], 1 }
0x18d4   :  { %6187 = vsyncpa [#allocation9], 1 }
0x18d5   :  { %6188 = vsyncpa [#allocation12], 1 }
0x18d6   :  { %6189 = vsyncpa [#allocation15], 1 }
0x18d7   :  { %6190 = vsyncpa [#allocation18], 1 }
0x18d8   :  { %6191 = vsyncpa [#allocation21], 1 }
0x18d9   :  { %6192 = vsyncpa [#allocation24], 1 }
0x18da   :  { %6193 = vsyncpa [#allocation4], 1 }

</bundles_post_ra>
